<compile_context>
chip_gen: v6e
topology: v6e:2x2x1
jax: 0.10.0
libtpu: 0.0.40
codegen_flags: <defaults>
</compile_context>

<pallas_src>
import math

import jax
import jax.numpy as jnp
import numpy as np
from jax.experimental import pallas as pl
from jax.experimental.pallas import tpu as pltpu

EPS = 1e-5  # PyTorch LayerNorm default
LANE = 128  # TPU lane width


# ------------------------------ kernel helpers -------------------------------
def _layernorm(y, g, b):
    mean = jnp.mean(y, axis=-1, keepdims=True)
    var = jnp.mean((y - mean) ** 2, axis=-1, keepdims=True)
    return (y - mean) * jax.lax.rsqrt(var + EPS) * g + b


def _mlp(h, Ws, bs):
    """Linear->ReLU x3 then Linear (same as build_MLP)."""
    for i in range(3):
        h = jnp.maximum(
            jnp.dot(h, Ws[i], preferred_element_type=jnp.float32) + bs[i], 0.0
        )
    return jnp.dot(h, Ws[3], preferred_element_type=jnp.float32) + bs[3]


# ------------------------------ fused kernel ---------------------------------
def gmn_fused_kernel(
    x_ref, adj_ref,
    # encoder (MLP + LayerNorm)
    e_w0, e_b0, e_w1, e_b1, e_w2, e_b2, e_w3, e_b3, e_g, e_bt,
    # message passing, stacked over MP_NUM on the leading axis
    m_w0a, m_w0b, m_b0, m_w1, m_b1, m_w2, m_b2, m_w3, m_b3, m_g, m_bt,
    # decoder (MLP, no LayerNorm); final layer zero-padded to 128 lanes
    d_w0, d_b0, d_w1, d_b1, d_w2, d_b2, d_w3, d_b3,
    o_ref,
):
    x = x_ref[...]
    adj = adj_ref[...]

    # ---- Encoder ----
    h = _mlp(
        x,
        [e_w0[...], e_w1[...], e_w2[...], e_w3[...]],
        [e_b0[...], e_b1[...], e_b2[...], e_b3[...]],
    )
    h = _layernorm(h, e_g[...], e_bt[...])

    # ---- Message passing (h stays resident on-chip across steps) ----
    n_steps = m_w0a.shape[0]
    for s in range(n_steps):  # static unroll; MP_NUM is small
        agg = jnp.dot(adj, h, preferred_element_type=jnp.float32)
        # concat([h, agg]) @ W0 == h @ W0a + agg @ W0b
        t = (
            jnp.dot(h, m_w0a[s], preferred_element_type=jnp.float32)
            + jnp.dot(agg, m_w0b[s], preferred_element_type=jnp.float32)
            + m_b0[s]
        )
        t = jnp.maximum(t, 0.0)
        t = jnp.maximum(
            jnp.dot(t, m_w1[s], preferred_element_type=jnp.float32) + m_b1[s], 0.0
        )
        t = jnp.maximum(
            jnp.dot(t, m_w2[s], preferred_element_type=jnp.float32) + m_b2[s], 0.0
        )
        y = jnp.dot(t, m_w3[s], preferred_element_type=jnp.float32) + m_b3[s]
        h = _layernorm(y, m_g[s], m_bt[s])

    # ---- Decoder (lane-dense, unmasked final store) ----
    o_ref[...] = _mlp(
        h,
        [d_w0[...], d_w1[...], d_w2[...], d_w3[...]],
        [d_b0[...], d_b1[...], d_b2[...], d_b3[...]],
    )


# ------------------------------ pallas wrapper -------------------------------
def _full_spec(shape):
    nd = len(shape)
    return pl.BlockSpec(shape, lambda *_: (0,) * nd)


def gmn_forward(x, adj, enc_p, mp_ps, dec_p):
    n, _ = x.shape
    latent = enc_p["Ws"][3].shape[1]
    out_dim = dec_p["Ws"][3].shape[1]

    # Zero-pad the decoder's final Linear to a full lane width so the kernel's
    # single HBM writeback is an unmasked (lane-dense) store. Columns >=out_dim
    # are pure zero weights/biases and are sliced away below -> exact result.
    out_pad = max(LANE, ((out_dim + LANE - 1) // LANE) * LANE)
    d_w3 = dec_p["Ws"][3]
    d_b3 = dec_p["bs"][3]
    if out_pad != out_dim:
        d_w3 = jnp.pad(d_w3, ((0, 0), (0, out_pad - out_dim)))
        d_b3 = jnp.pad(d_b3, ((0, 0), (0, out_pad - out_dim)))

    # Stack per-step MP params; split W0 into self / aggregated halves.
    m_w0 = jnp.stack([p["Ws"][0] for p in mp_ps])            # (K, 2L, L)
    m_w0a, m_w0b = m_w0[:, :latent, :], m_w0[:, latent:, :]  # (K, L, L) each
    m_b0 = jnp.stack([p["bs"][0] for p in mp_ps])             # (K, 1, L)
    m_w1 = jnp.stack([p["Ws"][1] for p in mp_ps])
    m_b1 = jnp.stack([p["bs"][1] for p in mp_ps])
    m_w2 = jnp.stack([p["Ws"][2] for p in mp_ps])
    m_b2 = jnp.stack([p["bs"][2] for p in mp_ps])
    m_w3 = jnp.stack([p["Ws"][3] for p in mp_ps])
    m_b3 = jnp.stack([p["bs"][3] for p in mp_ps])
    m_g = jnp.stack([p["gamma"] for p in mp_ps])
    m_bt = jnp.stack([p["beta"] for p in mp_ps])

    args = [x, adj]
    args += [
        enc_p["Ws"][0], enc_p["bs"][0], enc_p["Ws"][1], enc_p["bs"][1],
        enc_p["Ws"][2], enc_p["bs"][2], enc_p["Ws"][3], enc_p["bs"][3],
        enc_p["gamma"], enc_p["beta"],
    ]
    args += [m_w0a, m_w0b, m_b0, m_w1, m_b1, m_w2, m_b2, m_w3, m_b3, m_g, m_bt]
    args += [
        dec_p["Ws"][0], dec_p["bs"][0], dec_p["Ws"][1], dec_p["bs"][1],
        dec_p["Ws"][2], dec_p["bs"][2], d_w3, d_b3,
    ]

    in_specs = [_full_spec(a.shape) for a in args]

    dec_full = pl.pallas_call(
        gmn_fused_kernel,
        out_shape=jax.ShapeDtypeStruct((n, out_pad), jnp.float32),
        grid=(1,),  # single block: the whole graph + weights fit in VMEM
        in_specs=in_specs,
        out_specs=_full_spec((n, out_pad)),
        compiler_params=pltpu.CompilerParams(
            dimension_semantics=("arbitrary",),
            vmem_limit_bytes=32 * 1024 * 1024,
        ),
    )(*args)

    return dec_full[:, 1:3]  # decoded_graph[:, 1:3]


# --------------------------- params / reference ------------------------------
def init_linear(key, in_dim, out_dim):
    k1, k2 = jax.random.split(key)
    bound = 1.0 / math.sqrt(in_dim)
    W = jax.random.uniform(k1, (in_dim, out_dim), jnp.float32, -bound, bound)
    b = jax.random.uniform(k2, (1, out_dim), jnp.float32, -bound, bound)
    return W, b


def init_mlp(key, in_dim, hidden, out_dim, *, ln):
    dims = [(in_dim, hidden), (hidden, hidden), (hidden, hidden), (hidden, out_dim)]
    keys = jax.random.split(key, 4)
    Ws, bs = [], []
    for k, (di, do) in zip(keys, dims):
        W, b = init_linear(k, di, do)
        Ws.append(W)
        bs.append(b)
    p = {"Ws": Ws, "bs": bs}
    if ln:
        p["gamma"] = jnp.ones((1, out_dim), jnp.float32)
        p["beta"] = jnp.zeros((1, out_dim), jnp.float32)
    return p


def mlp_ref(x, p, *, ln):
    h = x
    for i in range(3):
        h = jnp.maximum(
            jnp.dot(h, p["Ws"][i], precision=jax.lax.Precision.HIGHEST) + p["bs"][i],
            0.0,
        )
    y = jnp.dot(h, p["Ws"][3], precision=jax.lax.Precision.HIGHEST) + p["bs"][3]
    if ln:
        y = _layernorm(y, p["gamma"], p["beta"])
    return y


def gmn_ref(x, adj, enc_p, mp_ps, dec_p):
    h = mlp_ref(x, enc_p, ln=True)
    for p in mp_ps:
        agg = jnp.dot(adj, h, precision=jax.lax.Precision.HIGHEST)
        h = mlp_ref(jnp.concatenate([h, agg], axis=-1), p, ln=True)
    y = mlp_ref(h, dec_p, ln=False)
    return y[:, 1:3]


# ----------------------------------- main ------------------------------------
if __name__ == "__main__":
    NODE_ATTR = 4      # node_attr_size (>=3 so [:, 1:3] is valid)
    LATENT = 128       # latent_dim_size (lane-dense: full 128-lane vregs)
    MP_NUM = 2         # message_passing_num
    N_NODES = 64
    N_EDGES = 256

    key = jax.random.PRNGKey(0)
    kx, ke, kenc, kdec, *kmps = jax.random.split(key, 4 + MP_NUM)

    x = jax.random.normal(kx, (N_NODES, NODE_ATTR), jnp.float32)

    # random edge_index [2, E]; adjacency A[r, s] = #edges s->r (scatter_add)
    senders = jax.random.randint(ke, (N_EDGES,), 0, N_NODES)
    receivers = jax.random.randint(jax.random.fold_in(ke, 1), (N_EDGES,), 0, N_NODES)
    adj = jnp.zeros((N_NODES, N_NODES), jnp.float32).at[receivers, senders].add(1.0)

    enc_p = init_mlp(kenc, NODE_ATTR, LATENT, LATENT, ln=True)
    mp_ps = [init_mlp(k, 2 * LATENT, LATENT, LATENT, ln=True) for k in kmps]
    dec_p = init_mlp(kdec, LATENT, LATENT, NODE_ATTR, ln=False)

    fwd = jax.jit(gmn_forward)
    out = jax.block_until_ready(fwd(x, adj, enc_p, mp_ps, dec_p))

    ref = jax.block_until_ready(gmn_ref(x, adj, enc_p, mp_ps, dec_p))
    assert out.shape == (N_NODES, 2), out.shape
    np.testing.assert_allclose(np.asarray(out), np.asarray(ref), rtol=2e-3, atol=2e-3)

    print("KERNEL_OK")
</pallas_src>

<mosaic_0001>
module attributes {stable_mosaic.version = 11 : i64} {
  func.func @gmn_fused_kernel(%arg0: i32, %arg1: memref<64x4xf32, #tpu.memory_space<vmem>>, %arg2: memref<64x64xf32, #tpu.memory_space<vmem>>, %arg3: memref<4x128xf32, #tpu.memory_space<vmem>>, %arg4: memref<1x128xf32, #tpu.memory_space<vmem>>, %arg5: memref<128x128xf32, #tpu.memory_space<vmem>>, %arg6: memref<1x128xf32, #tpu.memory_space<vmem>>, %arg7: memref<128x128xf32, #tpu.memory_space<vmem>>, %arg8: memref<1x128xf32, #tpu.memory_space<vmem>>, %arg9: memref<128x128xf32, #tpu.memory_space<vmem>>, %arg10: memref<1x128xf32, #tpu.memory_space<vmem>>, %arg11: memref<1x128xf32, #tpu.memory_space<vmem>>, %arg12: memref<1x128xf32, #tpu.memory_space<vmem>>, %arg13: memref<2x128x128xf32, #tpu.memory_space<vmem>>, %arg14: memref<2x128x128xf32, #tpu.memory_space<vmem>>, %arg15: memref<2x1x128xf32, #tpu.memory_space<vmem>>, %arg16: memref<2x128x128xf32, #tpu.memory_space<vmem>>, %arg17: memref<2x1x128xf32, #tpu.memory_space<vmem>>, %arg18: memref<2x128x128xf32, #tpu.memory_space<vmem>>, %arg19: memref<2x1x128xf32, #tpu.memory_space<vmem>>, %arg20: memref<2x128x128xf32, #tpu.memory_space<vmem>>, %arg21: memref<2x1x128xf32, #tpu.memory_space<vmem>>, %arg22: memref<2x1x128xf32, #tpu.memory_space<vmem>>, %arg23: memref<2x1x128xf32, #tpu.memory_space<vmem>>, %arg24: memref<128x128xf32, #tpu.memory_space<vmem>>, %arg25: memref<1x128xf32, #tpu.memory_space<vmem>>, %arg26: memref<128x128xf32, #tpu.memory_space<vmem>>, %arg27: memref<1x128xf32, #tpu.memory_space<vmem>>, %arg28: memref<128x128xf32, #tpu.memory_space<vmem>>, %arg29: memref<1x128xf32, #tpu.memory_space<vmem>>, %arg30: memref<128x128xf32, #tpu.memory_space<vmem>>, %arg31: memref<1x128xf32, #tpu.memory_space<vmem>>, %arg32: memref<64x128xf32, #tpu.memory_space<vmem>>) attributes {dimension_semantics = [#tpu.dimension_semantics<arbitrary>], iteration_bounds = array<i64: 1>, scalar_prefetch = 0 : i64, scratch_operands = 0 : i64, tpu.core_type = #tpu.core_type<tc>, window_params = [{pipeline_mode = #tpu.pipeline_mode<synchronous>, transform_indices = @transform_0, window_bounds = array<i64: 64, 4>}, {pipeline_mode = #tpu.pipeline_mode<synchronous>, transform_indices = @transform_1, window_bounds = array<i64: 64, 64>}, {pipeline_mode = #tpu.pipeline_mode<synchronous>, transform_indices = @transform_2, window_bounds = array<i64: 4, 128>}, {pipeline_mode = #tpu.pipeline_mode<synchronous>, transform_indices = @transform_3, window_bounds = array<i64: 1, 128>}, {pipeline_mode = #tpu.pipeline_mode<synchronous>, transform_indices = @transform_4, window_bounds = array<i64: 128, 128>}, {pipeline_mode = #tpu.pipeline_mode<synchronous>, transform_indices = @transform_5, window_bounds = array<i64: 1, 128>}, {pipeline_mode = #tpu.pipeline_mode<synchronous>, transform_indices = @transform_6, window_bounds = array<i64: 128, 128>}, {pipeline_mode = #tpu.pipeline_mode<synchronous>, transform_indices = @transform_7, window_bounds = array<i64: 1, 128>}, {pipeline_mode = #tpu.pipeline_mode<synchronous>, transform_indices = @transform_8, window_bounds = array<i64: 128, 128>}, {pipeline_mode = #tpu.pipeline_mode<synchronous>, transform_indices = @transform_9, window_bounds = array<i64: 1, 128>}, {pipeline_mode = #tpu.pipeline_mode<synchronous>, transform_indices = @transform_10, window_bounds = array<i64: 1, 128>}, {pipeline_mode = #tpu.pipeline_mode<synchronous>, transform_indices = @transform_11, window_bounds = array<i64: 1, 128>}, {pipeline_mode = #tpu.pipeline_mode<synchronous>, transform_indices = @transform_12, window_bounds = array<i64: 2, 128, 128>}, {pipeline_mode = #tpu.pipeline_mode<synchronous>, transform_indices = @transform_13, window_bounds = array<i64: 2, 128, 128>}, {pipeline_mode = #tpu.pipeline_mode<synchronous>, transform_indices = @transform_14, window_bounds = array<i64: 2, 1, 128>}, {pipeline_mode = #tpu.pipeline_mode<synchronous>, transform_indices = @transform_15, window_bounds = array<i64: 2, 128, 128>}, {pipeline_mode = #tpu.pipeline_mode<synchronous>, transform_indices = @transform_16, window_bounds = array<i64: 2, 1, 128>}, {pipeline_mode = #tpu.pipeline_mode<synchronous>, transform_indices = @transform_17, window_bounds = array<i64: 2, 128, 128>}, {pipeline_mode = #tpu.pipeline_mode<synchronous>, transform_indices = @transform_18, window_bounds = array<i64: 2, 1, 128>}, {pipeline_mode = #tpu.pipeline_mode<synchronous>, transform_indices = @transform_19, window_bounds = array<i64: 2, 128, 128>}, {pipeline_mode = #tpu.pipeline_mode<synchronous>, transform_indices = @transform_20, window_bounds = array<i64: 2, 1, 128>}, {pipeline_mode = #tpu.pipeline_mode<synchronous>, transform_indices = @transform_21, window_bounds = array<i64: 2, 1, 128>}, {pipeline_mode = #tpu.pipeline_mode<synchronous>, transform_indices = @transform_22, window_bounds = array<i64: 2, 1, 128>}, {pipeline_mode = #tpu.pipeline_mode<synchronous>, transform_indices = @transform_23, window_bounds = array<i64: 128, 128>}, {pipeline_mode = #tpu.pipeline_mode<synchronous>, transform_indices = @transform_24, window_bounds = array<i64: 1, 128>}, {pipeline_mode = #tpu.pipeline_mode<synchronous>, transform_indices = @transform_25, window_bounds = array<i64: 128, 128>}, {pipeline_mode = #tpu.pipeline_mode<synchronous>, transform_indices = @transform_26, window_bounds = array<i64: 1, 128>}, {pipeline_mode = #tpu.pipeline_mode<synchronous>, transform_indices = @transform_27, window_bounds = array<i64: 128, 128>}, {pipeline_mode = #tpu.pipeline_mode<synchronous>, transform_indices = @transform_28, window_bounds = array<i64: 1, 128>}, {pipeline_mode = #tpu.pipeline_mode<synchronous>, transform_indices = @transform_29, window_bounds = array<i64: 128, 128>}, {pipeline_mode = #tpu.pipeline_mode<synchronous>, transform_indices = @transform_30, window_bounds = array<i64: 1, 128>}, {pipeline_mode = #tpu.pipeline_mode<synchronous>, transform_indices = @transform_31, window_bounds = array<i64: 64, 128>}]} {
    %c0 = arith.constant 0 : index
    %c0_0 = arith.constant 0 : index
    %0 = vector.load %arg1[%c0, %c0_0] : memref<64x4xf32, #tpu.memory_space<vmem>>, vector<64x4xf32>
    %c0_1 = arith.constant 0 : index
    %c0_2 = arith.constant 0 : index
    %1 = vector.load %arg2[%c0_1, %c0_2] : memref<64x64xf32, #tpu.memory_space<vmem>>, vector<64x64xf32>
    %c0_3 = arith.constant 0 : index
    %c0_4 = arith.constant 0 : index
    %2 = vector.load %arg3[%c0_3, %c0_4] : memref<4x128xf32, #tpu.memory_space<vmem>>, vector<4x128xf32>
    %c0_5 = arith.constant 0 : index
    %c0_6 = arith.constant 0 : index
    %3 = vector.load %arg5[%c0_5, %c0_6] : memref<128x128xf32, #tpu.memory_space<vmem>>, vector<128x128xf32>
    %c0_7 = arith.constant 0 : index
    %c0_8 = arith.constant 0 : index
    %4 = vector.load %arg7[%c0_7, %c0_8] : memref<128x128xf32, #tpu.memory_space<vmem>>, vector<128x128xf32>
    %c0_9 = arith.constant 0 : index
    %c0_10 = arith.constant 0 : index
    %5 = vector.load %arg9[%c0_9, %c0_10] : memref<128x128xf32, #tpu.memory_space<vmem>>, vector<128x128xf32>
    %c0_11 = arith.constant 0 : index
    %c0_12 = arith.constant 0 : index
    %6 = vector.load %arg4[%c0_11, %c0_12] : memref<1x128xf32, #tpu.memory_space<vmem>>, vector<1x128xf32>
    %c0_13 = arith.constant 0 : index
    %c0_14 = arith.constant 0 : index
    %7 = vector.load %arg6[%c0_13, %c0_14] : memref<1x128xf32, #tpu.memory_space<vmem>>, vector<1x128xf32>
    %c0_15 = arith.constant 0 : index
    %c0_16 = arith.constant 0 : index
    %8 = vector.load %arg8[%c0_15, %c0_16] : memref<1x128xf32, #tpu.memory_space<vmem>>, vector<1x128xf32>
    %c0_17 = arith.constant 0 : index
    %c0_18 = arith.constant 0 : index
    %9 = vector.load %arg10[%c0_17, %c0_18] : memref<1x128xf32, #tpu.memory_space<vmem>>, vector<1x128xf32>
    %cst = arith.constant dense<0.000000e+00> : vector<64x128xf32>
    %10 = tpu.matmul %0, %2, %cst {dimension_numbers = #tpu.dot_dimension_numbers<[1], [0], [0], [1], [0, 0, 1, 1], [], []>} : vector<64x4xf32>, vector<4x128xf32>, vector<64x128xf32> -> vector<64x128xf32>
    %11 = vector.broadcast %6 : vector<1x128xf32> to vector<64x128xf32>
    %12 = arith.addf %10, %11 : vector<64x128xf32>
    %cst_19 = arith.constant 0.000000e+00 : f32
    %13 = vector.broadcast %cst_19 : f32 to vector<64x128xf32>
    %14 = arith.maximumf %12, %13 : vector<64x128xf32>
    %cst_20 = arith.constant dense<0.000000e+00> : vector<64x128xf32>
    %15 = tpu.matmul %14, %3, %cst_20 {dimension_numbers = #tpu.dot_dimension_numbers<[1], [0], [0], [1], [0, 0, 1, 1], [], []>} : vector<64x128xf32>, vector<128x128xf32>, vector<64x128xf32> -> vector<64x128xf32>
    %16 = vector.broadcast %7 : vector<1x128xf32> to vector<64x128xf32>
    %17 = arith.addf %15, %16 : vector<64x128xf32>
    %cst_21 = arith.constant 0.000000e+00 : f32
    %18 = vector.broadcast %cst_21 : f32 to vector<64x128xf32>
    %19 = arith.maximumf %17, %18 : vector<64x128xf32>
    %cst_22 = arith.constant dense<0.000000e+00> : vector<64x128xf32>
    %20 = tpu.matmul %19, %4, %cst_22 {dimension_numbers = #tpu.dot_dimension_numbers<[1], [0], [0], [1], [0, 0, 1, 1], [], []>} : vector<64x128xf32>, vector<128x128xf32>, vector<64x128xf32> -> vector<64x128xf32>
    %21 = vector.broadcast %8 : vector<1x128xf32> to vector<64x128xf32>
    %22 = arith.addf %20, %21 : vector<64x128xf32>
    %cst_23 = arith.constant 0.000000e+00 : f32
    %23 = vector.broadcast %cst_23 : f32 to vector<64x128xf32>
    %24 = arith.maximumf %22, %23 : vector<64x128xf32>
    %cst_24 = arith.constant dense<0.000000e+00> : vector<64x128xf32>
    %25 = tpu.matmul %24, %5, %cst_24 {dimension_numbers = #tpu.dot_dimension_numbers<[1], [0], [0], [1], [0, 0, 1, 1], [], []>} : vector<64x128xf32>, vector<128x128xf32>, vector<64x128xf32> -> vector<64x128xf32>
    %26 = vector.broadcast %9 : vector<1x128xf32> to vector<64x128xf32>
    %27 = arith.addf %25, %26 : vector<64x128xf32>
    %c0_25 = arith.constant 0 : index
    %c0_26 = arith.constant 0 : index
    %28 = vector.load %arg11[%c0_25, %c0_26] : memref<1x128xf32, #tpu.memory_space<vmem>>, vector<1x128xf32>
    %c0_27 = arith.constant 0 : index
    %c0_28 = arith.constant 0 : index
    %29 = vector.load %arg12[%c0_27, %c0_28] : memref<1x128xf32, #tpu.memory_space<vmem>>, vector<1x128xf32>
    %cst_29 = arith.constant dense<0.000000e+00> : vector<64xf32>
    %30 = vector.multi_reduction <add>, %27, %cst_29 [1] : vector<64x128xf32> to vector<64xf32>
    %31 = vector.shape_cast %30 : vector<64xf32> to vector<64x1xf32>
    %cst_30 = arith.constant 1.280000e+02 : f32
    %32 = vector.broadcast %cst_30 : f32 to vector<64x1xf32>
    %33 = arith.divf %31, %32 : vector<64x1xf32>
    %34 = vector.broadcast %33 : vector<64x1xf32> to vector<64x128xf32>
    %35 = arith.subf %27, %34 : vector<64x128xf32>
    %36 = arith.mulf %35, %35 : vector<64x128xf32>
    %cst_31 = arith.constant dense<0.000000e+00> : vector<64xf32>
    %37 = vector.multi_reduction <add>, %36, %cst_31 [1] : vector<64x128xf32> to vector<64xf32>
    %38 = vector.shape_cast %37 : vector<64xf32> to vector<64x1xf32>
    %cst_32 = arith.constant 1.280000e+02 : f32
    %39 = vector.broadcast %cst_32 : f32 to vector<64x1xf32>
    %40 = arith.divf %38, %39 : vector<64x1xf32>
    %41 = vector.broadcast %33 : vector<64x1xf32> to vector<64x128xf32>
    %42 = arith.subf %27, %41 : vector<64x128xf32>
    %cst_33 = arith.constant 9.99999974E-6 : f32
    %43 = vector.broadcast %cst_33 : f32 to vector<64x1xf32>
    %44 = arith.addf %40, %43 : vector<64x1xf32>
    %45 = math.rsqrt %44 : vector<64x1xf32>
    %46 = vector.broadcast %45 : vector<64x1xf32> to vector<64x128xf32>
    %47 = arith.mulf %42, %46 : vector<64x128xf32>
    %48 = vector.broadcast %28 : vector<1x128xf32> to vector<64x128xf32>
    %49 = arith.mulf %47, %48 : vector<64x128xf32>
    %50 = vector.broadcast %29 : vector<1x128xf32> to vector<64x128xf32>
    %51 = arith.addf %49, %50 : vector<64x128xf32>
    %cst_34 = arith.constant dense<0.000000e+00> : vector<64x128xf32>
    %52 = tpu.matmul %1, %51, %cst_34 {dimension_numbers = #tpu.dot_dimension_numbers<[1], [0], [0], [1], [0, 0, 1, 1], [], []>} : vector<64x64xf32>, vector<64x128xf32>, vector<64x128xf32> -> vector<64x128xf32>
    %c0_35 = arith.constant 0 : index
    %c0_36 = arith.constant 0 : index
    %c0_37 = arith.constant 0 : index
    %53 = vector.load %arg13[%c0_35, %c0_36, %c0_37] : memref<2x128x128xf32, #tpu.memory_space<vmem>>, vector<1x128x128xf32>
    %54 = vector.shape_cast %53 : vector<1x128x128xf32> to vector<128x128xf32>
    %cst_38 = arith.constant dense<0.000000e+00> : vector<64x128xf32>
    %55 = tpu.matmul %51, %54, %cst_38 {dimension_numbers = #tpu.dot_dimension_numbers<[1], [0], [0], [1], [0, 0, 1, 1], [], []>} : vector<64x128xf32>, vector<128x128xf32>, vector<64x128xf32> -> vector<64x128xf32>
    %c0_39 = arith.constant 0 : index
    %c0_40 = arith.constant 0 : index
    %c0_41 = arith.constant 0 : index
    %56 = vector.load %arg14[%c0_39, %c0_40, %c0_41] : memref<2x128x128xf32, #tpu.memory_space<vmem>>, vector<1x128x128xf32>
    %57 = vector.shape_cast %56 : vector<1x128x128xf32> to vector<128x128xf32>
    %cst_42 = arith.constant dense<0.000000e+00> : vector<64x128xf32>
    %58 = tpu.matmul %52, %57, %cst_42 {dimension_numbers = #tpu.dot_dimension_numbers<[1], [0], [0], [1], [0, 0, 1, 1], [], []>} : vector<64x128xf32>, vector<128x128xf32>, vector<64x128xf32> -> vector<64x128xf32>
    %59 = arith.addf %55, %58 : vector<64x128xf32>
    %c0_43 = arith.constant 0 : index
    %c0_44 = arith.constant 0 : index
    %c0_45 = arith.constant 0 : index
    %60 = vector.load %arg15[%c0_43, %c0_44, %c0_45] : memref<2x1x128xf32, #tpu.memory_space<vmem>>, vector<1x1x128xf32>
    %61 = vector.shape_cast %60 : vector<1x1x128xf32> to vector<1x128xf32>
    %62 = vector.broadcast %61 : vector<1x128xf32> to vector<64x128xf32>
    %63 = arith.addf %59, %62 : vector<64x128xf32>
    %cst_46 = arith.constant 0.000000e+00 : f32
    %64 = vector.broadcast %cst_46 : f32 to vector<64x128xf32>
    %65 = arith.maximumf %63, %64 : vector<64x128xf32>
    %c0_47 = arith.constant 0 : index
    %c0_48 = arith.constant 0 : index
    %c0_49 = arith.constant 0 : index
    %66 = vector.load %arg16[%c0_47, %c0_48, %c0_49] : memref<2x128x128xf32, #tpu.memory_space<vmem>>, vector<1x128x128xf32>
    %67 = vector.shape_cast %66 : vector<1x128x128xf32> to vector<128x128xf32>
    %cst_50 = arith.constant dense<0.000000e+00> : vector<64x128xf32>
    %68 = tpu.matmul %65, %67, %cst_50 {dimension_numbers = #tpu.dot_dimension_numbers<[1], [0], [0], [1], [0, 0, 1, 1], [], []>} : vector<64x128xf32>, vector<128x128xf32>, vector<64x128xf32> -> vector<64x128xf32>
    %c0_51 = arith.constant 0 : index
    %c0_52 = arith.constant 0 : index
    %c0_53 = arith.constant 0 : index
    %69 = vector.load %arg17[%c0_51, %c0_52, %c0_53] : memref<2x1x128xf32, #tpu.memory_space<vmem>>, vector<1x1x128xf32>
    %70 = vector.shape_cast %69 : vector<1x1x128xf32> to vector<1x128xf32>
    %71 = vector.broadcast %70 : vector<1x128xf32> to vector<64x128xf32>
    %72 = arith.addf %68, %71 : vector<64x128xf32>
    %cst_54 = arith.constant 0.000000e+00 : f32
    %73 = vector.broadcast %cst_54 : f32 to vector<64x128xf32>
    %74 = arith.maximumf %72, %73 : vector<64x128xf32>
    %c0_55 = arith.constant 0 : index
    %c0_56 = arith.constant 0 : index
    %c0_57 = arith.constant 0 : index
    %75 = vector.load %arg18[%c0_55, %c0_56, %c0_57] : memref<2x128x128xf32, #tpu.memory_space<vmem>>, vector<1x128x128xf32>
    %76 = vector.shape_cast %75 : vector<1x128x128xf32> to vector<128x128xf32>
    %cst_58 = arith.constant dense<0.000000e+00> : vector<64x128xf32>
    %77 = tpu.matmul %74, %76, %cst_58 {dimension_numbers = #tpu.dot_dimension_numbers<[1], [0], [0], [1], [0, 0, 1, 1], [], []>} : vector<64x128xf32>, vector<128x128xf32>, vector<64x128xf32> -> vector<64x128xf32>
    %c0_59 = arith.constant 0 : index
    %c0_60 = arith.constant 0 : index
    %c0_61 = arith.constant 0 : index
    %78 = vector.load %arg19[%c0_59, %c0_60, %c0_61] : memref<2x1x128xf32, #tpu.memory_space<vmem>>, vector<1x1x128xf32>
    %79 = vector.shape_cast %78 : vector<1x1x128xf32> to vector<1x128xf32>
    %80 = vector.broadcast %79 : vector<1x128xf32> to vector<64x128xf32>
    %81 = arith.addf %77, %80 : vector<64x128xf32>
    %cst_62 = arith.constant 0.000000e+00 : f32
    %82 = vector.broadcast %cst_62 : f32 to vector<64x128xf32>
    %83 = arith.maximumf %81, %82 : vector<64x128xf32>
    %c0_63 = arith.constant 0 : index
    %c0_64 = arith.constant 0 : index
    %c0_65 = arith.constant 0 : index
    %84 = vector.load %arg20[%c0_63, %c0_64, %c0_65] : memref<2x128x128xf32, #tpu.memory_space<vmem>>, vector<1x128x128xf32>
    %85 = vector.shape_cast %84 : vector<1x128x128xf32> to vector<128x128xf32>
    %cst_66 = arith.constant dense<0.000000e+00> : vector<64x128xf32>
    %86 = tpu.matmul %83, %85, %cst_66 {dimension_numbers = #tpu.dot_dimension_numbers<[1], [0], [0], [1], [0, 0, 1, 1], [], []>} : vector<64x128xf32>, vector<128x128xf32>, vector<64x128xf32> -> vector<64x128xf32>
    %c0_67 = arith.constant 0 : index
    %c0_68 = arith.constant 0 : index
    %c0_69 = arith.constant 0 : index
    %87 = vector.load %arg21[%c0_67, %c0_68, %c0_69] : memref<2x1x128xf32, #tpu.memory_space<vmem>>, vector<1x1x128xf32>
    %88 = vector.shape_cast %87 : vector<1x1x128xf32> to vector<1x128xf32>
    %89 = vector.broadcast %88 : vector<1x128xf32> to vector<64x128xf32>
    %90 = arith.addf %86, %89 : vector<64x128xf32>
    %c0_70 = arith.constant 0 : index
    %c0_71 = arith.constant 0 : index
    %c0_72 = arith.constant 0 : index
    %91 = vector.load %arg22[%c0_70, %c0_71, %c0_72] : memref<2x1x128xf32, #tpu.memory_space<vmem>>, vector<1x1x128xf32>
    %92 = vector.shape_cast %91 : vector<1x1x128xf32> to vector<1x128xf32>
    %c0_73 = arith.constant 0 : index
    %c0_74 = arith.constant 0 : index
    %c0_75 = arith.constant 0 : index
    %93 = vector.load %arg23[%c0_73, %c0_74, %c0_75] : memref<2x1x128xf32, #tpu.memory_space<vmem>>, vector<1x1x128xf32>
    %94 = vector.shape_cast %93 : vector<1x1x128xf32> to vector<1x128xf32>
    %cst_76 = arith.constant dense<0.000000e+00> : vector<64xf32>
    %95 = vector.multi_reduction <add>, %90, %cst_76 [1] : vector<64x128xf32> to vector<64xf32>
    %96 = vector.shape_cast %95 : vector<64xf32> to vector<64x1xf32>
    %cst_77 = arith.constant 1.280000e+02 : f32
    %97 = vector.broadcast %cst_77 : f32 to vector<64x1xf32>
    %98 = arith.divf %96, %97 : vector<64x1xf32>
    %99 = vector.broadcast %98 : vector<64x1xf32> to vector<64x128xf32>
    %100 = arith.subf %90, %99 : vector<64x128xf32>
    %101 = arith.mulf %100, %100 : vector<64x128xf32>
    %cst_78 = arith.constant dense<0.000000e+00> : vector<64xf32>
    %102 = vector.multi_reduction <add>, %101, %cst_78 [1] : vector<64x128xf32> to vector<64xf32>
    %103 = vector.shape_cast %102 : vector<64xf32> to vector<64x1xf32>
    %cst_79 = arith.constant 1.280000e+02 : f32
    %104 = vector.broadcast %cst_79 : f32 to vector<64x1xf32>
    %105 = arith.divf %103, %104 : vector<64x1xf32>
    %106 = vector.broadcast %98 : vector<64x1xf32> to vector<64x128xf32>
    %107 = arith.subf %90, %106 : vector<64x128xf32>
    %cst_80 = arith.constant 9.99999974E-6 : f32
    %108 = vector.broadcast %cst_80 : f32 to vector<64x1xf32>
    %109 = arith.addf %105, %108 : vector<64x1xf32>
    %110 = math.rsqrt %109 : vector<64x1xf32>
    %111 = vector.broadcast %110 : vector<64x1xf32> to vector<64x128xf32>
    %112 = arith.mulf %107, %111 : vector<64x128xf32>
    %113 = vector.broadcast %92 : vector<1x128xf32> to vector<64x128xf32>
    %114 = arith.mulf %112, %113 : vector<64x128xf32>
    %115 = vector.broadcast %94 : vector<1x128xf32> to vector<64x128xf32>
    %116 = arith.addf %114, %115 : vector<64x128xf32>
    %cst_81 = arith.constant dense<0.000000e+00> : vector<64x128xf32>
    %117 = tpu.matmul %1, %116, %cst_81 {dimension_numbers = #tpu.dot_dimension_numbers<[1], [0], [0], [1], [0, 0, 1, 1], [], []>} : vector<64x64xf32>, vector<64x128xf32>, vector<64x128xf32> -> vector<64x128xf32>
    %c1 = arith.constant 1 : index
    %c0_82 = arith.constant 0 : index
    %c0_83 = arith.constant 0 : index
    %118 = vector.load %arg13[%c1, %c0_82, %c0_83] : memref<2x128x128xf32, #tpu.memory_space<vmem>>, vector<1x128x128xf32>
    %119 = vector.shape_cast %118 : vector<1x128x128xf32> to vector<128x128xf32>
    %cst_84 = arith.constant dense<0.000000e+00> : vector<64x128xf32>
    %120 = tpu.matmul %116, %119, %cst_84 {dimension_numbers = #tpu.dot_dimension_numbers<[1], [0], [0], [1], [0, 0, 1, 1], [], []>} : vector<64x128xf32>, vector<128x128xf32>, vector<64x128xf32> -> vector<64x128xf32>
    %c1_85 = arith.constant 1 : index
    %c0_86 = arith.constant 0 : index
    %c0_87 = arith.constant 0 : index
    %121 = vector.load %arg14[%c1_85, %c0_86, %c0_87] : memref<2x128x128xf32, #tpu.memory_space<vmem>>, vector<1x128x128xf32>
    %122 = vector.shape_cast %121 : vector<1x128x128xf32> to vector<128x128xf32>
    %cst_88 = arith.constant dense<0.000000e+00> : vector<64x128xf32>
    %123 = tpu.matmul %117, %122, %cst_88 {dimension_numbers = #tpu.dot_dimension_numbers<[1], [0], [0], [1], [0, 0, 1, 1], [], []>} : vector<64x128xf32>, vector<128x128xf32>, vector<64x128xf32> -> vector<64x128xf32>
    %124 = arith.addf %120, %123 : vector<64x128xf32>
    %c1_89 = arith.constant 1 : index
    %c0_90 = arith.constant 0 : index
    %c0_91 = arith.constant 0 : index
    %125 = vector.load %arg15[%c1_89, %c0_90, %c0_91] : memref<2x1x128xf32, #tpu.memory_space<vmem>>, vector<1x1x128xf32>
    %126 = vector.shape_cast %125 : vector<1x1x128xf32> to vector<1x128xf32>
    %127 = vector.broadcast %126 : vector<1x128xf32> to vector<64x128xf32>
    %128 = arith.addf %124, %127 : vector<64x128xf32>
    %cst_92 = arith.constant 0.000000e+00 : f32
    %129 = vector.broadcast %cst_92 : f32 to vector<64x128xf32>
    %130 = arith.maximumf %128, %129 : vector<64x128xf32>
    %c1_93 = arith.constant 1 : index
    %c0_94 = arith.constant 0 : index
    %c0_95 = arith.constant 0 : index
    %131 = vector.load %arg16[%c1_93, %c0_94, %c0_95] : memref<2x128x128xf32, #tpu.memory_space<vmem>>, vector<1x128x128xf32>
    %132 = vector.shape_cast %131 : vector<1x128x128xf32> to vector<128x128xf32>
    %cst_96 = arith.constant dense<0.000000e+00> : vector<64x128xf32>
    %133 = tpu.matmul %130, %132, %cst_96 {dimension_numbers = #tpu.dot_dimension_numbers<[1], [0], [0], [1], [0, 0, 1, 1], [], []>} : vector<64x128xf32>, vector<128x128xf32>, vector<64x128xf32> -> vector<64x128xf32>
    %c1_97 = arith.constant 1 : index
    %c0_98 = arith.constant 0 : index
    %c0_99 = arith.constant 0 : index
    %134 = vector.load %arg17[%c1_97, %c0_98, %c0_99] : memref<2x1x128xf32, #tpu.memory_space<vmem>>, vector<1x1x128xf32>
    %135 = vector.shape_cast %134 : vector<1x1x128xf32> to vector<1x128xf32>
    %136 = vector.broadcast %135 : vector<1x128xf32> to vector<64x128xf32>
    %137 = arith.addf %133, %136 : vector<64x128xf32>
    %cst_100 = arith.constant 0.000000e+00 : f32
    %138 = vector.broadcast %cst_100 : f32 to vector<64x128xf32>
    %139 = arith.maximumf %137, %138 : vector<64x128xf32>
    %c1_101 = arith.constant 1 : index
    %c0_102 = arith.constant 0 : index
    %c0_103 = arith.constant 0 : index
    %140 = vector.load %arg18[%c1_101, %c0_102, %c0_103] : memref<2x128x128xf32, #tpu.memory_space<vmem>>, vector<1x128x128xf32>
    %141 = vector.shape_cast %140 : vector<1x128x128xf32> to vector<128x128xf32>
    %cst_104 = arith.constant dense<0.000000e+00> : vector<64x128xf32>
    %142 = tpu.matmul %139, %141, %cst_104 {dimension_numbers = #tpu.dot_dimension_numbers<[1], [0], [0], [1], [0, 0, 1, 1], [], []>} : vector<64x128xf32>, vector<128x128xf32>, vector<64x128xf32> -> vector<64x128xf32>
    %c1_105 = arith.constant 1 : index
    %c0_106 = arith.constant 0 : index
    %c0_107 = arith.constant 0 : index
    %143 = vector.load %arg19[%c1_105, %c0_106, %c0_107] : memref<2x1x128xf32, #tpu.memory_space<vmem>>, vector<1x1x128xf32>
    %144 = vector.shape_cast %143 : vector<1x1x128xf32> to vector<1x128xf32>
    %145 = vector.broadcast %144 : vector<1x128xf32> to vector<64x128xf32>
    %146 = arith.addf %142, %145 : vector<64x128xf32>
    %cst_108 = arith.constant 0.000000e+00 : f32
    %147 = vector.broadcast %cst_108 : f32 to vector<64x128xf32>
    %148 = arith.maximumf %146, %147 : vector<64x128xf32>
    %c1_109 = arith.constant 1 : index
    %c0_110 = arith.constant 0 : index
    %c0_111 = arith.constant 0 : index
    %149 = vector.load %arg20[%c1_109, %c0_110, %c0_111] : memref<2x128x128xf32, #tpu.memory_space<vmem>>, vector<1x128x128xf32>
    %150 = vector.shape_cast %149 : vector<1x128x128xf32> to vector<128x128xf32>
    %cst_112 = arith.constant dense<0.000000e+00> : vector<64x128xf32>
    %151 = tpu.matmul %148, %150, %cst_112 {dimension_numbers = #tpu.dot_dimension_numbers<[1], [0], [0], [1], [0, 0, 1, 1], [], []>} : vector<64x128xf32>, vector<128x128xf32>, vector<64x128xf32> -> vector<64x128xf32>
    %c1_113 = arith.constant 1 : index
    %c0_114 = arith.constant 0 : index
    %c0_115 = arith.constant 0 : index
    %152 = vector.load %arg21[%c1_113, %c0_114, %c0_115] : memref<2x1x128xf32, #tpu.memory_space<vmem>>, vector<1x1x128xf32>
    %153 = vector.shape_cast %152 : vector<1x1x128xf32> to vector<1x128xf32>
    %154 = vector.broadcast %153 : vector<1x128xf32> to vector<64x128xf32>
    %155 = arith.addf %151, %154 : vector<64x128xf32>
    %c1_116 = arith.constant 1 : index
    %c0_117 = arith.constant 0 : index
    %c0_118 = arith.constant 0 : index
    %156 = vector.load %arg22[%c1_116, %c0_117, %c0_118] : memref<2x1x128xf32, #tpu.memory_space<vmem>>, vector<1x1x128xf32>
    %157 = vector.shape_cast %156 : vector<1x1x128xf32> to vector<1x128xf32>
    %c1_119 = arith.constant 1 : index
    %c0_120 = arith.constant 0 : index
    %c0_121 = arith.constant 0 : index
    %158 = vector.load %arg23[%c1_119, %c0_120, %c0_121] : memref<2x1x128xf32, #tpu.memory_space<vmem>>, vector<1x1x128xf32>
    %159 = vector.shape_cast %158 : vector<1x1x128xf32> to vector<1x128xf32>
    %cst_122 = arith.constant dense<0.000000e+00> : vector<64xf32>
    %160 = vector.multi_reduction <add>, %155, %cst_122 [1] : vector<64x128xf32> to vector<64xf32>
    %161 = vector.shape_cast %160 : vector<64xf32> to vector<64x1xf32>
    %cst_123 = arith.constant 1.280000e+02 : f32
    %162 = vector.broadcast %cst_123 : f32 to vector<64x1xf32>
    %163 = arith.divf %161, %162 : vector<64x1xf32>
    %164 = vector.broadcast %163 : vector<64x1xf32> to vector<64x128xf32>
    %165 = arith.subf %155, %164 : vector<64x128xf32>
    %166 = arith.mulf %165, %165 : vector<64x128xf32>
    %cst_124 = arith.constant dense<0.000000e+00> : vector<64xf32>
    %167 = vector.multi_reduction <add>, %166, %cst_124 [1] : vector<64x128xf32> to vector<64xf32>
    %168 = vector.shape_cast %167 : vector<64xf32> to vector<64x1xf32>
    %cst_125 = arith.constant 1.280000e+02 : f32
    %169 = vector.broadcast %cst_125 : f32 to vector<64x1xf32>
    %170 = arith.divf %168, %169 : vector<64x1xf32>
    %171 = vector.broadcast %163 : vector<64x1xf32> to vector<64x128xf32>
    %172 = arith.subf %155, %171 : vector<64x128xf32>
    %cst_126 = arith.constant 9.99999974E-6 : f32
    %173 = vector.broadcast %cst_126 : f32 to vector<64x1xf32>
    %174 = arith.addf %170, %173 : vector<64x1xf32>
    %175 = math.rsqrt %174 : vector<64x1xf32>
    %176 = vector.broadcast %175 : vector<64x1xf32> to vector<64x128xf32>
    %177 = arith.mulf %172, %176 : vector<64x128xf32>
    %178 = vector.broadcast %157 : vector<1x128xf32> to vector<64x128xf32>
    %179 = arith.mulf %177, %178 : vector<64x128xf32>
    %180 = vector.broadcast %159 : vector<1x128xf32> to vector<64x128xf32>
    %181 = arith.addf %179, %180 : vector<64x128xf32>
    %c0_127 = arith.constant 0 : index
    %c0_128 = arith.constant 0 : index
    %182 = vector.load %arg24[%c0_127, %c0_128] : memref<128x128xf32, #tpu.memory_space<vmem>>, vector<128x128xf32>
    %c0_129 = arith.constant 0 : index
    %c0_130 = arith.constant 0 : index
    %183 = vector.load %arg26[%c0_129, %c0_130] : memref<128x128xf32, #tpu.memory_space<vmem>>, vector<128x128xf32>
    %c0_131 = arith.constant 0 : index
    %c0_132 = arith.constant 0 : index
    %184 = vector.load %arg28[%c0_131, %c0_132] : memref<128x128xf32, #tpu.memory_space<vmem>>, vector<128x128xf32>
    %c0_133 = arith.constant 0 : index
    %c0_134 = arith.constant 0 : index
    %185 = vector.load %arg30[%c0_133, %c0_134] : memref<128x128xf32, #tpu.memory_space<vmem>>, vector<128x128xf32>
    %c0_135 = arith.constant 0 : index
    %c0_136 = arith.constant 0 : index
    %186 = vector.load %arg25[%c0_135, %c0_136] : memref<1x128xf32, #tpu.memory_space<vmem>>, vector<1x128xf32>
    %c0_137 = arith.constant 0 : index
    %c0_138 = arith.constant 0 : index
    %187 = vector.load %arg27[%c0_137, %c0_138] : memref<1x128xf32, #tpu.memory_space<vmem>>, vector<1x128xf32>
    %c0_139 = arith.constant 0 : index
    %c0_140 = arith.constant 0 : index
    %188 = vector.load %arg29[%c0_139, %c0_140] : memref<1x128xf32, #tpu.memory_space<vmem>>, vector<1x128xf32>
    %c0_141 = arith.constant 0 : index
    %c0_142 = arith.constant 0 : index
    %189 = vector.load %arg31[%c0_141, %c0_142] : memref<1x128xf32, #tpu.memory_space<vmem>>, vector<1x128xf32>
    %cst_143 = arith.constant dense<0.000000e+00> : vector<64x128xf32>
    %190 = tpu.matmul %181, %182, %cst_143 {dimension_numbers = #tpu.dot_dimension_numbers<[1], [0], [0], [1], [0, 0, 1, 1], [], []>} : vector<64x128xf32>, vector<128x128xf32>, vector<64x128xf32> -> vector<64x128xf32>
    %191 = vector.broadcast %186 : vector<1x128xf32> to vector<64x128xf32>
    %192 = arith.addf %190, %191 : vector<64x128xf32>
    %cst_144 = arith.constant 0.000000e+00 : f32
    %193 = vector.broadcast %cst_144 : f32 to vector<64x128xf32>
    %194 = arith.maximumf %192, %193 : vector<64x128xf32>
    %cst_145 = arith.constant dense<0.000000e+00> : vector<64x128xf32>
    %195 = tpu.matmul %194, %183, %cst_145 {dimension_numbers = #tpu.dot_dimension_numbers<[1], [0], [0], [1], [0, 0, 1, 1], [], []>} : vector<64x128xf32>, vector<128x128xf32>, vector<64x128xf32> -> vector<64x128xf32>
    %196 = vector.broadcast %187 : vector<1x128xf32> to vector<64x128xf32>
    %197 = arith.addf %195, %196 : vector<64x128xf32>
    %cst_146 = arith.constant 0.000000e+00 : f32
    %198 = vector.broadcast %cst_146 : f32 to vector<64x128xf32>
    %199 = arith.maximumf %197, %198 : vector<64x128xf32>
    %cst_147 = arith.constant dense<0.000000e+00> : vector<64x128xf32>
    %200 = tpu.matmul %199, %184, %cst_147 {dimension_numbers = #tpu.dot_dimension_numbers<[1], [0], [0], [1], [0, 0, 1, 1], [], []>} : vector<64x128xf32>, vector<128x128xf32>, vector<64x128xf32> -> vector<64x128xf32>
    %201 = vector.broadcast %188 : vector<1x128xf32> to vector<64x128xf32>
    %202 = arith.addf %200, %201 : vector<64x128xf32>
    %cst_148 = arith.constant 0.000000e+00 : f32
    %203 = vector.broadcast %cst_148 : f32 to vector<64x128xf32>
    %204 = arith.maximumf %202, %203 : vector<64x128xf32>
    %cst_149 = arith.constant dense<0.000000e+00> : vector<64x128xf32>
    %205 = tpu.matmul %204, %185, %cst_149 {dimension_numbers = #tpu.dot_dimension_numbers<[1], [0], [0], [1], [0, 0, 1, 1], [], []>} : vector<64x128xf32>, vector<128x128xf32>, vector<64x128xf32> -> vector<64x128xf32>
    %206 = vector.broadcast %189 : vector<1x128xf32> to vector<64x128xf32>
    %207 = arith.addf %205, %206 : vector<64x128xf32>
    %c0_150 = arith.constant 0 : index
    %c0_151 = arith.constant 0 : index
    %208 = vector.load %arg32[%c0_150, %c0_151] : memref<64x128xf32, #tpu.memory_space<vmem>>, vector<64x128xf32>
    tpu.vector_store %arg32[%c0_150, %c0_151], %207 {strides = array<i32>} : memref<64x128xf32, #tpu.memory_space<vmem>>, vector<64x128xf32>,
    return
  }
  func.func @transform_0(%arg0: i32) -> (i32, i32) {
    %c0_i32 = arith.constant 0 : i32
    %c0_i32_0 = arith.constant 0 : i32
    %c0_i32_1 = arith.constant 0 : i32
    return %c0_i32, %c0_i32_0 : i32, i32
  }
  func.func @transform_1(%arg0: i32) -> (i32, i32) {
    %c0_i32 = arith.constant 0 : i32
    %c0_i32_0 = arith.constant 0 : i32
    %c0_i32_1 = arith.constant 0 : i32
    return %c0_i32, %c0_i32_0 : i32, i32
  }
  func.func @transform_2(%arg0: i32) -> (i32, i32) {
    %c0_i32 = arith.constant 0 : i32
    %c0_i32_0 = arith.constant 0 : i32
    %c0_i32_1 = arith.constant 0 : i32
    return %c0_i32, %c0_i32_0 : i32, i32
  }
  func.func @transform_3(%arg0: i32) -> (i32, i32) {
    %c0_i32 = arith.constant 0 : i32
    %c0_i32_0 = arith.constant 0 : i32
    %c0_i32_1 = arith.constant 0 : i32
    return %c0_i32, %c0_i32_0 : i32, i32
  }
  func.func @transform_4(%arg0: i32) -> (i32, i32) {
    %c0_i32 = arith.constant 0 : i32
    %c0_i32_0 = arith.constant 0 : i32
    %c0_i32_1 = arith.constant 0 : i32
    return %c0_i32, %c0_i32_0 : i32, i32
  }
  func.func @transform_5(%arg0: i32) -> (i32, i32) {
    %c0_i32 = arith.constant 0 : i32
    %c0_i32_0 = arith.constant 0 : i32
    %c0_i32_1 = arith.constant 0 : i32
    return %c0_i32, %c0_i32_0 : i32, i32
  }
  func.func @transform_6(%arg0: i32) -> (i32, i32) {
    %c0_i32 = arith.constant 0 : i32
    %c0_i32_0 = arith.constant 0 : i32
    %c0_i32_1 = arith.constant 0 : i32
    return %c0_i32, %c0_i32_0 : i32, i32
  }
  func.func @transform_7(%arg0: i32) -> (i32, i32) {
    %c0_i32 = arith.constant 0 : i32
    %c0_i32_0 = arith.constant 0 : i32
    %c0_i32_1 = arith.constant 0 : i32
    return %c0_i32, %c0_i32_0 : i32, i32
  }
  func.func @transform_8(%arg0: i32) -> (i32, i32) {
    %c0_i32 = arith.constant 0 : i32
    %c0_i32_0 = arith.constant 0 : i32
    %c0_i32_1 = arith.constant 0 : i32
    return %c0_i32, %c0_i32_0 : i32, i32
  }
  func.func @transform_9(%arg0: i32) -> (i32, i32) {
    %c0_i32 = arith.constant 0 : i32
    %c0_i32_0 = arith.constant 0 : i32
    %c0_i32_1 = arith.constant 0 : i32
    return %c0_i32, %c0_i32_0 : i32, i32
  }
  func.func @transform_10(%arg0: i32) -> (i32, i32) {
    %c0_i32 = arith.constant 0 : i32
    %c0_i32_0 = arith.constant 0 : i32
    %c0_i32_1 = arith.constant 0 : i32
    return %c0_i32, %c0_i32_0 : i32, i32
  }
  func.func @transform_11(%arg0: i32) -> (i32, i32) {
    %c0_i32 = arith.constant 0 : i32
    %c0_i32_0 = arith.constant 0 : i32
    %c0_i32_1 = arith.constant 0 : i32
    return %c0_i32, %c0_i32_0 : i32, i32
  }
  func.func @transform_12(%arg0: i32) -> (i32, i32, i32) {
    %c0_i32 = arith.constant 0 : i32
    %c0_i32_0 = arith.constant 0 : i32
    %c0_i32_1 = arith.constant 0 : i32
    %c0_i32_2 = arith.constant 0 : i32
    return %c0_i32, %c0_i32_0, %c0_i32_1 : i32, i32, i32
  }
  func.func @transform_13(%arg0: i32) -> (i32, i32, i32) {
    %c0_i32 = arith.constant 0 : i32
    %c0_i32_0 = arith.constant 0 : i32
    %c0_i32_1 = arith.constant 0 : i32
    %c0_i32_2 = arith.constant 0 : i32
    return %c0_i32, %c0_i32_0, %c0_i32_1 : i32, i32, i32
  }
  func.func @transform_14(%arg0: i32) -> (i32, i32, i32) {
    %c0_i32 = arith.constant 0 : i32
    %c0_i32_0 = arith.constant 0 : i32
    %c0_i32_1 = arith.constant 0 : i32
    %c0_i32_2 = arith.constant 0 : i32
    return %c0_i32, %c0_i32_0, %c0_i32_1 : i32, i32, i32
  }
  func.func @transform_15(%arg0: i32) -> (i32, i32, i32) {
    %c0_i32 = arith.constant 0 : i32
    %c0_i32_0 = arith.constant 0 : i32
    %c0_i32_1 = arith.constant 0 : i32
    %c0_i32_2 = arith.constant 0 : i32
    return %c0_i32, %c0_i32_0, %c0_i32_1 : i32, i32, i32
  }
  func.func @transform_16(%arg0: i32) -> (i32, i32, i32) {
    %c0_i32 = arith.constant 0 : i32
    %c0_i32_0 = arith.constant 0 : i32
    %c0_i32_1 = arith.constant 0 : i32
    %c0_i32_2 = arith.constant 0 : i32
    return %c0_i32, %c0_i32_0, %c0_i32_1 : i32, i32, i32
  }
  func.func @transform_17(%arg0: i32) -> (i32, i32, i32) {
    %c0_i32 = arith.constant 0 : i32
    %c0_i32_0 = arith.constant 0 : i32
    %c0_i32_1 = arith.constant 0 : i32
    %c0_i32_2 = arith.constant 0 : i32
    return %c0_i32, %c0_i32_0, %c0_i32_1 : i32, i32, i32
  }
  func.func @transform_18(%arg0: i32) -> (i32, i32, i32) {
    %c0_i32 = arith.constant 0 : i32
    %c0_i32_0 = arith.constant 0 : i32
    %c0_i32_1 = arith.constant 0 : i32
    %c0_i32_2 = arith.constant 0 : i32
    return %c0_i32, %c0_i32_0, %c0_i32_1 : i32, i32, i32
  }
  func.func @transform_19(%arg0: i32) -> (i32, i32, i32) {
    %c0_i32 = arith.constant 0 : i32
    %c0_i32_0 = arith.constant 0 : i32
    %c0_i32_1 = arith.constant 0 : i32
    %c0_i32_2 = arith.constant 0 : i32
    return %c0_i32, %c0_i32_0, %c0_i32_1 : i32, i32, i32
  }
  func.func @transform_20(%arg0: i32) -> (i32, i32, i32) {
    %c0_i32 = arith.constant 0 : i32
    %c0_i32_0 = arith.constant 0 : i32
    %c0_i32_1 = arith.constant 0 : i32
    %c0_i32_2 = arith.constant 0 : i32
    return %c0_i32, %c0_i32_0, %c0_i32_1 : i32, i32, i32
  }
  func.func @transform_21(%arg0: i32) -> (i32, i32, i32) {
    %c0_i32 = arith.constant 0 : i32
    %c0_i32_0 = arith.constant 0 : i32
    %c0_i32_1 = arith.constant 0 : i32
    %c0_i32_2 = arith.constant 0 : i32
    return %c0_i32, %c0_i32_0, %c0_i32_1 : i32, i32, i32
  }
  func.func @transform_22(%arg0: i32) -> (i32, i32, i32) {
    %c0_i32 = arith.constant 0 : i32
    %c0_i32_0 = arith.constant 0 : i32
    %c0_i32_1 = arith.constant 0 : i32
    %c0_i32_2 = arith.constant 0 : i32
    return %c0_i32, %c0_i32_0, %c0_i32_1 : i32, i32, i32
  }
  func.func @transform_23(%arg0: i32) -> (i32, i32) {
    %c0_i32 = arith.constant 0 : i32
    %c0_i32_0 = arith.constant 0 : i32
    %c0_i32_1 = arith.constant 0 : i32
    return %c0_i32, %c0_i32_0 : i32, i32
  }
  func.func @transform_24(%arg0: i32) -> (i32, i32) {
    %c0_i32 = arith.constant 0 : i32
    %c0_i32_0 = arith.constant 0 : i32
    %c0_i32_1 = arith.constant 0 : i32
    return %c0_i32, %c0_i32_0 : i32, i32
  }
  func.func @transform_25(%arg0: i32) -> (i32, i32) {
    %c0_i32 = arith.constant 0 : i32
    %c0_i32_0 = arith.constant 0 : i32
    %c0_i32_1 = arith.constant 0 : i32
    return %c0_i32, %c0_i32_0 : i32, i32
  }
  func.func @transform_26(%arg0: i32) -> (i32, i32) {
    %c0_i32 = arith.constant 0 : i32
    %c0_i32_0 = arith.constant 0 : i32
    %c0_i32_1 = arith.constant 0 : i32
    return %c0_i32, %c0_i32_0 : i32, i32
  }
  func.func @transform_27(%arg0: i32) -> (i32, i32) {
    %c0_i32 = arith.constant 0 : i32
    %c0_i32_0 = arith.constant 0 : i32
    %c0_i32_1 = arith.constant 0 : i32
    return %c0_i32, %c0_i32_0 : i32, i32
  }
  func.func @transform_28(%arg0: i32) -> (i32, i32) {
    %c0_i32 = arith.constant 0 : i32
    %c0_i32_0 = arith.constant 0 : i32
    %c0_i32_1 = arith.constant 0 : i32
    return %c0_i32, %c0_i32_0 : i32, i32
  }
  func.func @transform_29(%arg0: i32) -> (i32, i32) {
    %c0_i32 = arith.constant 0 : i32
    %c0_i32_0 = arith.constant 0 : i32
    %c0_i32_1 = arith.constant 0 : i32
    return %c0_i32, %c0_i32_0 : i32, i32
  }
  func.func @transform_30(%arg0: i32) -> (i32, i32) {
    %c0_i32 = arith.constant 0 : i32
    %c0_i32_0 = arith.constant 0 : i32
    %c0_i32_1 = arith.constant 0 : i32
    return %c0_i32, %c0_i32_0 : i32, i32
  }
  func.func @transform_31(%arg0: i32) -> (i32, i32) {
    %c0_i32 = arith.constant 0 : i32
    %c0_i32_0 = arith.constant 0 : i32
    %c0_i32_1 = arith.constant 0 : i32
    return %c0_i32, %c0_i32_0 : i32, i32
  }
}

</mosaic_0001>

<bundles_post_ra>
// kernel: gmn_forward.1
= control target key start
LH: loop header
LB: loop body
LE: loop exit
PB: predicated region body
PF: predicated region fallthrough
CT: control target
= control target key end

     0   :  { %s4692_s3 = smov 2   ;;  %s4693_s10 = smov 4   ;;  %vm230_vm0 = vcmask 1043456   ;;  %vm205_vm1 = vcmask 31744   ;;  %vm815_vm2 = vcmask 523264   ;;  %s5359_s0 = inlined_call_operand.smem [shape: u32[32], index: -1, kind: input, shape index: {}] }
   0x1   :  { %s3176_s6 = sld [smem:[%s5359_s0 + %s4692_s3]]   ;;  %s4694_s14 = smov 6  }
   0x2   :  { %s4734_s9 = sld [smem:[%s5359_s0]]   ;;  %s4695_s18 = smov 3  }
   0x3   :  { %s4739_s13 = sld [smem:[%s5359_s0 + %s4693_s10]]   ;;  %s4696_s22 = smov 8  }
   0x4   :  { %s4776_s17 = sld [smem:[%s5359_s0 + %s4694_s14]]   ;;  %s4697_s26 = smov 5  }
   0x5   :  { %s3177_s21 = sld [smem:[%s5359_s0 + %s4695_s18]]   ;;  %s4698_s30 = smov 7  }
   0x6   :  { %s4800_s25 = sld [smem:[%s5359_s0 + %s4696_s22]]   ;;  %s4699_s4 = smov 9  }
   0x7   :  { %v146_v0 = vld [vmem:[%s3176_s6] sm:$0xf]  ;;  %s3179_s29 = sld [smem:[%s5359_s0 + %s4697_s26]]   ;;  %s4700_s8 = smov 12  }
   0x8   :  { %3788 = vmatprep.subr.msk.mxu0 %vm230_vm0, %v146_v0  ;;  %v130_v1 = vld [vmem:[%s4734_s9] sm:$0xff]  ;;  %v131_v2 = vld [vmem:[%s4734_s9 + $0x8] sm:$0xff]  ;;  %v132_v3 = vld [vmem:[%s4734_s9 + $0x10] sm:$0xff]  ;;  %s3181_s3 = sld [smem:[%s5359_s0 + %s4698_s30]]   ;;  %s4701_s12 = smov 1  }
   0x9   :  { %3789 = vmatpush3.msk.msra.mxu0 %vm230_vm0, %v146_v0  ;;  %3790 = vmatprep.mubr.msk.f32.mxu0 %vm205_vm1, %v130_v1  ;;  %v162_v4 = vld [vmem:[%s4739_s13 + $0x78] sm:$0xff]  ;;  %v161_v6 = vld [vmem:[%s4739_s13 + $0x70] sm:$0xff]  ;;  %v134_v7 = vld [vmem:[%s4734_s9 + $0x20] sm:$0xff]  ;;  %s3183_s7 = sld [smem:[%s5359_s0 + %s4699_s4]]   ;;  %s4702_s16 = smov 10  }
   0xa   :  { %3791 = vmatmul.mubr.msk.f32.vlgmr.msra.gmra.mxu0 %vm205_vm1, %v131_v2  ;;  %v133_v5 = vld [vmem:[%s4734_s9 + $0x18] sm:$0xff]  ;;  %3802 = vmatprep.subr.mxu1 %v162_v4  ;;  %v160_v8 = vld [vmem:[%s4739_s13 + $0x68] sm:$0xff]  ;;  %v159_v9 = vld [vmem:[%s4739_s13 + $0x60] sm:$0xff]  ;;  %s4860_s11 = sld [smem:[%s5359_s0 + %s4700_s8]]   ;;  %s4703_s20 = smov 11  }
   0xb   :  { %3793 = vmatprep.mubr.msk.f32.mxu0 %vm205_vm1, %v132_v3  ;;  %3803 = vmatpush3.msra.mxu1 %v162_v4  ;;  %v135_v10 = vld [vmem:[%s4734_s9 + $0x28] sm:$0xff]  ;;  %v136_v11 = vld [vmem:[%s4734_s9 + $0x30] sm:$0xff]  ;;  %v158_v12 = vld [vmem:[%s4739_s13 + $0x58] sm:$0xff]  ;;  %s4881_s15 = sld [smem:[%s5359_s0 + %s4701_s12]]   ;;  %s4704_s24 = smov 13  }
   0xc   :  { %3804 = vmatprep.subr.mxu1 %v161_v6  ;;  %v157_v13 = vld [vmem:[%s4739_s13 + $0x50] sm:$0xff]  ;;  %v137_v14 = vld [vmem:[%s4734_s9 + $0x38] sm:$0xff]  ;;  %v156_v15 = vld [vmem:[%s4739_s13 + $0x48] sm:$0xff]  ;;  %s3184_s19 = sld [smem:[%s5359_s0 + %s4702_s16]]   ;;  %s4705_s28 = smov 15  }
   0xd   :  { %3805 = vmatpush3.msra.mxu1 %v161_v6  ;;  %v155_v16 = vld [vmem:[%s4739_s13 + $0x40] sm:$0xff]  ;;  %v154_v17 = vld [vmem:[%s4739_s13 + $0x38] sm:$0xff]  ;;  %v153_v18 = vld [vmem:[%s4739_s13 + $0x30] sm:$0xff]  ;;  %s3185_s23 = sld [smem:[%s5359_s0 + %s4703_s20]]   ;;  %s4706_s2 = smov 17  }
   0xe   :  { %3794 = vmatmul.mubr.msk.f32.gmra.mxu0 %vm205_vm1, %v133_v5  ;;  %3806 = vmatprep.subr.mxu1 %v160_v8  ;;  %v152_v19 = vld [vmem:[%s4739_s13 + $0x28] sm:$0xff]  ;;  %v151_v20 = vld [vmem:[%s4739_s13 + $0x20] sm:$0xff]  ;;  %v150_v21 = vld [vmem:[%s4739_s13 + $0x18] sm:$0xff]  ;;  %s4910_s27 = sld [smem:[%s5359_s0 + %s4704_s24]]   ;;  %s4707_s6 = smov 14  }
   0xf   :  { %3796 = vmatprep.mubr.msk.f32.mxu0 %vm205_vm1, %v134_v7  ;;  %3807 = vmatpush3.msra.mxu1 %v160_v8  ;;  %v149_v22 = vld [vmem:[%s4739_s13 + $0x10] sm:$0xff]  ;;  %v148_v23 = vld [vmem:[%s4739_s13 + $0x8] sm:$0xff]  ;;  %v147_v24 = vld [vmem:[%s4739_s13] sm:$0xff]  ;;  %s4947_s1 = sld [smem:[%s5359_s0 + %s4705_s28]]   ;;  %s4708_s10 = smov 19  }
  0x10   :  { %3808 = vmatprep.subr.mxu1 %v159_v9  ;;  %v178_v25 = vld [vmem:[%s4776_s17 + $0x78] sm:$0xff]  ;;  %v177_v26 = vld [vmem:[%s4776_s17 + $0x70] sm:$0xff]  ;;  %v176_v27 = vld [vmem:[%s4776_s17 + $0x68] sm:$0xff]  ;;  %s4968_s5 = sld [smem:[%s5359_s0 + %s4706_s2]]   ;;  %s4709_s16 = smov 16  }
  0x11   :  { %3809 = vmatpush3.msra.mxu1 %v159_v9  ;;  %3846 = vmatprep.subr.mxu0 %v178_v25  ;;  %v175_v28 = vld [vmem:[%s4776_s17 + $0x60] sm:$0xff]  ;;  %v174_v29 = vld [vmem:[%s4776_s17 + $0x58] sm:$0xff]  ;;  %v173_v30 = vld [vmem:[%s4776_s17 + $0x50] sm:$0xff]  ;;  %s4985_s9 = sld [smem:[%s5359_s0 + %s4707_s6]]   ;;  %s4710_s20 = smov 18  }
  0x12   :  { %3797 = vmatmul.mubr.msk.f32.gmra.mxu0 %vm205_vm1, %v135_v10  ;;  %3810 = vmatprep.subr.mxu1 %v158_v12  ;;  %v172_v31 = vld [vmem:[%s4776_s17 + $0x48] sm:$0xff]  ;;  %v171_v32 = vld [vmem:[%s4776_s17 + $0x40] sm:$0xff]  ;;  %v170_v33 = vld [vmem:[%s4776_s17 + $0x38] sm:$0xff]  ;;  %s4995_s14 = sld [smem:[%s5359_s0 + %s4708_s10]]   ;;  %s4711_s24 = smov 20  }
  0x13   :  { %3799 = vmatprep.mubr.msk.f32.mxu0 %vm205_vm1, %v136_v11  ;;  %3811 = vmatpush3.msra.mxu1 %v158_v12  ;;  %v169_v34 = vld [vmem:[%s4776_s17 + $0x30] sm:$0xff]  ;;  %v168_v35 = vld [vmem:[%s4776_s17 + $0x28] sm:$0xff]  ;;  %v167_v36 = vld [vmem:[%s4776_s17 + $0x20] sm:$0xff]  ;;  %s5030_s28 = sld [smem:[%s5359_s0 + %s4711_s24]]   ;;  %s4713_s4 = smov 22  }
  0x14   :  { %3812 = vmatprep.subr.mxu1 %v157_v13  ;;  %3847 = vmatpush3.msra.mxu0 %v178_v25  ;;  %v3206_v37 = vld [vmem:[%s3177_s21] ss:$0 sm:$0xff]  ;;  %v166_v62 = vld [vmem:[%s4776_s17 + $0x18] sm:$0xff]  ;;  %v165_v63 = vld [vmem:[%s4776_s17 + $0x10] sm:$0xff]  ;;  %s5087_s8 = sld [smem:[%s5359_s0 + %s4713_s4]]   ;;  %s4716_s13 = smov 27  }
  0x15   :  { %3813 = vmatpush3.msra.mxu1 %v157_v13  ;;  %3848 = vmatprep.subr.mxu0 %v177_v26  ;;  %v164_v0 = vld [vmem:[%s4776_s17 + $0x8] sm:$0xff]  ;;  %v163_v1 = vld [vmem:[%s4776_s17] sm:$0xff]  ;;  %v194_v2 = vld [vmem:[%s4800_s25 + $0x78] sm:$0xff]  ;;  %s5305_s17 = sld [smem:[%s5359_s0 + %s4716_s13]]   ;;  %s4717_s18 = smov 24  }
  0x16   :  { %3800 = vmatmul.mubr.msk.f32.gmra.mxu0 %vm205_vm1, %v137_v14  ;;  %3814 = vmatprep.subr.mxu1 %v156_v15  ;;  %v193_v3 = vld [vmem:[%s4800_s25 + $0x70] sm:$0xff]  ;;  %v192_v4 = vld [vmem:[%s4800_s25 + $0x68] sm:$0xff]  ;;  %v191_v5 = vld [vmem:[%s4800_s25 + $0x60] sm:$0xff]  ;;  %s3198_s21 = sld [smem:[%s5359_s0 + %s4717_s18]]   ;;  %s4718_s22 = smov 29  }
  0x17   :  { %3815 = vmatpush3.msra.mxu1 %v156_v15  ;;  %3849 = vmatpush3.msra.mxu0 %v177_v26  ;;  %v190_v6 = vld [vmem:[%s4800_s25 + $0x58] sm:$0xff]  ;;  %v189_v7 = vld [vmem:[%s4800_s25 + $0x50] sm:$0xff]  ;;  %v188_v8 = vld [vmem:[%s4800_s25 + $0x48] sm:$0xff]  ;;  %s4719_s26 = smov 26   ;;  %s4720_s2 = smov 28  }
  0x18   :  { %3816 = vmatprep.subr.mxu1 %v155_v16  ;;  %3850 = vmatprep.subr.mxu0 %v176_v27  ;;  %v187_v9 = vld [vmem:[%s4800_s25 + $0x40] sm:$0xff]  ;;  %v186_v10 = vld [vmem:[%s4800_s25 + $0x38] sm:$0xff]  ;;  %v185_v11 = vld [vmem:[%s4800_s25 + $0x30] sm:$0xff]  ;;  %s3200_s30 = sld [smem:[%s5359_s0 + %s4719_s26]]  }
  0x19   :  { %3817 = vmatpush3.msra.mxu1 %v155_v16  ;;  %3851 = vmatpush3.msra.mxu0 %v176_v27  ;;  %v184_v12 = vld [vmem:[%s4800_s25 + $0x28] sm:$0xff]  ;;  %v183_v13 = vld [vmem:[%s4800_s25 + $0x20] sm:$0xff]  ;;  %s3202_s6 = sld [smem:[%s5359_s0 + %s4720_s2]]  }
  0x1a   :  { %3818 = vmatprep.subr.mxu1 %v154_v17  ;;  %3852 = vmatprep.subr.mxu0 %v175_v28  ;;  %v3216_v14 = vld [vmem:[%s3179_s29] ss:$0 sm:$0xff]  ;;  %s4712_s29 = smov 21  }
  0x1b   :  { %3819 = vmatpush3.msra.mxu1 %v154_v17  ;;  %3853 = vmatpush3.msra.mxu0 %v175_v28 }
  0x1c   :  { %3820 = vmatprep.subr.mxu1 %v153_v18  ;;  %3854 = vmatprep.subr.mxu0 %v174_v29 }
  0x1d   :  { %3821 = vmatpush3.msra.mxu1 %v153_v18  ;;  %3855 = vmatpush3.msra.mxu0 %v174_v29 }
  0x1e   :  { %3822 = vmatprep.subr.mxu1 %v152_v19  ;;  %3856 = vmatprep.subr.mxu0 %v173_v30 }
  0x1f   :  { %3823 = vmatpush3.msra.mxu1 %v152_v19  ;;  %3857 = vmatpush3.msra.mxu0 %v173_v30 }
  0x20   :  { %3824 = vmatprep.subr.mxu1 %v151_v20  ;;  %3858 = vmatprep.subr.mxu0 %v172_v31 }
  0x21   :  { %3825 = vmatpush3.msra.mxu1 %v151_v20  ;;  %3859 = vmatpush3.msra.mxu0 %v172_v31 }
  0x22   :  { %3826 = vmatprep.subr.mxu1 %v150_v21  ;;  %3860 = vmatprep.subr.mxu0 %v171_v32 }
  0x23   :  { %3827 = vmatpush3.msra.mxu1 %v150_v21  ;;  %3861 = vmatpush3.msra.mxu0 %v171_v32 }
  0x24   :  { %3828 = vmatprep.subr.mxu1 %v149_v22  ;;  %3862 = vmatprep.subr.mxu0 %v170_v33 }
  0x25   :  { %3829 = vmatpush3.msra.mxu1 %v149_v22  ;;  %3863 = vmatpush3.msra.mxu0 %v170_v33 }
  0x26   :  { %3830 = vmatprep.subr.mxu1 %v148_v23  ;;  %3864 = vmatprep.subr.mxu0 %v169_v34 }
  0x27   :  { %3831 = vmatpush3.msra.mxu1 %v148_v23  ;;  %3865 = vmatpush3.msra.mxu0 %v169_v34 }
  0x28   :  { %3832 = vmatprep.subr.mxu1 %v147_v24  ;;  %3866 = vmatprep.subr.mxu0 %v168_v35 }
  0x29   :  { %3833 = vmatpush3.msra.mxu1 %v147_v24  ;;  %3867 = vmatpush3.msra.mxu0 %v168_v35 }
  0x2a   :  { %3868 = vmatprep.subr.mxu0 %v167_v36  ;;  %3890 = vmatprep.subr.mxu1 %v194_v2 }
  0x2b   :  { %3869 = vmatpush3.msra.mxu0 %v167_v36 }
  0x2c   :  { %3870 = vmatprep.subr.mxu0 %v166_v62 }
  0x2d   :  { %3871 = vmatpush3.msra.mxu0 %v166_v62 }
  0x2e   :  { %3872 = vmatprep.subr.mxu0 %v165_v63 }
  0x2f   :  { %3873 = vmatpush3.msra.mxu0 %v165_v63 }
  0x30   :  { %3874 = vmatprep.subr.mxu0 %v164_v0 }
  0x31   :  { %3875 = vmatpush3.msra.mxu0 %v164_v0 }
  0x32   :  { %3876 = vmatprep.subr.mxu0 %v163_v1 }
  0x33   :  { %3877 = vmatpush3.msra.mxu0 %v163_v1 }
  0xca   :  { %v3792_v38 = vpop.f32.mrf.mxu0 }
  0xcb   :  { %v306_v39 = vadd.f32 %v3792_v38, %v3206_v37 }
  0xcc   :  { %v300_v40 = vpop.f32.mrf.mxu0 }
  0xcd   :  { %v301_v41 = vadd.f32 %v3206_v37, %v300_v40  ;;  %v340_v44 = vmax.f32 %v306_v39, 0.0  ;;  %v182_v39 = vld [vmem:[%s4800_s25 + $0x18] sm:$0xff]  ;;  %v181_v40 = vld [vmem:[%s4800_s25 + $0x10] sm:$0xff] }
  0xce   :  { %v3795_v42 = vpop.f32.mrf.mxu0 }
  0xcf   :  { %v339_v43 = vmax.f32 %v301_v41, 0.0  ;;  %v316_v45 = vadd.f32 %v3795_v42, %v3206_v37  ;;  %v180_v41 = vld [vmem:[%s4800_s25 + $0x8] sm:$0xff]  ;;  %v179_v42 = vld [vmem:[%s4800_s25] sm:$0xff]  ;;  %s5329_s25 = sld [smem:[%s5359_s0 + %s4718_s22]]  }
  0xd0   :  { %v310_v46 = vpop.f32.mrf.mxu0 }
  0xd1   :  { %v311_v47 = vadd.f32 %v3206_v37, %v310_v46  ;;  %3834 = vmatprep.mubr.f32.mxu1 %v339_v43  ;;  %v342_v50 = vmax.f32 %v316_v45, 0.0  ;;  %v3217_v43 = vld [vmem:[%s3181_s3] ss:$0 sm:$0xff]  ;;  %s5082_s3 = sld [smem:[%s5359_s0 + %s4712_s29]]  }
  0xd2   :  { %v3798_v48 = vpop.f32.mrf.mxu0  ;;  %3835 = vmatmul.mubr.f32.vlgmr.msra.gmra.mxu1 %v340_v44 }
  0xd3   :  { %v341_v49 = vmax.f32 %v311_v47, 0.0  ;;  %v326_v51 = vadd.f32 %v3798_v48, %v3206_v37  ;;  %3891 = vmatpush3.msra.mxu1 %v194_v2 }
  0xd4   :  { %v320_v52 = vpop.f32.mrf.mxu0  ;;  %3892 = vmatprep.subr.mxu1 %v193_v3 }
  0xd5   :  { %v321_v53 = vadd.f32 %v3206_v37, %v320_v52  ;;  %3837 = vmatprep.mubr.f32.mxu1 %v341_v49  ;;  %v344_v56 = vmax.f32 %v326_v51, 0.0  ;;  %3893 = vmatpush3.msra.mxu1 %v193_v3 }
  0xd6   :  { %v3801_v54 = vpop.f32.mrf.mxu0  ;;  %3838 = vmatmul.mubr.f32.gmra.mxu1 %v342_v50  ;;  %3894 = vmatprep.subr.mxu1 %v192_v4 }
  0xd7   :  { %v343_v55 = vmax.f32 %v321_v53, 0.0  ;;  %v336_v57 = vadd.f32 %v3801_v54, %v3206_v37  ;;  %3895 = vmatpush3.msra.mxu1 %v192_v4 }
  0xd8   :  { %v330_v58 = vpop.f32.mrf.mxu0  ;;  %3896 = vmatprep.subr.mxu1 %v191_v5 }
  0xd9   :  { %v331_v59 = vadd.f32 %v3206_v37, %v330_v58  ;;  %3840 = vmatprep.mubr.f32.mxu1 %v343_v55  ;;  %v346_v61 = vmax.f32 %v336_v57, 0.0  ;;  %3897 = vmatpush3.msra.mxu1 %v191_v5 }
  0xda   :  { %3841 = vmatmul.mubr.f32.gmra.mxu1 %v344_v56  ;;  %3898 = vmatprep.subr.mxu1 %v190_v6 }
  0xdb   :  { %v345_v60 = vmax.f32 %v331_v59, 0.0  ;;  %3899 = vmatpush3.msra.mxu1 %v190_v6 }
  0xdc   :  { %3900 = vmatprep.subr.mxu1 %v189_v7 }
  0xdd   :  { %3843 = vmatprep.mubr.f32.mxu1 %v345_v60  ;;  %3901 = vmatpush3.msra.mxu1 %v189_v7 }
  0xde   :  { %3844 = vmatmul.mubr.f32.gmra.mxu1 %v346_v61  ;;  %3902 = vmatprep.subr.mxu1 %v188_v8 }
  0xdf   :  { %3903 = vmatpush3.msra.mxu1 %v188_v8  ;;  %v3218_v8 = vld [vmem:[%s3183_s7] ss:$0 sm:$0xff]  ;;  %s4721_s7 = smov 30  }
  0xe0   :  { %3904 = vmatprep.subr.mxu1 %v187_v9 }
  0xe1   :  { %3905 = vmatpush3.msra.mxu1 %v187_v9 }
  0xe2   :  { %3906 = vmatprep.subr.mxu1 %v186_v10 }
  0xe3   :  { %3907 = vmatpush3.msra.mxu1 %v186_v10 }
  0xe4   :  { %3908 = vmatprep.subr.mxu1 %v185_v11 }
  0xe5   :  { %3909 = vmatpush3.msra.mxu1 %v185_v11 }
  0xe6   :  { %3910 = vmatprep.subr.mxu1 %v184_v12 }
  0xe7   :  { %3911 = vmatpush3.msra.mxu1 %v184_v12 }
  0xe8   :  { %3912 = vmatprep.subr.mxu1 %v183_v13 }
  0xe9   :  { %3913 = vmatpush3.msra.mxu1 %v183_v13 }
  0xea   :  { %3914 = vmatprep.subr.mxu1 %v182_v39 }
  0xeb   :  { %3915 = vmatpush3.msra.mxu1 %v182_v39 }
  0xec   :  { %3916 = vmatprep.subr.mxu1 %v181_v40 }
  0xed   :  { %3917 = vmatpush3.msra.mxu1 %v181_v40 }
  0xee   :  { %3918 = vmatprep.subr.mxu1 %v180_v41 }
  0xef   :  { %3919 = vmatpush3.msra.mxu1 %v180_v41 }
  0xf0   :  { %3920 = vmatprep.subr.mxu1 %v179_v42 }
  0xf1   :  { %3921 = vmatpush3.msra.mxu1 %v179_v42 }
 0x192   :  { %v3836_v15 = vpop.f32.mrf.mxu1 }
 0x193   :  { %v425_v16 = vadd.f32 %v3836_v15, %v3216_v14 }
 0x194   :  { %v419_v17 = vpop.f32.mrf.mxu1 }
 0x195   :  { %v420_v18 = vadd.f32 %v3216_v14, %v419_v17  ;;  %v459_v21 = vmax.f32 %v425_v16, 0.0 }
 0x196   :  { %v3839_v19 = vpop.f32.mrf.mxu1 }
 0x197   :  { %v458_v20 = vmax.f32 %v420_v18, 0.0  ;;  %v435_v22 = vadd.f32 %v3839_v19, %v3216_v14 }
 0x198   :  { %v429_v23 = vpop.f32.mrf.mxu1 }
 0x199   :  { %v430_v24 = vadd.f32 %v3216_v14, %v429_v23  ;;  %3878 = vmatprep.mubr.f32.mxu0 %v458_v20  ;;  %v461_v27 = vmax.f32 %v435_v22, 0.0 }
 0x19a   :  { %v3842_v25 = vpop.f32.mrf.mxu1  ;;  %3879 = vmatmul.mubr.f32.vlgmr.msra.gmra.mxu0 %v459_v21 }
 0x19b   :  { %v460_v26 = vmax.f32 %v430_v24, 0.0  ;;  %v445_v28 = vadd.f32 %v3842_v25, %v3216_v14 }
 0x19c   :  { %v439_v29 = vpop.f32.mrf.mxu1 }
 0x19d   :  { %v440_v30 = vadd.f32 %v3216_v14, %v439_v29  ;;  %3881 = vmatprep.mubr.f32.mxu0 %v460_v26  ;;  %v463_v33 = vmax.f32 %v445_v28, 0.0 }
 0x19e   :  { %v3845_v31 = vpop.f32.mrf.mxu1  ;;  %3882 = vmatmul.mubr.f32.gmra.mxu0 %v461_v27 }
 0x19f   :  { %v462_v32 = vmax.f32 %v440_v30, 0.0  ;;  %v455_v34 = vadd.f32 %v3845_v31, %v3216_v14 }
 0x1a0   :  { %v449_v35 = vpop.f32.mrf.mxu1 }
 0x1a1   :  { %v450_v36 = vadd.f32 %v3216_v14, %v449_v35  ;;  %3884 = vmatprep.mubr.f32.mxu0 %v462_v32  ;;  %v465_v38 = vmax.f32 %v455_v34, 0.0 }
 0x1a2   :  { %3885 = vmatmul.mubr.f32.gmra.mxu0 %v463_v33 }
 0x1a3   :  { %v464_v37 = vmax.f32 %v450_v36, 0.0 }
 0x1a5   :  { %3887 = vmatprep.mubr.f32.mxu0 %v464_v37 }
 0x1a6   :  { %3888 = vmatmul.mubr.f32.gmra.mxu0 %v465_v38 }
 0x25a   :  { %v3880_v44 = vpop.f32.mrf.mxu0 }
 0x25b   :  { %v544_v45 = vadd.f32 %v3880_v44, %v3217_v43 }
 0x25c   :  { %v538_v46 = vpop.f32.mrf.mxu0 }
 0x25d   :  { %v539_v47 = vadd.f32 %v3217_v43, %v538_v46  ;;  %v578_v50 = vmax.f32 %v544_v45, 0.0 }
 0x25e   :  { %v3883_v48 = vpop.f32.mrf.mxu0 }
 0x25f   :  { %v577_v49 = vmax.f32 %v539_v47, 0.0  ;;  %v554_v51 = vadd.f32 %v3883_v48, %v3217_v43 }
 0x260   :  { %v548_v52 = vpop.f32.mrf.mxu0 }
 0x261   :  { %v549_v53 = vadd.f32 %v3217_v43, %v548_v52  ;;  %3922 = vmatprep.mubr.f32.mxu1 %v577_v49  ;;  %v580_v56 = vmax.f32 %v554_v51, 0.0 }
 0x262   :  { %v3886_v54 = vpop.f32.mrf.mxu0  ;;  %3923 = vmatmul.mubr.f32.vlgmr.msra.gmra.mxu1 %v578_v50 }
 0x263   :  { %v579_v55 = vmax.f32 %v549_v53, 0.0  ;;  %v564_v57 = vadd.f32 %v3886_v54, %v3217_v43  ;;  %v960_v53 = vld [vmem:[%s4860_s11 + $0x78] sm:$0xff]  ;;  %v959_v54 = vld [vmem:[%s4860_s11 + $0x70] sm:$0xff] }
 0x264   :  { %v558_v58 = vpop.f32.mrf.mxu0  ;;  %4006 = vmatprep.subr.mxu1 %v960_v53 }
 0x265   :  { %v559_v59 = vadd.f32 %v3217_v43, %v558_v58  ;;  %3925 = vmatprep.mubr.f32.mxu1 %v579_v55  ;;  %v582_v62 = vmax.f32 %v564_v57, 0.0  ;;  %4007 = vmatpush3.msra.mxu1 %v960_v53  ;;  %v958_v55 = vld [vmem:[%s4860_s11 + $0x68] sm:$0xff]  ;;  %v956_v57 = vld [vmem:[%s4860_s11 + $0x58] sm:$0xff]  ;;  %v955_v58 = vld [vmem:[%s4860_s11 + $0x50] sm:$0xff] }
 0x266   :  { %v3889_v60 = vpop.f32.mrf.mxu0  ;;  %3926 = vmatmul.mubr.f32.gmra.mxu1 %v580_v56  ;;  %4008 = vmatprep.subr.mxu1 %v959_v54  ;;  %v957_v56 = vld [vmem:[%s4860_s11 + $0x60] sm:$0xff] }
 0x267   :  { %v581_v61 = vmax.f32 %v559_v59, 0.0  ;;  %v574_v63 = vadd.f32 %v3889_v60, %v3217_v43  ;;  %4009 = vmatpush3.msra.mxu1 %v959_v54  ;;  %v954_v59 = vld [vmem:[%s4860_s11 + $0x48] sm:$0xff]  ;;  %v953_v60 = vld [vmem:[%s4860_s11 + $0x40] sm:$0xff] }
 0x268   :  { %v568_v0 = vpop.f32.mrf.mxu0  ;;  %4010 = vmatprep.subr.mxu1 %v958_v55 }
 0x269   :  { %v569_v1 = vadd.f32 %v3217_v43, %v568_v0  ;;  %3928 = vmatprep.mubr.f32.mxu1 %v581_v61  ;;  %v584_v3 = vmax.f32 %v574_v63, 0.0  ;;  %4011 = vmatpush3.msra.mxu1 %v958_v55  ;;  %v952_v61 = vld [vmem:[%s4860_s11 + $0x38] sm:$0xff]  ;;  %v950_v63 = vld [vmem:[%s4860_s11 + $0x28] sm:$0xff]  ;;  %v949_v0 = vld [vmem:[%s4860_s11 + $0x20] sm:$0xff] }
 0x26a   :  { %3929 = vmatmul.mubr.f32.gmra.mxu1 %v582_v62  ;;  %4012 = vmatprep.subr.mxu1 %v957_v56  ;;  %v951_v62 = vld [vmem:[%s4860_s11 + $0x30] sm:$0xff] }
 0x26b   :  { %v583_v2 = vmax.f32 %v569_v1, 0.0  ;;  %4013 = vmatpush3.msra.mxu1 %v957_v56  ;;  %v948_v1 = vld [vmem:[%s4860_s11 + $0x18] sm:$0xff] }
 0x26c   :  { %4014 = vmatprep.subr.mxu1 %v956_v57 }
 0x26d   :  { %3931 = vmatprep.mubr.f32.mxu1 %v583_v2  ;;  %4015 = vmatpush3.msra.mxu1 %v956_v57  ;;  %v947_v2 = vld [vmem:[%s4860_s11 + $0x10] sm:$0xff] }
 0x26e   :  { %3932 = vmatmul.mubr.f32.gmra.mxu1 %v584_v3  ;;  %4016 = vmatprep.subr.mxu1 %v955_v58  ;;  %v946_v3 = vld [vmem:[%s4860_s11 + $0x8] sm:$0xff] }
 0x26f   :  { %4017 = vmatpush3.msra.mxu1 %v955_v58 }
 0x270   :  { %4018 = vmatprep.subr.mxu1 %v954_v59 }
 0x271   :  { %4019 = vmatpush3.msra.mxu1 %v954_v59 }
 0x272   :  { %4020 = vmatprep.subr.mxu1 %v953_v60 }
 0x273   :  { %4021 = vmatpush3.msra.mxu1 %v953_v60 }
 0x274   :  { %4022 = vmatprep.subr.mxu1 %v952_v61 }
 0x275   :  { %4023 = vmatpush3.msra.mxu1 %v952_v61 }
 0x276   :  { %4024 = vmatprep.subr.mxu1 %v951_v62 }
 0x277   :  { %4025 = vmatpush3.msra.mxu1 %v951_v62 }
 0x278   :  { %4026 = vmatprep.subr.mxu1 %v950_v63 }
 0x279   :  { %4027 = vmatpush3.msra.mxu1 %v950_v63 }
 0x27a   :  { %4028 = vmatprep.subr.mxu1 %v949_v0 }
 0x27b   :  { %4029 = vmatpush3.msra.mxu1 %v949_v0 }
 0x27c   :  { %4030 = vmatprep.subr.mxu1 %v948_v1 }
 0x27d   :  { %4031 = vmatpush3.msra.mxu1 %v948_v1  ;;  %v139_v1 = vld [vmem:[%s4881_s15 + $0x8] sm:$0xff] }
 0x27e   :  { %4032 = vmatprep.subr.mxu1 %v947_v2 }
 0x27f   :  { %4033 = vmatpush3.msra.mxu1 %v947_v2  ;;  %v976_v2 = vld [vmem:[%s4910_s27 + $0x78] sm:$0xff] }
 0x280   :  { %4034 = vmatprep.subr.mxu1 %v946_v3 }
 0x281   :  { %4035 = vmatpush3.msra.mxu1 %v946_v3  ;;  %v975_v3 = vld [vmem:[%s4910_s27 + $0x70] sm:$0xff] }
 0x322   :  { %v3924_v4 = vpop.f32.mrf.mxu1 }
 0x323   :  { %v663_v20 = vadd.f32 %v3924_v4, %v3218_v8  ;;  %v945_v4 = vld [vmem:[%s4860_s11] sm:$0xff] }
 0x324   :  { %v657_v5 = vpop.f32.mrf.mxu1  ;;  %4036 = vmatprep.subr.mxu1 %v945_v4 }
 0x325   :  { %v658_v18 = vadd.f32 %v3218_v8, %v657_v5  ;;  %4037 = vmatpush3.msra.mxu1 %v945_v4  ;;  %v4886_v5 = vld [vmem:[%s4881_s15] sm:$0xff]  ;;  %v141_v4 = vld [vmem:[%s4881_s15 + $0x18] sm:$0xff] }
 0x326   :  { %v3927_v6 = vpop.f32.mrf.mxu1  ;;  %3950 = vmatprep.mubr.msk.f32.mxu0 %vm815_vm2, %v4886_v5 }
 0x327   :  { %v673_v19 = vadd.f32 %v3927_v6, %v3218_v8 }
 0x328   :  { %v667_v7 = vpop.f32.mrf.mxu1 }
 0x329   :  { %v668_v16 = vadd.f32 %v3218_v8, %v667_v7 }
 0x32a   :  { %v3930_v9 = vpop.f32.mrf.mxu1 }
 0x32b   :  { %v683_v10 = vadd.f32 %v3930_v9, %v3218_v8 }
 0x32c   :  { %v677_v11 = vpop.f32.mrf.mxu1 }
 0x32d   :  { %708 = vadd.xlane.f32.xlu1 %v683_v10  ;;  %v678_v13 = vadd.f32 %v3218_v8, %v677_v11 }
 0x32e   :  { %v3933_v12 = vpop.f32.mrf.mxu1 }
 0x32f   :  { %v693_v14 = vadd.f32 %v3933_v12, %v3218_v8 }
 0x330   :  { %v687_v15 = vpop.f32.mrf.mxu1 }
 0x331   :  { %712 = vadd.xlane.f32.xlu0 %v693_v14  ;;  %706 = vadd.xlane.f32.xlu1 %v678_v13  ;;  %v688_v17 = vadd.f32 %v3218_v8, %v687_v15 }
 0x335   :  { %710 = vadd.xlane.f32.xlu0 %v688_v17  ;;  %702 = vadd.xlane.f32.xlu1 %v668_v16 }
 0x339   :  { %704 = vadd.xlane.f32.xlu0 %v673_v19  ;;  %698 = vadd.xlane.f32.xlu1 %v658_v18 }
 0x33d   :  { %700 = vadd.xlane.f32.xlu0 %v663_v20 }
 0x3b6   :  { %v709_v21 = vpop.xlane.xlu1 %708 }
 0x3b7   :  { %v720_v24 = vmul.f32 0.0078125, %v709_v21 }
 0x3b9   :  { %v4829_v30 = vsub.f32 %v683_v10, %v720_v24 }
 0x3ba   :  { %v713_v22 = vpop.xlane.xlu0 %712  ;;  %v707_v23 = vpop.xlane.xlu1 %706 }
 0x3bb   :  { %v722_v25 = vmul.f32 0.0078125, %v713_v22  ;;  %v719_v27 = vmul.f32 0.0078125, %v707_v23  ;;  %v736_v38 = vmul.f32 %v4829_v30, %v4829_v30 }
 0x3bd   :  { %v4827_v26 = vsub.f32 %v693_v14, %v722_v25  ;;  %v4835_v34 = vsub.f32 %v678_v13, %v719_v27 }
 0x3be   :  { %v711_v28 = vpop.xlane.xlu0 %710  ;;  %v703_v29 = vpop.xlane.xlu1 %702 }
 0x3bf   :  { %v721_v31 = vmul.f32 0.0078125, %v711_v28  ;;  %v738_v32 = vmul.f32 %v4827_v26, %v4827_v26  ;;  %v717_v36 = vmul.f32 0.0078125, %v703_v29  ;;  %v735_v43 = vmul.f32 %v4835_v34, %v4835_v34 }
 0x3c1   :  { %v4833_v33 = vsub.f32 %v688_v17, %v721_v31  ;;  %753 = vadd.xlane.f32.xlu0 %v738_v32  ;;  %v4845_v44 = vsub.f32 %v668_v16, %v717_v36  ;;  %v3219_v32 = vld [vmem:[%s3184_s19] ss:$0 sm:$0xff]  ;;  %s5012_s19 = sld [smem:[%s5359_s0 + %s4709_s16]]  }
 0x3c2   :  { %v705_v35 = vpop.xlane.xlu0 %704  ;;  %v699_v40 = vpop.xlane.xlu1 %698 }
 0x3c3   :  { %v718_v37 = vmul.f32 0.0078125, %v705_v35  ;;  %v737_v39 = vmul.f32 %v4833_v33, %v4833_v33  ;;  %v715_v45 = vmul.f32 0.0078125, %v699_v40  ;;  %v733_v51 = vmul.f32 %v4845_v44, %v4845_v44 }
 0x3c5   :  { %v4841_v41 = vsub.f32 %v673_v19, %v718_v37  ;;  %749 = vadd.xlane.f32.xlu0 %v736_v38  ;;  %751 = vadd.xlane.f32.xlu1 %v737_v39  ;;  %v4851_v49 = vsub.f32 %v658_v18, %v715_v45  ;;  %v3220_v37 = vld [vmem:[%s3185_s23] ss:$0 sm:$0xff]  ;;  %s5022_s23 = sld [smem:[%s5359_s0 + %s4710_s20]]  }
 0x3c6   :  { %v701_v42 = vpop.xlane.xlu0 %700 }
 0x3c7   :  { %v716_v46 = vmul.f32 0.0078125, %v701_v42  ;;  %v734_v47 = vmul.f32 %v4841_v41, %v4841_v41  ;;  %v731_v52 = vmul.f32 %v4851_v49, %v4851_v49 }
 0x3c9   :  { %v4849_v48 = vsub.f32 %v663_v20, %v716_v46  ;;  %745 = vadd.xlane.f32.xlu0 %v734_v47  ;;  %747 = vadd.xlane.f32.xlu1 %v735_v43 }
 0x3cb   :  { %v732_v50 = vmul.f32 %v4849_v48, %v4849_v48 }
 0x3cd   :  { %741 = vadd.xlane.f32.xlu0 %v732_v50  ;;  %743 = vadd.xlane.f32.xlu1 %v733_v51 }
 0x3d1   :  { %739 = vadd.xlane.f32.xlu1 %v731_v52 }
 0x44a   :  { %v754_v6 = vpop.xlane.xlu0 %753 }
 0x44b   :  { %v762_v7 = vmul.f32 0.0078125, %v754_v6  ;;  %v974_v6 = vld [vmem:[%s4910_s27 + $0x68] sm:$0xff] }
 0x44d   :  { %v770_v8 = vadd.f32 1e-05, %v762_v7  ;;  %v142_v7 = vld [vmem:[%s4881_s15 + $0x20] sm:$0xff] }
 0x44e   :  { %v750_v9 = vpop.xlane.xlu0 %749  ;;  %v752_v10 = vpop.xlane.xlu1 %751 }
 0x44f   :  { %4637 = vrsqrt.f32 %v770_v8  ;;  %v760_v11 = vmul.f32 0.0078125, %v750_v9  ;;  %v761_v12 = vmul.f32 0.0078125, %v752_v10  ;;  %v973_v8 = vld [vmem:[%s4910_s27 + $0x60] sm:$0xff]  ;;  %v143_v9 = vld [vmem:[%s4881_s15 + $0x28] sm:$0xff]  ;;  %v972_v10 = vld [vmem:[%s4910_s27 + $0x58] sm:$0xff] }
 0x451   :  { %v768_v13 = vadd.f32 1e-05, %v760_v11  ;;  %v769_v14 = vadd.f32 1e-05, %v761_v12  ;;  %v144_v11 = vld [vmem:[%s4881_s15 + $0x30] sm:$0xff] }
 0x452   :  { %v746_v15 = vpop.xlane.xlu0 %745  ;;  %v748_v16 = vpop.xlane.xlu1 %747  ;;  %v971_v12 = vld [vmem:[%s4910_s27 + $0x50] sm:$0xff] }
 0x453   :  { %4639 = vrsqrt.f32 %v768_v13  ;;  %v758_v17 = vmul.f32 0.0078125, %v746_v15  ;;  %v759_v18 = vmul.f32 0.0078125, %v748_v16  ;;  %v145_v13 = vld [vmem:[%s4881_s15 + $0x38] sm:$0xff]  ;;  %v969_v15 = vld [vmem:[%s4910_s27 + $0x40] sm:$0xff] }
 0x454   :  { %4641 = vrsqrt.f32 %v769_v14  ;;  %v970_v14 = vld [vmem:[%s4910_s27 + $0x48] sm:$0xff]  ;;  %v968_v16 = vld [vmem:[%s4910_s27 + $0x38] sm:$0xff] }
 0x455   :  { %v766_v19 = vadd.f32 1e-05, %v758_v17  ;;  %v767_v20 = vadd.f32 1e-05, %v759_v18  ;;  %v967_v17 = vld [vmem:[%s4910_s27 + $0x30] sm:$0xff]  ;;  %v966_v18 = vld [vmem:[%s4910_s27 + $0x28] sm:$0xff] }
 0x456   :  { %v742_v21 = vpop.xlane.xlu0 %741  ;;  %v744_v22 = vpop.xlane.xlu1 %743 }
 0x457   :  { %4643 = vrsqrt.f32 %v766_v19  ;;  %v756_v23 = vmul.f32 0.0078125, %v742_v21  ;;  %v757_v24 = vmul.f32 0.0078125, %v744_v22  ;;  %v965_v19 = vld [vmem:[%s4910_s27 + $0x20] sm:$0xff]  ;;  %v963_v21 = vld [vmem:[%s4910_s27 + $0x10] sm:$0xff]  ;;  %v962_v22 = vld [vmem:[%s4910_s27 + $0x8] sm:$0xff] }
 0x458   :  { %4645 = vrsqrt.f32 %v767_v20  ;;  %v964_v20 = vld [vmem:[%s4910_s27 + $0x18] sm:$0xff] }
 0x459   :  { %v764_v25 = vadd.f32 1e-05, %v756_v23  ;;  %v765_v27 = vadd.f32 1e-05, %v757_v24  ;;  %v961_v23 = vld [vmem:[%s4910_s27] sm:$0xff]  ;;  %v1225_v24 = vld [vmem:[%s4947_s1 + $0x78] sm:$0xff] }
 0x45a   :  { %v740_v28 = vpop.xlane.xlu1 %739 }
 0x45b   :  { %4647 = vrsqrt.f32 %v764_v25  ;;  %v755_v29 = vmul.f32 0.0078125, %v740_v28  ;;  %v1224_v28 = vld [vmem:[%s4947_s1 + $0x70] sm:$0xff] }
 0x45c   :  { %v4638_v31 = vpop.eup %4637  ;;  %4649 = vrsqrt.f32 %v765_v27 }
 0x45d   :  { %v763_v35 = vadd.f32 1e-05, %v755_v29  ;;  %v786_v36 = vmul.f32 %v4638_v31, %v4827_v26  ;;  %v1223_v31 = vld [vmem:[%s4947_s1 + $0x68] sm:$0xff] }
 0x45f   :  { %4651 = vrsqrt.f32 %v763_v35  ;;  %v800_v38 = vmul.f32 %v3219_v32, %v786_v36  ;;  %v1222_v35 = vld [vmem:[%s4947_s1 + $0x60] sm:$0xff] }
 0x460   :  { %v4640_v39 = vpop.eup %4639 }
 0x461   :  { %v4642_v40 = vpop.eup %4641  ;;  %v4897_v42 = vadd.f32 %v3220_v37, %v800_v38  ;;  %v784_v43 = vmul.f32 %v4640_v39, %v4829_v30  ;;  %v1220_v39 = vld [vmem:[%s4947_s1 + $0x50] sm:$0xff] }
 0x462   :  { %v785_v45 = vmul.f32 %v4642_v40, %v4833_v33 }
 0x463   :  { %3934 = vmatprep.subr.mxu0 %v4897_v42  ;;  %v798_v50 = vmul.f32 %v3219_v32, %v784_v43 }
 0x464   :  { %v4644_v46 = vpop.eup %4643  ;;  %3935 = vmatpush3.msra.mxu0 %v4897_v42  ;;  %v799_v47 = vmul.f32 %v3219_v32, %v785_v45  ;;  %v1218_v45 = vld [vmem:[%s4947_s1 + $0x40] sm:$0xff] }
 0x465   :  { %v4646_v51 = vpop.eup %4645  ;;  %v782_v26 = vmul.f32 %v4644_v46, %v4841_v41  ;;  %v812_v55 = vadd.f32 %v3220_v37, %v798_v50  ;;  %v1217_v46 = vld [vmem:[%s4947_s1 + $0x38] sm:$0xff]  ;;  %v1215_v50 = vld [vmem:[%s4947_s1 + $0x28] sm:$0xff] }
 0x466   :  { %v813_v52 = vadd.f32 %v3220_v37, %v799_v47  ;;  %v783_v53 = vmul.f32 %v4646_v51, %v4835_v34  ;;  %v1216_v47 = vld [vmem:[%s4947_s1 + $0x30] sm:$0xff]  ;;  %v1214_v51 = vld [vmem:[%s4947_s1 + $0x20] sm:$0xff] }
 0x467   :  { %v796_v30 = vmul.f32 %v3219_v32, %v782_v26  ;;  %v1213_v26 = vld [vmem:[%s4947_s1 + $0x18] sm:$0xff] }
 0x468   :  { %v4648_v54 = vpop.eup %4647  ;;  %3936 = vmatprep.subr.mxu0 %v813_v52  ;;  %v797_v56 = vmul.f32 %v3219_v32, %v783_v53  ;;  %v1211_v53 = vld [vmem:[%s4947_s1 + $0x8] sm:$0xff] }
 0x469   :  { %v4650_v57 = vpop.eup %4649  ;;  %3937 = vmatpush3.msra.mxu0 %v813_v52  ;;  %v780_v33 = vmul.f32 %v4648_v54, %v4849_v48  ;;  %v810_v41 = vadd.f32 %v3220_v37, %v796_v30  ;;  %v1210_v54 = vld [vmem:[%s4947_s1] sm:$0xff]  ;;  %v1359_v30 = vld [vmem:[%s4968_s5 + $0x68] sm:$0xff] }
 0x46a   :  { %3938 = vmatprep.subr.mxu0 %v812_v55  ;;  %v811_v58 = vadd.f32 %v3220_v37, %v797_v56  ;;  %v781_v59 = vmul.f32 %v4650_v57, %v4845_v44  ;;  %v1360_v56 = vld [vmem:[%s4968_s5 + $0x70] sm:$0xff]  ;;  %v1358_v57 = vld [vmem:[%s4968_s5 + $0x60] sm:$0xff] }
 0x46b   :  { %3939 = vmatpush3.msra.mxu0 %v812_v55  ;;  %v794_v61 = vmul.f32 %v3219_v32, %v780_v33  ;;  %v1357_v33 = vld [vmem:[%s4968_s5 + $0x58] sm:$0xff] }
 0x46c   :  { %v4652_v34 = vpop.eup %4651  ;;  %3940 = vmatprep.subr.mxu0 %v811_v58  ;;  %v795_v60 = vmul.f32 %v3219_v32, %v781_v59  ;;  %v1355_v59 = vld [vmem:[%s4968_s5 + $0x48] sm:$0xff] }
 0x46d   :  { %3941 = vmatpush3.msra.mxu0 %v811_v58  ;;  %v779_v48 = vmul.f32 %v4652_v34, %v4851_v49  ;;  %v808_v63 = vadd.f32 %v3220_v37, %v794_v61  ;;  %v140_v49 = vld [vmem:[%s4881_s15 + $0x10] sm:$0xff]  ;;  %v1354_v34 = vld [vmem:[%s4968_s5 + $0x40] sm:$0xff]  ;;  %v1351_v61 = vld [vmem:[%s4968_s5 + $0x28] sm:$0xff] }
 0x46e   :  { %3942 = vmatprep.subr.mxu0 %v810_v41  ;;  %v809_v44 = vadd.f32 %v3220_v37, %v795_v60  ;;  %v1352_v60 = vld [vmem:[%s4968_s5 + $0x30] sm:$0xff] }
 0x46f   :  { %3943 = vmatpush3.msra.mxu0 %v810_v41  ;;  %v793_v62 = vmul.f32 %v3219_v32, %v779_v48  ;;  %v1350_v48 = vld [vmem:[%s4968_s5 + $0x20] sm:$0xff] }
 0x470   :  { %3944 = vmatprep.subr.mxu0 %v809_v44 }
 0x471   :  { %3945 = vmatpush3.msra.mxu0 %v809_v44  ;;  %v807_v0 = vadd.f32 %v3220_v37, %v793_v62  ;;  %v1221_v37 = vld [vmem:[%s4947_s1 + $0x58] sm:$0xff] }
 0x472   :  { %3946 = vmatprep.subr.mxu0 %v808_v63 }
 0x473   :  { %3947 = vmatpush3.msra.mxu0 %v808_v63  ;;  %4038 = vmatprep.mubr.f32.mxu1 %v807_v0 }
 0x474   :  { %3948 = vmatprep.subr.mxu0 %v807_v0  ;;  %4039 = vmatmul.mubr.f32.vlgmr.msra.gmra.mxu1 %v808_v63 }
 0x475   :  { %3949 = vmatpush3.msra.mxu0 %v807_v0  ;;  %4041 = vmatprep.mubr.f32.mxu1 %v809_v44 }
 0x476   :  { %3951 = vmatmul.mubr.msk.f32.vlgmr.msra.gmra.mxu0 %vm815_vm2, %v139_v1  ;;  %3962 = vmatprep.subr.mxu0 %v976_v2 }
 0x477   :  { %3953 = vmatprep.mubr.msk.f32.mxu0 %vm815_vm2, %v140_v49  ;;  %3963 = vmatpush3.msra.mxu0 %v976_v2  ;;  %v3229_v49 = vld [vmem:[%s4985_s9] ss:$0 sm:$0xff] }
 0x478   :  { %4042 = vmatmul.mubr.f32.gmra.mxu1 %v810_v41  ;;  %3964 = vmatprep.subr.mxu0 %v975_v3  ;;  %v1353_v41 = vld [vmem:[%s4968_s5 + $0x38] sm:$0xff] }
 0x479   :  { %4044 = vmatprep.mubr.f32.mxu1 %v811_v58  ;;  %3965 = vmatpush3.msra.mxu0 %v975_v3  ;;  %v1356_v58 = vld [vmem:[%s4968_s5 + $0x50] sm:$0xff] }
 0x47a   :  { %3954 = vmatmul.mubr.msk.f32.gmra.mxu0 %vm815_vm2, %v141_v4  ;;  %3966 = vmatprep.subr.mxu0 %v974_v6 }
 0x47b   :  { %3956 = vmatprep.mubr.msk.f32.mxu0 %vm815_vm2, %v142_v7  ;;  %3967 = vmatpush3.msra.mxu0 %v974_v6 }
 0x47c   :  { %4045 = vmatmul.mubr.f32.gmra.mxu1 %v812_v55  ;;  %3968 = vmatprep.subr.mxu0 %v973_v8  ;;  %v1361_v55 = vld [vmem:[%s4968_s5 + $0x78] sm:$0xff] }
 0x47d   :  { %4047 = vmatprep.mubr.f32.mxu1 %v813_v52  ;;  %3969 = vmatpush3.msra.mxu0 %v973_v8  ;;  %v1212_v52 = vld [vmem:[%s4947_s1 + $0x10] sm:$0xff] }
 0x47e   :  { %3957 = vmatmul.mubr.msk.f32.gmra.mxu0 %vm815_vm2, %v143_v9  ;;  %3970 = vmatprep.subr.mxu0 %v972_v10 }
 0x47f   :  { %3959 = vmatprep.mubr.msk.f32.mxu0 %vm815_vm2, %v144_v11  ;;  %3971 = vmatpush3.msra.mxu0 %v972_v10 }
 0x480   :  { %4048 = vmatmul.mubr.f32.gmra.mxu1 %v4897_v42  ;;  %3972 = vmatprep.subr.mxu0 %v971_v12  ;;  %v1219_v42 = vld [vmem:[%s4947_s1 + $0x48] sm:$0xff] }
 0x481   :  { %3973 = vmatpush3.msra.mxu0 %v971_v12  ;;  %4094 = vmatprep.subr.mxu1 %v1361_v55 }
 0x482   :  { %3960 = vmatmul.mubr.msk.f32.gmra.mxu0 %vm815_vm2, %v145_v13  ;;  %3974 = vmatprep.subr.mxu0 %v970_v14 }
 0x483   :  { %3975 = vmatpush3.msra.mxu0 %v970_v14  ;;  %4095 = vmatpush3.msra.mxu1 %v1361_v55  ;;  %v1491_v55 = vld [vmem:[%s4995_s14 + $0x48] sm:$0xff] }
 0x484   :  { %3976 = vmatprep.subr.mxu0 %v969_v15  ;;  %4096 = vmatprep.subr.mxu1 %v1360_v56 }
 0x485   :  { %3977 = vmatpush3.msra.mxu0 %v969_v15  ;;  %4097 = vmatpush3.msra.mxu1 %v1360_v56  ;;  %v1490_v56 = vld [vmem:[%s4995_s14 + $0x40] sm:$0xff] }
 0x486   :  { %3978 = vmatprep.subr.mxu0 %v968_v16  ;;  %4098 = vmatprep.subr.mxu1 %v1359_v30 }
 0x487   :  { %3979 = vmatpush3.msra.mxu0 %v968_v16  ;;  %4099 = vmatpush3.msra.mxu1 %v1359_v30  ;;  %v1489_v30 = vld [vmem:[%s4995_s14 + $0x38] sm:$0xff] }
 0x488   :  { %3980 = vmatprep.subr.mxu0 %v967_v17  ;;  %4100 = vmatprep.subr.mxu1 %v1358_v57 }
 0x489   :  { %3981 = vmatpush3.msra.mxu0 %v967_v17  ;;  %4101 = vmatpush3.msra.mxu1 %v1358_v57  ;;  %v1488_v57 = vld [vmem:[%s4995_s14 + $0x30] sm:$0xff] }
 0x48a   :  { %3982 = vmatprep.subr.mxu0 %v966_v18  ;;  %4102 = vmatprep.subr.mxu1 %v1357_v33 }
 0x48b   :  { %3983 = vmatpush3.msra.mxu0 %v966_v18  ;;  %4103 = vmatpush3.msra.mxu1 %v1357_v33  ;;  %v1487_v33 = vld [vmem:[%s4995_s14 + $0x28] sm:$0xff] }
 0x48c   :  { %3984 = vmatprep.subr.mxu0 %v965_v19  ;;  %4104 = vmatprep.subr.mxu1 %v1356_v58 }
 0x48d   :  { %3985 = vmatpush3.msra.mxu0 %v965_v19  ;;  %4105 = vmatpush3.msra.mxu1 %v1356_v58  ;;  %v1486_v58 = vld [vmem:[%s4995_s14 + $0x20] sm:$0xff] }
 0x48e   :  { %3986 = vmatprep.subr.mxu0 %v964_v20  ;;  %4106 = vmatprep.subr.mxu1 %v1355_v59 }
 0x48f   :  { %3987 = vmatpush3.msra.mxu0 %v964_v20  ;;  %4107 = vmatpush3.msra.mxu1 %v1355_v59  ;;  %v3230_v59 = vld [vmem:[%s5012_s19] ss:$0 sm:$0xff] }
 0x490   :  { %3988 = vmatprep.subr.mxu0 %v963_v21  ;;  %4108 = vmatprep.subr.mxu1 %v1354_v34 }
 0x491   :  { %3989 = vmatpush3.msra.mxu0 %v963_v21  ;;  %4109 = vmatpush3.msra.mxu1 %v1354_v34 }
 0x492   :  { %3990 = vmatprep.subr.mxu0 %v962_v22  ;;  %4110 = vmatprep.subr.mxu1 %v1353_v41 }
 0x493   :  { %3991 = vmatpush3.msra.mxu0 %v962_v22  ;;  %4111 = vmatpush3.msra.mxu1 %v1353_v41 }
 0x494   :  { %3992 = vmatprep.subr.mxu0 %v961_v23  ;;  %4112 = vmatprep.subr.mxu1 %v1352_v60 }
 0x495   :  { %3993 = vmatpush3.msra.mxu0 %v961_v23  ;;  %4113 = vmatpush3.msra.mxu1 %v1352_v60 }
 0x496   :  { %4050 = vmatprep.subr.mxu0 %v1225_v24  ;;  %4114 = vmatprep.subr.mxu1 %v1351_v61 }
 0x497   :  { %4115 = vmatpush3.msra.mxu1 %v1351_v61 }
 0x498   :  { %4116 = vmatprep.subr.mxu1 %v1350_v48 }
 0x499   :  { %4117 = vmatpush3.msra.mxu1 %v1350_v48 }
 0x534   :  { %v4040_v44 = vpop.f32.mrf.mxu1 }
 0x536   :  { %v3952_v25 = vpop.f32.mrf.mxu0  ;;  %v1148_v62 = vpop.f32.mrf.mxu1 }
 0x538   :  { %v906_v27 = vpop.f32.mrf.mxu0  ;;  %v4043_v63 = vpop.f32.mrf.mxu1 }
 0x539   :  { %3994 = vmatprep.mubr.f32.mxu0 %v906_v27 }
 0x53a   :  { %v3955_v29 = vpop.f32.mrf.mxu0  ;;  %3995 = vmatmul.mubr.f32.vlgmr.msra.gmra.mxu0 %v3952_v25  ;;  %v1158_v0 = vpop.f32.mrf.mxu1 }
 0x53b   :  { %4051 = vmatpush3.msra.mxu0 %v1225_v24 }
 0x53c   :  { %v916_v32 = vpop.f32.mrf.mxu0  ;;  %4052 = vmatprep.subr.mxu0 %v1224_v28  ;;  %v4046_v3 = vpop.f32.mrf.mxu1 }
 0x53d   :  { %3997 = vmatprep.mubr.f32.mxu0 %v916_v32  ;;  %4053 = vmatpush3.msra.mxu0 %v1224_v28 }
 0x53e   :  { %v3958_v36 = vpop.f32.mrf.mxu0  ;;  %3998 = vmatmul.mubr.f32.gmra.mxu0 %v3955_v29  ;;  %4054 = vmatprep.subr.mxu0 %v1223_v31  ;;  %v1168_v11 = vpop.f32.mrf.mxu1 }
 0x53f   :  { %4055 = vmatpush3.msra.mxu0 %v1223_v31 }
 0x540   :  { %v926_v38 = vpop.f32.mrf.mxu0  ;;  %4056 = vmatprep.subr.mxu0 %v1222_v35  ;;  %v4049_v20 = vpop.f32.mrf.mxu1 }
 0x541   :  { %4000 = vmatprep.mubr.f32.mxu0 %v926_v38  ;;  %4057 = vmatpush3.msra.mxu0 %v1222_v35 }
 0x542   :  { %v3961_v40 = vpop.f32.mrf.mxu0  ;;  %4001 = vmatmul.mubr.f32.gmra.mxu0 %v3958_v36  ;;  %4058 = vmatprep.subr.mxu0 %v1221_v37  ;;  %v1178_v31 = vpop.f32.mrf.mxu1 }
 0x543   :  { %4059 = vmatpush3.msra.mxu0 %v1221_v37 }
 0x544   :  { %v936_v43 = vpop.f32.mrf.mxu0  ;;  %4060 = vmatprep.subr.mxu0 %v1220_v39 }
 0x545   :  { %4003 = vmatprep.mubr.f32.mxu0 %v936_v43  ;;  %4061 = vmatpush3.msra.mxu0 %v1220_v39  ;;  %v1349_v43 = vld [vmem:[%s4968_s5 + $0x18] sm:$0xff] }
 0x546   :  { %4004 = vmatmul.mubr.f32.gmra.mxu0 %v3961_v40  ;;  %4062 = vmatprep.subr.mxu0 %v1219_v42 }
 0x547   :  { %4063 = vmatpush3.msra.mxu0 %v1219_v42  ;;  %4118 = vmatprep.subr.mxu1 %v1349_v43 }
 0x548   :  { %4064 = vmatprep.subr.mxu0 %v1218_v45  ;;  %4119 = vmatpush3.msra.mxu1 %v1349_v43 }
 0x549   :  { %4065 = vmatpush3.msra.mxu0 %v1218_v45  ;;  %v1348_v45 = vld [vmem:[%s4968_s5 + $0x10] sm:$0xff] }
 0x54a   :  { %4066 = vmatprep.subr.mxu0 %v1217_v46  ;;  %4120 = vmatprep.subr.mxu1 %v1348_v45 }
 0x54b   :  { %4067 = vmatpush3.msra.mxu0 %v1217_v46  ;;  %4121 = vmatpush3.msra.mxu1 %v1348_v45  ;;  %v1347_v46 = vld [vmem:[%s4968_s5 + $0x8] sm:$0xff] }
 0x54c   :  { %4068 = vmatprep.subr.mxu0 %v1216_v47  ;;  %4122 = vmatprep.subr.mxu1 %v1347_v46 }
 0x54d   :  { %4069 = vmatpush3.msra.mxu0 %v1216_v47  ;;  %4123 = vmatpush3.msra.mxu1 %v1347_v46  ;;  %v1346_v47 = vld [vmem:[%s4968_s5] sm:$0xff] }
 0x54e   :  { %4070 = vmatprep.subr.mxu0 %v1215_v50  ;;  %4124 = vmatprep.subr.mxu1 %v1346_v47 }
 0x54f   :  { %4071 = vmatpush3.msra.mxu0 %v1215_v50  ;;  %4125 = vmatpush3.msra.mxu1 %v1346_v47  ;;  %v1497_v50 = vld [vmem:[%s4995_s14 + $0x78] sm:$0xff] }
 0x550   :  { %4072 = vmatprep.subr.mxu0 %v1214_v51 }
 0x551   :  { %4073 = vmatpush3.msra.mxu0 %v1214_v51  ;;  %v1496_v51 = vld [vmem:[%s4995_s14 + $0x70] sm:$0xff] }
 0x552   :  { %4074 = vmatprep.subr.mxu0 %v1213_v26 }
 0x553   :  { %4075 = vmatpush3.msra.mxu0 %v1213_v26  ;;  %v1495_v26 = vld [vmem:[%s4995_s14 + $0x68] sm:$0xff] }
 0x554   :  { %4076 = vmatprep.subr.mxu0 %v1212_v52 }
 0x555   :  { %4077 = vmatpush3.msra.mxu0 %v1212_v52  ;;  %v1494_v52 = vld [vmem:[%s4995_s14 + $0x60] sm:$0xff] }
 0x556   :  { %4078 = vmatprep.subr.mxu0 %v1211_v53 }
 0x557   :  { %4079 = vmatpush3.msra.mxu0 %v1211_v53  ;;  %v1493_v53 = vld [vmem:[%s4995_s14 + $0x58] sm:$0xff] }
 0x558   :  { %4080 = vmatprep.subr.mxu0 %v1210_v54 }
 0x559   :  { %4081 = vmatpush3.msra.mxu0 %v1210_v54  ;;  %v1492_v54 = vld [vmem:[%s4995_s14 + $0x50] sm:$0xff] }
 0x55a   :  { %4138 = vmatprep.subr.mxu0 %v1497_v50 }
 0x5fa   :  { %v3996_v1 = vpop.f32.mrf.mxu0 }
 0x5fb   :  { %v1154_v2 = vadd.f32 %v4040_v44, %v3996_v1 }
 0x5fc   :  { %v1043_v4 = vpop.f32.mrf.mxu0 }
 0x5fd   :  { %v1149_v6 = vadd.f32 %v1148_v62, %v1043_v4  ;;  %v1195_v7 = vadd.f32 %v3229_v49, %v1154_v2 }
 0x5fe   :  { %v3999_v8 = vpop.f32.mrf.mxu0 }
 0x5ff   :  { %v1194_v9 = vadd.f32 %v3229_v49, %v1149_v6  ;;  %v1164_v10 = vadd.f32 %v4043_v63, %v3999_v8  ;;  %v1203_v15 = vmax.f32 %v1195_v7, 0.0 }
 0x600   :  { %v1053_v12 = vpop.f32.mrf.mxu0 }
 0x601   :  { %v1202_v13 = vmax.f32 %v1194_v9, 0.0  ;;  %v1159_v14 = vadd.f32 %v1158_v0, %v1053_v12  ;;  %v1197_v16 = vadd.f32 %v3229_v49, %v1164_v10 }
 0x602   :  { %v4002_v17 = vpop.f32.mrf.mxu0 }
 0x603   :  { %v1196_v18 = vadd.f32 %v3229_v49, %v1159_v14  ;;  %v1174_v19 = vadd.f32 %v4046_v3, %v4002_v17  ;;  %4082 = vmatprep.mubr.f32.mxu0 %v1202_v13  ;;  %v1205_v24 = vmax.f32 %v1197_v16, 0.0  ;;  %v1485_v16 = vld [vmem:[%s4995_s14 + $0x18] sm:$0xff]  ;;  %v1484_v17 = vld [vmem:[%s4995_s14 + $0x10] sm:$0xff] }
 0x604   :  { %v1063_v21 = vpop.f32.mrf.mxu0  ;;  %4083 = vmatmul.mubr.f32.vlgmr.msra.gmra.mxu0 %v1203_v15 }
 0x605   :  { %v1204_v22 = vmax.f32 %v1196_v18, 0.0  ;;  %v1169_v23 = vadd.f32 %v1168_v11, %v1063_v21  ;;  %v1199_v25 = vadd.f32 %v3229_v49, %v1174_v19  ;;  %4139 = vmatpush3.msra.mxu0 %v1497_v50  ;;  %v1483_v18 = vld [vmem:[%s4995_s14 + $0x8] sm:$0xff]  ;;  %v1482_v19 = vld [vmem:[%s4995_s14] sm:$0xff] }
 0x606   :  { %v4005_v27 = vpop.f32.mrf.mxu0  ;;  %4140 = vmatprep.subr.mxu0 %v1496_v51 }
 0x607   :  { %v1198_v28 = vadd.f32 %v3229_v49, %v1169_v23  ;;  %v1184_v29 = vadd.f32 %v4049_v20, %v4005_v27  ;;  %4085 = vmatprep.mubr.f32.mxu0 %v1204_v22  ;;  %v1207_v37 = vmax.f32 %v1199_v25, 0.0  ;;  %4141 = vmatpush3.msra.mxu0 %v1496_v51  ;;  %v3231_v20 = vld [vmem:[%s5022_s23] ss:$0 sm:$0xff] }
 0x608   :  { %v1073_v32 = vpop.f32.mrf.mxu0  ;;  %4086 = vmatmul.mubr.f32.gmra.mxu0 %v1205_v24  ;;  %4142 = vmatprep.subr.mxu0 %v1495_v26 }
 0x609   :  { %v1206_v35 = vmax.f32 %v1198_v28, 0.0  ;;  %v1179_v36 = vadd.f32 %v1178_v31, %v1073_v32  ;;  %v1201_v38 = vadd.f32 %v3229_v49, %v1184_v29  ;;  %4143 = vmatpush3.msra.mxu0 %v1495_v26 }
 0x60a   :  { %4144 = vmatprep.subr.mxu0 %v1494_v52 }
 0x60b   :  { %v1200_v39 = vadd.f32 %v3229_v49, %v1179_v36  ;;  %4088 = vmatprep.mubr.f32.mxu0 %v1206_v35  ;;  %v1209_v42 = vmax.f32 %v1201_v38, 0.0  ;;  %4145 = vmatpush3.msra.mxu0 %v1494_v52 }
 0x60c   :  { %4089 = vmatmul.mubr.f32.gmra.mxu0 %v1207_v37  ;;  %4146 = vmatprep.subr.mxu0 %v1493_v53 }
 0x60d   :  { %v1208_v40 = vmax.f32 %v1200_v39, 0.0  ;;  %4147 = vmatpush3.msra.mxu0 %v1493_v53 }
 0x60e   :  { %4148 = vmatprep.subr.mxu0 %v1492_v54 }
 0x60f   :  { %4091 = vmatprep.mubr.f32.mxu0 %v1208_v40  ;;  %4149 = vmatpush3.msra.mxu0 %v1492_v54 }
 0x610   :  { %4092 = vmatmul.mubr.f32.gmra.mxu0 %v1209_v42  ;;  %4150 = vmatprep.subr.mxu0 %v1491_v55 }
 0x611   :  { %4151 = vmatpush3.msra.mxu0 %v1491_v55 }
 0x612   :  { %4152 = vmatprep.subr.mxu0 %v1490_v56 }
 0x613   :  { %4153 = vmatpush3.msra.mxu0 %v1490_v56 }
 0x614   :  { %4154 = vmatprep.subr.mxu0 %v1489_v30 }
 0x615   :  { %4155 = vmatpush3.msra.mxu0 %v1489_v30 }
 0x616   :  { %4156 = vmatprep.subr.mxu0 %v1488_v57 }
 0x617   :  { %4157 = vmatpush3.msra.mxu0 %v1488_v57  ;;  %v3232_v57 = vld [vmem:[%s5030_s28] ss:$0 sm:$0xff] }
 0x618   :  { %4158 = vmatprep.subr.mxu0 %v1487_v33 }
 0x619   :  { %4159 = vmatpush3.msra.mxu0 %v1487_v33 }
 0x61a   :  { %4160 = vmatprep.subr.mxu0 %v1486_v58 }
 0x61b   :  { %4161 = vmatpush3.msra.mxu0 %v1486_v58 }
 0x61c   :  { %4162 = vmatprep.subr.mxu0 %v1485_v16 }
 0x61d   :  { %4163 = vmatpush3.msra.mxu0 %v1485_v16 }
 0x61e   :  { %4164 = vmatprep.subr.mxu0 %v1484_v17 }
 0x61f   :  { %4165 = vmatpush3.msra.mxu0 %v1484_v17 }
 0x620   :  { %4166 = vmatprep.subr.mxu0 %v1483_v18 }
 0x621   :  { %4167 = vmatpush3.msra.mxu0 %v1483_v18 }
 0x622   :  { %4168 = vmatprep.subr.mxu0 %v1482_v19 }
 0x623   :  { %4169 = vmatpush3.msra.mxu0 %v1482_v19 }
 0x6c4   :  { %v4084_v34 = vpop.f32.mrf.mxu0 }
 0x6c5   :  { %v1305_v41 = vadd.f32 %v4084_v34, %v3230_v59 }
 0x6c6   :  { %v1299_v60 = vpop.f32.mrf.mxu0 }
 0x6c7   :  { %v1300_v61 = vadd.f32 %v3230_v59, %v1299_v60  ;;  %v1339_v62 = vmax.f32 %v1305_v41, 0.0 }
 0x6c8   :  { %v4087_v48 = vpop.f32.mrf.mxu0 }
 0x6c9   :  { %v1338_v44 = vmax.f32 %v1300_v61, 0.0  ;;  %v1315_v63 = vadd.f32 %v4087_v48, %v3230_v59 }
 0x6ca   :  { %v1309_v0 = vpop.f32.mrf.mxu0 }
 0x6cb   :  { %v1310_v1 = vadd.f32 %v3230_v59, %v1309_v0  ;;  %4126 = vmatprep.mubr.f32.mxu1 %v1338_v44  ;;  %v1341_v3 = vmax.f32 %v1315_v63, 0.0 }
 0x6cc   :  { %v4090_v2 = vpop.f32.mrf.mxu0  ;;  %4127 = vmatmul.mubr.f32.vlgmr.msra.gmra.mxu1 %v1339_v62 }
 0x6cd   :  { %v1340_v49 = vmax.f32 %v1310_v1, 0.0  ;;  %v1325_v4 = vadd.f32 %v4090_v2, %v3230_v59 }
 0x6ce   :  { %v1319_v6 = vpop.f32.mrf.mxu0 }
 0x6cf   :  { %v1320_v7 = vadd.f32 %v3230_v59, %v1319_v6  ;;  %4129 = vmatprep.mubr.f32.mxu1 %v1340_v49  ;;  %v1343_v10 = vmax.f32 %v1325_v4, 0.0 }
 0x6d0   :  { %v4093_v8 = vpop.f32.mrf.mxu0  ;;  %4130 = vmatmul.mubr.f32.gmra.mxu1 %v1341_v3 }
 0x6d1   :  { %v1342_v9 = vmax.f32 %v1320_v7, 0.0  ;;  %v1335_v11 = vadd.f32 %v4093_v8, %v3230_v59 }
 0x6d2   :  { %v1329_v12 = vpop.f32.mrf.mxu0 }
 0x6d3   :  { %v1330_v13 = vadd.f32 %v3230_v59, %v1329_v12  ;;  %4132 = vmatprep.mubr.f32.mxu1 %v1342_v9  ;;  %v1345_v15 = vmax.f32 %v1335_v11, 0.0 }
 0x6d4   :  { %4133 = vmatmul.mubr.f32.gmra.mxu1 %v1343_v10 }
 0x6d5   :  { %v1344_v14 = vmax.f32 %v1330_v13, 0.0 }
 0x6d7   :  { %4135 = vmatprep.mubr.f32.mxu1 %v1344_v14 }
 0x6d8   :  { %4136 = vmatmul.mubr.f32.gmra.mxu1 %v1345_v15 }
 0x78c   :  { %v4128_v21 = vpop.f32.mrf.mxu1 }
 0x78d   :  { %v1441_v22 = vadd.f32 %v4128_v21, %v3231_v20 }
 0x78e   :  { %v1435_v23 = vpop.f32.mrf.mxu1 }
 0x78f   :  { %v1436_v24 = vadd.f32 %v3231_v20, %v1435_v23  ;;  %v1475_v28 = vmax.f32 %v1441_v22, 0.0 }
 0x790   :  { %v4131_v25 = vpop.f32.mrf.mxu1 }
 0x791   :  { %v1474_v27 = vmax.f32 %v1436_v24, 0.0  ;;  %v1451_v29 = vadd.f32 %v4131_v25, %v3231_v20 }
 0x792   :  { %v1445_v31 = vpop.f32.mrf.mxu1 }
 0x793   :  { %v1446_v32 = vadd.f32 %v3231_v20, %v1445_v31  ;;  %4170 = vmatprep.mubr.f32.mxu0 %v1474_v27  ;;  %v1477_v37 = vmax.f32 %v1451_v29, 0.0 }
 0x794   :  { %v4134_v35 = vpop.f32.mrf.mxu1  ;;  %4171 = vmatmul.mubr.f32.vlgmr.msra.gmra.mxu0 %v1475_v28 }
 0x795   :  { %v1476_v36 = vmax.f32 %v1446_v32, 0.0  ;;  %v1461_v38 = vadd.f32 %v4134_v35, %v3231_v20  ;;  %v3274_v32 = vld [vmem:[%s4910_s27 + $0xf8] sm:$0xff]  ;;  %v3273_v35 = vld [vmem:[%s4910_s27 + $0xf0] sm:$0xff] }
 0x796   :  { %v1455_v39 = vpop.f32.mrf.mxu1  ;;  %4210 = vmatprep.subr.mxu1 %v3274_v32 }
 0x797   :  { %v1456_v40 = vadd.f32 %v3231_v20, %v1455_v39  ;;  %4173 = vmatprep.mubr.f32.mxu0 %v1476_v36  ;;  %v1479_v45 = vmax.f32 %v1461_v38, 0.0  ;;  %4211 = vmatpush3.msra.mxu1 %v3274_v32  ;;  %v3272_v36 = vld [vmem:[%s4910_s27 + $0xe8] sm:$0xff]  ;;  %v3270_v38 = vld [vmem:[%s4910_s27 + $0xd8] sm:$0xff]  ;;  %v3269_v39 = vld [vmem:[%s4910_s27 + $0xd0] sm:$0xff] }
 0x798   :  { %v4137_v42 = vpop.f32.mrf.mxu1  ;;  %4174 = vmatmul.mubr.f32.gmra.mxu0 %v1477_v37  ;;  %4212 = vmatprep.subr.mxu1 %v3273_v35  ;;  %v3271_v37 = vld [vmem:[%s4910_s27 + $0xe0] sm:$0xff] }
 0x799   :  { %v1478_v43 = vmax.f32 %v1456_v40, 0.0  ;;  %v1471_v46 = vadd.f32 %v4137_v42, %v3231_v20  ;;  %4213 = vmatpush3.msra.mxu1 %v3273_v35  ;;  %v3268_v40 = vld [vmem:[%s4910_s27 + $0xc8] sm:$0xff]  ;;  %v3267_v42 = vld [vmem:[%s4910_s27 + $0xc0] sm:$0xff] }
 0x79a   :  { %v1465_v47 = vpop.f32.mrf.mxu1  ;;  %4214 = vmatprep.subr.mxu1 %v3272_v36 }
 0x79b   :  { %v1466_v50 = vadd.f32 %v3231_v20, %v1465_v47  ;;  %4176 = vmatprep.mubr.f32.mxu0 %v1478_v43  ;;  %v1481_v26 = vmax.f32 %v1471_v46, 0.0  ;;  %4215 = vmatpush3.msra.mxu1 %v3272_v36  ;;  %v3266_v43 = vld [vmem:[%s4910_s27 + $0xb8] sm:$0xff]  ;;  %v3264_v46 = vld [vmem:[%s4910_s27 + $0xa8] sm:$0xff]  ;;  %v3263_v47 = vld [vmem:[%s4910_s27 + $0xa0] sm:$0xff] }
 0x79c   :  { %4177 = vmatmul.mubr.f32.gmra.mxu0 %v1479_v45  ;;  %4216 = vmatprep.subr.mxu1 %v3271_v37  ;;  %v3265_v45 = vld [vmem:[%s4910_s27 + $0xb0] sm:$0xff] }
 0x79d   :  { %v1480_v51 = vmax.f32 %v1466_v50, 0.0  ;;  %4217 = vmatpush3.msra.mxu1 %v3271_v37  ;;  %v3262_v50 = vld [vmem:[%s4910_s27 + $0x98] sm:$0xff] }
 0x79e   :  { %4218 = vmatprep.subr.mxu1 %v3270_v38 }
 0x79f   :  { %4179 = vmatprep.mubr.f32.mxu0 %v1480_v51  ;;  %4219 = vmatpush3.msra.mxu1 %v3270_v38  ;;  %v3261_v51 = vld [vmem:[%s4910_s27 + $0x90] sm:$0xff] }
 0x7a0   :  { %4180 = vmatmul.mubr.f32.gmra.mxu0 %v1481_v26  ;;  %4220 = vmatprep.subr.mxu1 %v3269_v39 }
 0x7a1   :  { %4198 = vmatprep.mubr.msk.f32.mxu0 %vm815_vm2, %v4886_v5  ;;  %4221 = vmatpush3.msra.mxu1 %v3269_v39 }
 0x7a2   :  { %4222 = vmatprep.subr.mxu1 %v3268_v40 }
 0x7a3   :  { %4223 = vmatpush3.msra.mxu1 %v3268_v40 }
 0x7a4   :  { %4224 = vmatprep.subr.mxu1 %v3267_v42 }
 0x7a5   :  { %4225 = vmatpush3.msra.mxu1 %v3267_v42 }
 0x7a6   :  { %4226 = vmatprep.subr.mxu1 %v3266_v43 }
 0x7a7   :  { %4227 = vmatpush3.msra.mxu1 %v3266_v43 }
 0x7a8   :  { %4228 = vmatprep.subr.mxu1 %v3265_v45 }
 0x7a9   :  { %4229 = vmatpush3.msra.mxu1 %v3265_v45  ;;  %v3258_v45 = vld [vmem:[%s4860_s11 + $0xf8] sm:$0xff] }
 0x7aa   :  { %4230 = vmatprep.subr.mxu1 %v3264_v46 }
 0x7ab   :  { %4231 = vmatpush3.msra.mxu1 %v3264_v46  ;;  %v4685_v46 = vld [vmem:[%s4881_s15 + $0x8] sm:$0xff] }
 0x7ac   :  { %4232 = vmatprep.subr.mxu1 %v3263_v47 }
 0x7ad   :  { %4233 = vmatpush3.msra.mxu1 %v3263_v47  ;;  %v4686_v47 = vld [vmem:[%s4881_s15 + $0x10] sm:$0xff] }
 0x7ae   :  { %4234 = vmatprep.subr.mxu1 %v3262_v50 }
 0x7af   :  { %4235 = vmatpush3.msra.mxu1 %v3262_v50  ;;  %v3256_v50 = vld [vmem:[%s4860_s11 + $0xe8] sm:$0xff] }
 0x7b0   :  { %4236 = vmatprep.subr.mxu1 %v3261_v51 }
 0x7b1   :  { %4237 = vmatpush3.msra.mxu1 %v3261_v51  ;;  %v3255_v51 = vld [vmem:[%s4860_s11 + $0xe0] sm:$0xff] }
 0x854   :  { %v4172_v52 = vpop.f32.mrf.mxu0 }
 0x855   :  { %v1577_v48 = vadd.f32 %v4172_v52, %v3232_v57 }
 0x856   :  { %v1571_v53 = vpop.f32.mrf.mxu0 }
 0x857   :  { %v1572_v44 = vadd.f32 %v3232_v57, %v1571_v53 }
 0x858   :  { %v4175_v54 = vpop.f32.mrf.mxu0 }
 0x859   :  { %v1587_v60 = vadd.f32 %v4175_v54, %v3232_v57 }
 0x85a   :  { %v1581_v55 = vpop.f32.mrf.mxu0 }
 0x85b   :  { %v1582_v61 = vadd.f32 %v3232_v57, %v1581_v55 }
 0x85c   :  { %v4178_v56 = vpop.f32.mrf.mxu0 }
 0x85d   :  { %v1597_v5 = vadd.f32 %v4178_v56, %v3232_v57 }
 0x85e   :  { %v1591_v30 = vpop.f32.mrf.mxu0 }
 0x85f   :  { %v1592_v41 = vadd.f32 %v3232_v57, %v1591_v30 }
 0x860   :  { %v4181_v33 = vpop.f32.mrf.mxu0 }
 0x861   :  { %v1607_v58 = vadd.f32 %v4181_v33, %v3232_v57 }
 0x862   :  { %v1601_v59 = vpop.f32.mrf.mxu0 }
 0x863   :  { %v1602_v34 = vadd.f32 %v3232_v57, %v1601_v59  ;;  %1626 = vadd.xlane.f32.xlu0 %v1607_v58 }
 0x865   :  { %1624 = vadd.xlane.f32.xlu1 %v1602_v34 }
 0x867   :  { %1622 = vadd.xlane.f32.xlu0 %v1597_v5 }
 0x869   :  { %1620 = vadd.xlane.f32.xlu1 %v1592_v41 }
 0x86b   :  { %1618 = vadd.xlane.f32.xlu0 %v1587_v60 }
 0x86d   :  { %1616 = vadd.xlane.f32.xlu1 %v1582_v61 }
 0x86f   :  { %1614 = vadd.xlane.f32.xlu0 %v1577_v48 }
 0x871   :  { %1612 = vadd.xlane.f32.xlu1 %v1572_v44 }
 0x8ec   :  { %v1627_v62 = vpop.xlane.xlu0 %1626 }
 0x8ed   :  { %v1635_v63 = vmul.f32 0.0078125, %v1627_v62 }
 0x8ee   :  { %v1625_v0 = vpop.xlane.xlu1 %1624 }
 0x8ef   :  { %v5033_v1 = vsub.f32 %v1607_v58, %v1635_v63  ;;  %v1634_v2 = vmul.f32 0.0078125, %v1625_v0 }
 0x8f0   :  { %v1623_v49 = vpop.xlane.xlu0 %1622 }
 0x8f1   :  { %v5035_v3 = vsub.f32 %v1602_v34, %v1634_v2  ;;  %v1633_v4 = vmul.f32 0.0078125, %v1623_v49  ;;  %v1651_v6 = vmul.f32 %v5033_v1, %v5033_v1 }
 0x8f2   :  { %v1621_v7 = vpop.xlane.xlu1 %1620 }
 0x8f3   :  { %v5039_v8 = vsub.f32 %v1597_v5, %v1633_v4  ;;  %v1632_v9 = vmul.f32 0.0078125, %v1621_v7  ;;  %1666 = vadd.xlane.f32.xlu0 %v1651_v6  ;;  %v1650_v10 = vmul.f32 %v5035_v3, %v5035_v3  ;;  %v3233_v7 = vld [vmem:[%s5082_s3] ss:$0 sm:$0xff] }
 0x8f4   :  { %v1619_v11 = vpop.xlane.xlu0 %1618 }
 0x8f5   :  { %v5043_v12 = vsub.f32 %v1592_v41, %v1632_v9  ;;  %v1631_v13 = vmul.f32 0.0078125, %v1619_v11  ;;  %1664 = vadd.xlane.f32.xlu1 %v1650_v10  ;;  %v1649_v14 = vmul.f32 %v5039_v8, %v5039_v8  ;;  %v3234_v11 = vld [vmem:[%s5087_s8] ss:$0 sm:$0xff] }
 0x8f6   :  { %v1617_v15 = vpop.xlane.xlu1 %1616 }
 0x8f7   :  { %v5047_v16 = vsub.f32 %v1587_v60, %v1631_v13  ;;  %v1630_v17 = vmul.f32 0.0078125, %v1617_v15  ;;  %1662 = vadd.xlane.f32.xlu0 %v1649_v14  ;;  %v1648_v18 = vmul.f32 %v5043_v12, %v5043_v12 }
 0x8f8   :  { %v1615_v19 = vpop.xlane.xlu0 %1614 }
 0x8f9   :  { %v5051_v20 = vsub.f32 %v1582_v61, %v1630_v17  ;;  %v1629_v21 = vmul.f32 0.0078125, %v1615_v19  ;;  %1660 = vadd.xlane.f32.xlu1 %v1648_v18  ;;  %v1647_v22 = vmul.f32 %v5047_v16, %v5047_v16 }
 0x8fa   :  { %v1613_v23 = vpop.xlane.xlu1 %1612 }
 0x8fb   :  { %v5055_v24 = vsub.f32 %v1577_v48, %v1629_v21  ;;  %v1628_v25 = vmul.f32 0.0078125, %v1613_v23  ;;  %1658 = vadd.xlane.f32.xlu0 %v1647_v22  ;;  %v1646_v27 = vmul.f32 %v5051_v20, %v5051_v20 }
 0x8fd   :  { %v5059_v28 = vsub.f32 %v1572_v44, %v1628_v25  ;;  %1656 = vadd.xlane.f32.xlu1 %v1646_v27  ;;  %v1645_v29 = vmul.f32 %v5055_v24, %v5055_v24 }
 0x8ff   :  { %1654 = vadd.xlane.f32.xlu0 %v1645_v29  ;;  %v1644_v31 = vmul.f32 %v5059_v28, %v5059_v28 }
 0x901   :  { %1652 = vadd.xlane.f32.xlu1 %v1644_v31 }
 0x97c   :  { %v1667_v26 = vpop.xlane.xlu0 %1666 }
 0x97d   :  { %v1675_v52 = vmul.f32 0.0078125, %v1667_v26  ;;  %v4687_v26 = vld [vmem:[%s4881_s15 + $0x18] sm:$0xff] }
 0x97e   :  { %v1665_v53 = vpop.xlane.xlu1 %1664 }
 0x97f   :  { %v1683_v54 = vadd.f32 1e-05, %v1675_v52  ;;  %v1674_v55 = vmul.f32 0.0078125, %v1665_v53  ;;  %v4688_v52 = vld [vmem:[%s4881_s15 + $0x20] sm:$0xff]  ;;  %v3254_v53 = vld [vmem:[%s4860_s11 + $0xd8] sm:$0xff] }
 0x980   :  { %v1663_v56 = vpop.xlane.xlu0 %1662 }
 0x981   :  { %4653 = vrsqrt.f32 %v1683_v54  ;;  %v1682_v30 = vadd.f32 1e-05, %v1674_v55  ;;  %v1673_v57 = vmul.f32 0.0078125, %v1663_v56  ;;  %v3253_v54 = vld [vmem:[%s4860_s11 + $0xd0] sm:$0xff]  ;;  %v4689_v55 = vld [vmem:[%s4881_s15 + $0x28] sm:$0xff] }
 0x982   :  { %v1661_v33 = vpop.xlane.xlu1 %1660  ;;  %v4690_v56 = vld [vmem:[%s4881_s15 + $0x30] sm:$0xff] }
 0x983   :  { %4655 = vrsqrt.f32 %v1682_v30  ;;  %v1681_v58 = vadd.f32 1e-05, %v1673_v57  ;;  %v1672_v59 = vmul.f32 0.0078125, %v1661_v33  ;;  %v3252_v30 = vld [vmem:[%s4860_s11 + $0xc8] sm:$0xff]  ;;  %v3251_v57 = vld [vmem:[%s4860_s11 + $0xc0] sm:$0xff]  ;;  %v4691_v33 = vld [vmem:[%s4881_s15 + $0x38] sm:$0xff]  ;;  %s3204_s15 = sld [smem:[%s5359_s0 + %s4721_s7]]  }
 0x984   :  { %v1659_v34 = vpop.xlane.xlu0 %1658 }
 0x985   :  { %4657 = vrsqrt.f32 %v1681_v58  ;;  %v1680_v5 = vadd.f32 1e-05, %v1672_v59  ;;  %v1671_v41 = vmul.f32 0.0078125, %v1659_v34  ;;  %v3250_v58 = vld [vmem:[%s4860_s11 + $0xb8] sm:$0xff]  ;;  %v3249_v59 = vld [vmem:[%s4860_s11 + $0xb0] sm:$0xff]  ;;  %v3248_v34 = vld [vmem:[%s4860_s11 + $0xa8] sm:$0xff] }
 0x986   :  { %v1657_v60 = vpop.xlane.xlu1 %1656 }
 0x987   :  { %4659 = vrsqrt.f32 %v1680_v5  ;;  %v1679_v61 = vadd.f32 1e-05, %v1671_v41  ;;  %v1670_v48 = vmul.f32 0.0078125, %v1657_v60  ;;  %v3247_v5 = vld [vmem:[%s4860_s11 + $0xa0] sm:$0xff]  ;;  %v3246_v41 = vld [vmem:[%s4860_s11 + $0x98] sm:$0xff]  ;;  %v3245_v60 = vld [vmem:[%s4860_s11 + $0x90] sm:$0xff] }
 0x988   :  { %v1655_v44 = vpop.xlane.xlu0 %1654 }
 0x989   :  { %4661 = vrsqrt.f32 %v1679_v61  ;;  %v1678_v62 = vadd.f32 1e-05, %v1670_v48  ;;  %v1669_v63 = vmul.f32 0.0078125, %v1655_v44  ;;  %v3244_v61 = vld [vmem:[%s4860_s11 + $0x88] sm:$0xff]  ;;  %v3243_v48 = vld [vmem:[%s4860_s11 + $0x80] sm:$0xff] }
 0x98a   :  { %v1653_v0 = vpop.xlane.xlu1 %1652  ;;  %v3260_v44 = vld [vmem:[%s4910_s27 + $0x88] sm:$0xff] }
 0x98b   :  { %4663 = vrsqrt.f32 %v1678_v62  ;;  %v1677_v2 = vadd.f32 1e-05, %v1669_v63  ;;  %v1668_v49 = vmul.f32 0.0078125, %v1653_v0  ;;  %4238 = vmatprep.subr.mxu1 %v3260_v44  ;;  %v3259_v62 = vld [vmem:[%s4910_s27 + $0x80] sm:$0xff]  ;;  %v3292_v63 = vld [vmem:[%s4947_s1 + $0xf8] sm:$0xff]  ;;  %s4722_s27 = smov 31  }
 0x98c   :  { %4239 = vmatpush3.msra.mxu1 %v3260_v44 }
 0x98d   :  { %4665 = vrsqrt.f32 %v1677_v2  ;;  %v1676_v4 = vadd.f32 1e-05, %v1668_v49  ;;  %4240 = vmatprep.subr.mxu1 %v3259_v62  ;;  %v3291_v49 = vld [vmem:[%s4947_s1 + $0xf0] sm:$0xff] }
 0x98e   :  { %v4654_v6 = vpop.eup %4653  ;;  %4241 = vmatpush3.msra.mxu1 %v3259_v62 }
 0x98f   :  { %4667 = vrsqrt.f32 %v1676_v4  ;;  %v1699_v9 = vmul.f32 %v4654_v6, %v5033_v1  ;;  %4298 = vmatprep.subr.mxu1 %v3292_v63  ;;  %v3290_v6 = vld [vmem:[%s4947_s1 + $0xe8] sm:$0xff] }
 0x990   :  { %v4656_v10 = vpop.eup %4655 }
 0x991   :  { %v1713_v13 = vmul.f32 %v3233_v7, %v1699_v9  ;;  %v1698_v14 = vmul.f32 %v4656_v10, %v5035_v3  ;;  %v3289_v9 = vld [vmem:[%s4947_s1 + $0xe0] sm:$0xff] }
 0x992   :  { %v4658_v15 = vpop.eup %4657 }
 0x993   :  { %v5093_v17 = vadd.f32 %v3234_v11, %v1713_v13  ;;  %v1712_v18 = vmul.f32 %v3233_v7, %v1698_v14  ;;  %v1697_v19 = vmul.f32 %v4658_v15, %v5039_v8  ;;  %v3287_v14 = vld [vmem:[%s4947_s1 + $0xd0] sm:$0xff] }
 0x994   :  { %v4660_v21 = vpop.eup %4659 }
 0x995   :  { %4182 = vmatprep.subr.mxu0 %v5093_v17  ;;  %v5097_v22 = vadd.f32 %v3234_v11, %v1712_v18  ;;  %v1711_v23 = vmul.f32 %v3233_v7, %v1697_v19  ;;  %v1696_v25 = vmul.f32 %v4660_v21, %v5043_v12  ;;  %v3285_v19 = vld [vmem:[%s4947_s1 + $0xc0] sm:$0xff]  ;;  %v3284_v21 = vld [vmem:[%s4947_s1 + $0xb8] sm:$0xff] }
 0x996   :  { %v4662_v1 = vpop.eup %4661  ;;  %4183 = vmatpush3.msra.mxu0 %v5093_v17 }
 0x997   :  { %4184 = vmatprep.subr.mxu0 %v5097_v22  ;;  %v5102_v3 = vadd.f32 %v3234_v11, %v1711_v23  ;;  %v1710_v27 = vmul.f32 %v3233_v7, %v1696_v25  ;;  %v1695_v29 = vmul.f32 %v4662_v1, %v5047_v16  ;;  %v3282_v23 = vld [vmem:[%s4947_s1 + $0xa8] sm:$0xff]  ;;  %v3281_v25 = vld [vmem:[%s4947_s1 + $0xa0] sm:$0xff]  ;;  %v3280_v1 = vld [vmem:[%s4947_s1 + $0x98] sm:$0xff] }
 0x998   :  { %v4664_v31 = vpop.eup %4663  ;;  %4185 = vmatpush3.msra.mxu0 %v5097_v22 }
 0x999   :  { %4186 = vmatprep.subr.mxu0 %v5102_v3  ;;  %v5107_v8 = vadd.f32 %v3234_v11, %v1710_v27  ;;  %v1709_v32 = vmul.f32 %v3233_v7, %v1695_v29  ;;  %v1694_v12 = vmul.f32 %v4664_v31, %v5051_v20  ;;  %v3278_v27 = vld [vmem:[%s4947_s1 + $0x88] sm:$0xff]  ;;  %v3277_v29 = vld [vmem:[%s4947_s1 + $0x80] sm:$0xff]  ;;  %v3310_v31 = vld [vmem:[%s4968_s5 + $0xf8] sm:$0xff] }
 0x99a   :  { %v4666_v35 = vpop.eup %4665  ;;  %4187 = vmatpush3.msra.mxu0 %v5102_v3 }
 0x99b   :  { %4188 = vmatprep.subr.mxu0 %v5107_v8  ;;  %v5112_v36 = vadd.f32 %v3234_v11, %v1709_v32  ;;  %v1708_v37 = vmul.f32 %v3233_v7, %v1694_v12  ;;  %v1693_v16 = vmul.f32 %v4666_v35, %v5055_v24  ;;  %v3308_v32 = vld [vmem:[%s4968_s5 + $0xe8] sm:$0xff]  ;;  %v3307_v12 = vld [vmem:[%s4968_s5 + $0xe0] sm:$0xff]  ;;  %v3306_v35 = vld [vmem:[%s4968_s5 + $0xd8] sm:$0xff] }
 0x99c   :  { %v4668_v38 = vpop.eup %4667  ;;  %4189 = vmatpush3.msra.mxu0 %v5107_v8 }
 0x99d   :  { %4190 = vmatprep.subr.mxu0 %v5112_v36  ;;  %v5117_v39 = vadd.f32 %v3234_v11, %v1708_v37  ;;  %v1707_v20 = vmul.f32 %v3233_v7, %v1693_v16  ;;  %v1692_v40 = vmul.f32 %v4668_v38, %v5059_v28  ;;  %v3257_v28 = vld [vmem:[%s4860_s11 + $0xf0] sm:$0xff]  ;;  %v3304_v37 = vld [vmem:[%s4968_s5 + $0xc8] sm:$0xff]  ;;  %v3303_v16 = vld [vmem:[%s4968_s5 + $0xc0] sm:$0xff]  ;;  %s4714_s11 = smov 23  }
 0x99e   :  { %4191 = vmatpush3.msra.mxu0 %v5112_v36  ;;  %v3302_v38 = vld [vmem:[%s4968_s5 + $0xb8] sm:$0xff] }
 0x99f   :  { %4192 = vmatprep.subr.mxu0 %v5117_v39  ;;  %v5122_v42 = vadd.f32 %v3234_v11, %v1707_v20  ;;  %v1706_v24 = vmul.f32 %v3233_v7, %v1692_v40  ;;  %v3300_v20 = vld [vmem:[%s4968_s5 + $0xa8] sm:$0xff]  ;;  %v3299_v40 = vld [vmem:[%s4968_s5 + $0xa0] sm:$0xff] }
 0x9a0   :  { %4193 = vmatpush3.msra.mxu0 %v5117_v39 }
 0x9a1   :  { %4194 = vmatprep.subr.mxu0 %v5122_v42  ;;  %v1720_v43 = vadd.f32 %v3234_v11, %v1706_v24  ;;  %v3288_v11 = vld [vmem:[%s4947_s1 + $0xd8] sm:$0xff] }
 0x9a2   :  { %4195 = vmatpush3.msra.mxu0 %v5122_v42 }
 0x9a3   :  { %4196 = vmatprep.subr.mxu0 %v1720_v43 }
 0x9a4   :  { %4197 = vmatpush3.msra.mxu0 %v1720_v43 }
 0x9a5   :  { %4199 = vmatmul.mubr.msk.f32.vlgmr.msra.gmra.mxu0 %vm815_vm2, %v4685_v46  ;;  %4254 = vmatprep.subr.mxu0 %v3258_v45 }
 0x9a6   :  { %4255 = vmatpush3.msra.mxu0 %v3258_v45  ;;  %4201 = vmatprep.mubr.msk.f32.mxu0 %vm815_vm2, %v4686_v47  ;;  %v3276_v47 = vld [vmem:[%s4985_s9 + $0x1] ss:$0 sm:$0xff]  ;;  %s3205_s9 = sld [smem:[%s5359_s0 + %s4722_s27]]  }
 0x9a7   :  { %4256 = vmatprep.subr.mxu0 %v3257_v28 }
 0x9a8   :  { %4257 = vmatpush3.msra.mxu0 %v3257_v28 }
 0x9a9   :  { %4202 = vmatmul.mubr.msk.f32.gmra.mxu0 %vm815_vm2, %v4687_v26  ;;  %4258 = vmatprep.subr.mxu0 %v3256_v50 }
 0x9aa   :  { %4259 = vmatpush3.msra.mxu0 %v3256_v50  ;;  %4204 = vmatprep.mubr.msk.f32.mxu0 %vm815_vm2, %v4688_v52 }
 0x9ab   :  { %4260 = vmatprep.subr.mxu0 %v3255_v51 }
 0x9ac   :  { %4261 = vmatpush3.msra.mxu0 %v3255_v51 }
 0x9ad   :  { %4205 = vmatmul.mubr.msk.f32.gmra.mxu0 %vm815_vm2, %v4689_v55  ;;  %4262 = vmatprep.subr.mxu0 %v3254_v53 }
 0x9ae   :  { %4263 = vmatpush3.msra.mxu0 %v3254_v53  ;;  %4207 = vmatprep.mubr.msk.f32.mxu0 %vm815_vm2, %v4690_v56 }
 0x9af   :  { %4264 = vmatprep.subr.mxu0 %v3253_v54 }
 0x9b0   :  { %4265 = vmatpush3.msra.mxu0 %v3253_v54 }
 0x9b1   :  { %4208 = vmatmul.mubr.msk.f32.gmra.mxu0 %vm815_vm2, %v4691_v33  ;;  %4266 = vmatprep.subr.mxu0 %v3252_v30 }
 0x9b2   :  { %4267 = vmatpush3.msra.mxu0 %v3252_v30  ;;  %4286 = vmatprep.mubr.f32.mxu0 %v1720_v43 }
 0x9b3   :  { %4268 = vmatprep.subr.mxu0 %v3251_v57 }
 0x9b4   :  { %4269 = vmatpush3.msra.mxu0 %v3251_v57 }
 0x9b5   :  { %4270 = vmatprep.subr.mxu0 %v3250_v58 }
 0x9b6   :  { %4271 = vmatpush3.msra.mxu0 %v3250_v58 }
 0x9b7   :  { %4272 = vmatprep.subr.mxu0 %v3249_v59 }
 0x9b8   :  { %4273 = vmatpush3.msra.mxu0 %v3249_v59 }
 0x9b9   :  { %4274 = vmatprep.subr.mxu0 %v3248_v34 }
 0x9ba   :  { %4275 = vmatpush3.msra.mxu0 %v3248_v34 }
 0x9bb   :  { %4276 = vmatprep.subr.mxu0 %v3247_v5 }
 0x9bc   :  { %4277 = vmatpush3.msra.mxu0 %v3247_v5 }
 0x9bd   :  { %4278 = vmatprep.subr.mxu0 %v3246_v41 }
 0x9be   :  { %4279 = vmatpush3.msra.mxu0 %v3246_v41 }
 0x9bf   :  { %4280 = vmatprep.subr.mxu0 %v3245_v60 }
 0x9c0   :  { %4281 = vmatpush3.msra.mxu0 %v3245_v60 }
 0x9c1   :  { %4282 = vmatprep.subr.mxu0 %v3244_v61 }
 0x9c2   :  { %4283 = vmatpush3.msra.mxu0 %v3244_v61 }
 0x9c3   :  { %4284 = vmatprep.subr.mxu0 %v3243_v48 }
 0x9c4   :  { %4285 = vmatpush3.msra.mxu0 %v3243_v48 }
 0x9c5   :  { %4287 = vmatmul.mubr.f32.vlgmr.msra.gmra.mxu0 %v5122_v42  ;;  %4342 = vmatprep.subr.mxu0 %v3310_v31 }
 0x9c6   :  { %4289 = vmatprep.mubr.f32.mxu0 %v5117_v39  ;;  %4343 = vmatpush3.msra.mxu0 %v3310_v31  ;;  %v3301_v39 = vld [vmem:[%s4968_s5 + $0xb0] sm:$0xff]  ;;  %v3321_v31 = vld [vmem:[%s4995_s14 + $0xc0] sm:$0xff] }
 0x9c9   :  { %4290 = vmatmul.mubr.f32.gmra.mxu0 %v5112_v36  ;;  %v3305_v36 = vld [vmem:[%s4968_s5 + $0xd0] sm:$0xff] }
 0x9ca   :  { %4292 = vmatprep.mubr.f32.mxu0 %v5107_v8  ;;  %v3309_v8 = vld [vmem:[%s4968_s5 + $0xf0] sm:$0xff] }
 0x9cb   :  { %4344 = vmatprep.subr.mxu0 %v3309_v8 }
 0x9cc   :  { %4345 = vmatpush3.msra.mxu0 %v3309_v8  ;;  %v3320_v8 = vld [vmem:[%s4995_s14 + $0xb8] sm:$0xff] }
 0x9cd   :  { %4293 = vmatmul.mubr.f32.gmra.mxu0 %v5102_v3  ;;  %v3279_v3 = vld [vmem:[%s4947_s1 + $0x90] sm:$0xff]  ;;  %4346 = vmatprep.subr.mxu0 %v3308_v32 }
 0x9ce   :  { %4295 = vmatprep.mubr.f32.mxu0 %v5097_v22  ;;  %v3283_v22 = vld [vmem:[%s4947_s1 + $0xb0] sm:$0xff]  ;;  %4347 = vmatpush3.msra.mxu0 %v3308_v32 }
 0x9cf   :  { %4348 = vmatprep.subr.mxu0 %v3307_v12  ;;  %v3319_v32 = vld [vmem:[%s4995_s14 + $0xb0] sm:$0xff] }
 0x9d0   :  { %4349 = vmatpush3.msra.mxu0 %v3307_v12  ;;  %v3318_v12 = vld [vmem:[%s4995_s14 + $0xa8] sm:$0xff] }
 0x9d1   :  { %4296 = vmatmul.mubr.f32.gmra.mxu0 %v5093_v17  ;;  %v3286_v17 = vld [vmem:[%s4947_s1 + $0xc8] sm:$0xff]  ;;  %4350 = vmatprep.subr.mxu0 %v3306_v35  ;;  %s5221_s1 = sld [smem:[%s5359_s0 + %s4714_s11]]  }
 0x9d2   :  { %4351 = vmatpush3.msra.mxu0 %v3306_v35  ;;  %v3317_v35 = vld [vmem:[%s4995_s14 + $0xa0] sm:$0xff] }
 0x9d3   :  { %4352 = vmatprep.subr.mxu0 %v3305_v36 }
 0x9d4   :  { %4353 = vmatpush3.msra.mxu0 %v3305_v36  ;;  %v3294_v36 = vld [vmem:[%s5012_s19 + $0x1] ss:$0 sm:$0xff] }
 0x9d5   :  { %4354 = vmatprep.subr.mxu0 %v3304_v37 }
 0x9d6   :  { %4355 = vmatpush3.msra.mxu0 %v3304_v37 }
 0x9d7   :  { %4356 = vmatprep.subr.mxu0 %v3303_v16 }
 0x9d8   :  { %4357 = vmatpush3.msra.mxu0 %v3303_v16 }
 0x9d9   :  { %4358 = vmatprep.subr.mxu0 %v3302_v38 }
 0x9da   :  { %4359 = vmatpush3.msra.mxu0 %v3302_v38 }
 0x9db   :  { %4360 = vmatprep.subr.mxu0 %v3301_v39 }
 0x9dc   :  { %4361 = vmatpush3.msra.mxu0 %v3301_v39 }
 0x9dd   :  { %4362 = vmatprep.subr.mxu0 %v3300_v20 }
 0x9de   :  { %4363 = vmatpush3.msra.mxu0 %v3300_v20 }
 0x9df   :  { %4364 = vmatprep.subr.mxu0 %v3299_v40 }
 0x9e0   :  { %4365 = vmatpush3.msra.mxu0 %v3299_v40 }
 0xa65   :  { %v4200_v0 = vpop.f32.mrf.mxu0 }
 0xa67   :  { %v1794_v2 = vpop.f32.mrf.mxu0 }
 0xa68   :  { %4242 = vmatprep.mubr.f32.mxu1 %v1794_v2 }
 0xa69   :  { %v4203_v4 = vpop.f32.mrf.mxu0  ;;  %4243 = vmatmul.mubr.f32.vlgmr.msra.gmra.mxu1 %v4200_v0 }
 0xa6a   :  { %4299 = vmatpush3.msra.mxu1 %v3292_v63 }
 0xa6b   :  { %v1804_v7 = vpop.f32.mrf.mxu0  ;;  %4300 = vmatprep.subr.mxu1 %v3291_v49 }
 0xa6c   :  { %4245 = vmatprep.mubr.f32.mxu1 %v1804_v7  ;;  %4301 = vmatpush3.msra.mxu1 %v3291_v49 }
 0xa6d   :  { %v4206_v10 = vpop.f32.mrf.mxu0  ;;  %4246 = vmatmul.mubr.f32.gmra.mxu1 %v4203_v4  ;;  %4302 = vmatprep.subr.mxu1 %v3290_v6 }
 0xa6e   :  { %4303 = vmatpush3.msra.mxu1 %v3290_v6 }
 0xa6f   :  { %v1814_v13 = vpop.f32.mrf.mxu0  ;;  %4304 = vmatprep.subr.mxu1 %v3289_v9 }
 0xa70   :  { %4248 = vmatprep.mubr.f32.mxu1 %v1814_v13  ;;  %4305 = vmatpush3.msra.mxu1 %v3289_v9 }
 0xa71   :  { %v4209_v15 = vpop.f32.mrf.mxu0  ;;  %4249 = vmatmul.mubr.f32.gmra.mxu1 %v4206_v10  ;;  %4306 = vmatprep.subr.mxu1 %v3288_v11 }
 0xa72   :  { %4307 = vmatpush3.msra.mxu1 %v3288_v11 }
 0xa73   :  { %v1824_v18 = vpop.f32.mrf.mxu0  ;;  %4308 = vmatprep.subr.mxu1 %v3287_v14 }
 0xa74   :  { %4251 = vmatprep.mubr.f32.mxu1 %v1824_v18  ;;  %4309 = vmatpush3.msra.mxu1 %v3287_v14  ;;  %v3297_v18 = vld [vmem:[%s4968_s5 + $0x90] sm:$0xff] }
 0xa75   :  { %4252 = vmatmul.mubr.f32.gmra.mxu1 %v4209_v15  ;;  %4310 = vmatprep.subr.mxu1 %v3286_v17 }
 0xa76   :  { %4311 = vmatpush3.msra.mxu1 %v3286_v17  ;;  %v3298_v17 = vld [vmem:[%s4968_s5 + $0x98] sm:$0xff] }
 0xa77   :  { %4312 = vmatprep.subr.mxu1 %v3285_v19  ;;  %4366 = vmatprep.subr.mxu0 %v3298_v17 }
 0xa78   :  { %4313 = vmatpush3.msra.mxu1 %v3285_v19  ;;  %4367 = vmatpush3.msra.mxu0 %v3298_v17  ;;  %v3296_v19 = vld [vmem:[%s4968_s5 + $0x88] sm:$0xff] }
 0xa79   :  { %4314 = vmatprep.subr.mxu1 %v3284_v21  ;;  %4368 = vmatprep.subr.mxu0 %v3297_v18 }
 0xa7a   :  { %4315 = vmatpush3.msra.mxu1 %v3284_v21  ;;  %4369 = vmatpush3.msra.mxu0 %v3297_v18  ;;  %v3295_v21 = vld [vmem:[%s4968_s5 + $0x80] sm:$0xff]  ;;  %s4715_s5 = smov 25  }
 0xa7b   :  { %4316 = vmatprep.subr.mxu1 %v3283_v22  ;;  %4370 = vmatprep.subr.mxu0 %v3296_v19  ;;  %s5274_s12 = sld [smem:[%s5359_s0 + %s4715_s5]]  }
 0xa7c   :  { %4317 = vmatpush3.msra.mxu1 %v3283_v22  ;;  %4371 = vmatpush3.msra.mxu0 %v3296_v19  ;;  %v3328_v22 = vld [vmem:[%s4995_s14 + $0xf8] sm:$0xff] }
 0xa7d   :  { %4318 = vmatprep.subr.mxu1 %v3282_v23  ;;  %4372 = vmatprep.subr.mxu0 %v3295_v21 }
 0xa7e   :  { %4319 = vmatpush3.msra.mxu1 %v3282_v23  ;;  %4373 = vmatpush3.msra.mxu0 %v3295_v21  ;;  %v3327_v23 = vld [vmem:[%s4995_s14 + $0xf0] sm:$0xff] }
 0xa7f   :  { %4320 = vmatprep.subr.mxu1 %v3281_v25 }
 0xa80   :  { %4321 = vmatpush3.msra.mxu1 %v3281_v25  ;;  %v3326_v25 = vld [vmem:[%s4995_s14 + $0xe8] sm:$0xff] }
 0xa81   :  { %4322 = vmatprep.subr.mxu1 %v3280_v1 }
 0xa82   :  { %4323 = vmatpush3.msra.mxu1 %v3280_v1  ;;  %v3325_v1 = vld [vmem:[%s4995_s14 + $0xe0] sm:$0xff] }
 0xa83   :  { %4324 = vmatprep.subr.mxu1 %v3279_v3 }
 0xa84   :  { %4325 = vmatpush3.msra.mxu1 %v3279_v3  ;;  %v3324_v3 = vld [vmem:[%s4995_s14 + $0xd8] sm:$0xff] }
 0xa85   :  { %4326 = vmatprep.subr.mxu1 %v3278_v27  ;;  %v4288_v42 = vpop.f32.mrf.mxu0 }
 0xa86   :  { %4327 = vmatpush3.msra.mxu1 %v3278_v27  ;;  %v3323_v27 = vld [vmem:[%s4995_s14 + $0xd0] sm:$0xff] }
 0xa87   :  { %4328 = vmatprep.subr.mxu1 %v3277_v29  ;;  %v2038_v24 = vpop.f32.mrf.mxu0 }
 0xa88   :  { %4329 = vmatpush3.msra.mxu1 %v3277_v29  ;;  %v3322_v29 = vld [vmem:[%s4995_s14 + $0xc8] sm:$0xff] }
 0xa89   :  { %v4291_v43 = vpop.f32.mrf.mxu0  ;;  %4386 = vmatprep.subr.mxu1 %v3328_v22 }
 0xa8b   :  { %v2048_v45 = vpop.f32.mrf.mxu0 }
 0xa8d   :  { %v4294_v50 = vpop.f32.mrf.mxu0 }
 0xa8f   :  { %v2058_v56 = vpop.f32.mrf.mxu0 }
 0xa91   :  { %v4297_v60 = vpop.f32.mrf.mxu0 }
 0xa93   :  { %v2068_v4 = vpop.f32.mrf.mxu0 }
 0xb29   :  { %v4244_v28 = vpop.f32.mrf.mxu1 }
 0xb2a   :  { %v2044_v46 = vadd.f32 %v4288_v42, %v4244_v28 }
 0xb2b   :  { %v1933_v51 = vpop.f32.mrf.mxu1 }
 0xb2c   :  { %v2039_v26 = vadd.f32 %v2038_v24, %v1933_v51  ;;  %v2086_v52 = vadd.f32 %v3276_v47, %v2044_v46 }
 0xb2d   :  { %v4247_v53 = vpop.f32.mrf.mxu1 }
 0xb2e   :  { %v2085_v54 = vadd.f32 %v3276_v47, %v2039_v26  ;;  %v2054_v55 = vadd.f32 %v4291_v43, %v4247_v53  ;;  %v2094_v58 = vmax.f32 %v2086_v52, 0.0 }
 0xb2f   :  { %v1943_v30 = vpop.f32.mrf.mxu1 }
 0xb30   :  { %v2093_v57 = vmax.f32 %v2085_v54, 0.0  ;;  %v2049_v33 = vadd.f32 %v2048_v45, %v1943_v30  ;;  %v2088_v59 = vadd.f32 %v3276_v47, %v2054_v55 }
 0xb31   :  { %v4250_v34 = vpop.f32.mrf.mxu1 }
 0xb32   :  { %v2087_v5 = vadd.f32 %v3276_v47, %v2049_v33  ;;  %v2064_v41 = vadd.f32 %v4294_v50, %v4250_v34  ;;  %4330 = vmatprep.mubr.f32.mxu1 %v2093_v57  ;;  %v2096_v62 = vmax.f32 %v2088_v59, 0.0  ;;  %v3315_v59 = vld [vmem:[%s4995_s14 + $0x90] sm:$0xff]  ;;  %v3314_v34 = vld [vmem:[%s4995_s14 + $0x88] sm:$0xff] }
 0xb33   :  { %v1953_v61 = vpop.f32.mrf.mxu1  ;;  %4331 = vmatmul.mubr.f32.vlgmr.msra.gmra.mxu1 %v2094_v58  ;;  %v3316_v58 = vld [vmem:[%s4995_s14 + $0x98] sm:$0xff] }
 0xb34   :  { %v2095_v48 = vmax.f32 %v2087_v5, 0.0  ;;  %v2059_v44 = vadd.f32 %v2058_v56, %v1953_v61  ;;  %v2090_v63 = vadd.f32 %v3276_v47, %v2064_v41  ;;  %4387 = vmatpush3.msra.mxu1 %v3328_v22  ;;  %v3313_v5 = vld [vmem:[%s4995_s14 + $0x80] sm:$0xff] }
 0xb35   :  { %v4253_v0 = vpop.f32.mrf.mxu1  ;;  %4388 = vmatprep.subr.mxu1 %v3327_v23  ;;  %v3312_v41 = vld [vmem:[%s5022_s23 + $0x1] ss:$0 sm:$0xff] }
 0xb36   :  { %v2089_v2 = vadd.f32 %v3276_v47, %v2059_v44  ;;  %v2074_v49 = vadd.f32 %v4297_v60, %v4253_v0  ;;  %4333 = vmatprep.mubr.f32.mxu1 %v2095_v48  ;;  %v2098_v10 = vmax.f32 %v2090_v63, 0.0  ;;  %4389 = vmatpush3.msra.mxu1 %v3327_v23 }
 0xb37   :  { %v1963_v6 = vpop.f32.mrf.mxu1  ;;  %4334 = vmatmul.mubr.f32.gmra.mxu1 %v2096_v62  ;;  %4390 = vmatprep.subr.mxu1 %v3326_v25 }
 0xb38   :  { %v2097_v7 = vmax.f32 %v2089_v2, 0.0  ;;  %v2069_v9 = vadd.f32 %v2068_v4, %v1963_v6  ;;  %v2092_v11 = vadd.f32 %v3276_v47, %v2074_v49  ;;  %4391 = vmatpush3.msra.mxu1 %v3326_v25  ;;  %v3330_v25 = vld [vmem:[%s5030_s28 + $0x1] ss:$0 sm:$0xff] }
 0xb39   :  { %4392 = vmatprep.subr.mxu1 %v3325_v1 }
 0xb3a   :  { %v2091_v13 = vadd.f32 %v3276_v47, %v2069_v9  ;;  %4336 = vmatprep.mubr.f32.mxu1 %v2097_v7  ;;  %v2100_v15 = vmax.f32 %v2092_v11, 0.0  ;;  %4393 = vmatpush3.msra.mxu1 %v3325_v1 }
 0xb3b   :  { %4337 = vmatmul.mubr.f32.gmra.mxu1 %v2098_v10  ;;  %4394 = vmatprep.subr.mxu1 %v3324_v3 }
 0xb3c   :  { %v2099_v14 = vmax.f32 %v2091_v13, 0.0  ;;  %4395 = vmatpush3.msra.mxu1 %v3324_v3 }
 0xb3d   :  { %4396 = vmatprep.subr.mxu1 %v3323_v27 }
 0xb3e   :  { %4339 = vmatprep.mubr.f32.mxu1 %v2099_v14  ;;  %4397 = vmatpush3.msra.mxu1 %v3323_v27 }
 0xb3f   :  { %4340 = vmatmul.mubr.f32.gmra.mxu1 %v2100_v15  ;;  %4398 = vmatprep.subr.mxu1 %v3322_v29 }
 0xb40   :  { %4399 = vmatpush3.msra.mxu1 %v3322_v29 }
 0xb41   :  { %4400 = vmatprep.subr.mxu1 %v3321_v31 }
 0xb42   :  { %4401 = vmatpush3.msra.mxu1 %v3321_v31 }
 0xb43   :  { %4402 = vmatprep.subr.mxu1 %v3320_v8 }
 0xb44   :  { %4403 = vmatpush3.msra.mxu1 %v3320_v8 }
 0xb45   :  { %4404 = vmatprep.subr.mxu1 %v3319_v32 }
 0xb46   :  { %4405 = vmatpush3.msra.mxu1 %v3319_v32 }
 0xb47   :  { %4406 = vmatprep.subr.mxu1 %v3318_v12 }
 0xb48   :  { %4407 = vmatpush3.msra.mxu1 %v3318_v12 }
 0xb49   :  { %4408 = vmatprep.subr.mxu1 %v3317_v35 }
 0xb4a   :  { %4409 = vmatpush3.msra.mxu1 %v3317_v35 }
 0xb4b   :  { %4410 = vmatprep.subr.mxu1 %v3316_v58 }
 0xb4c   :  { %4411 = vmatpush3.msra.mxu1 %v3316_v58 }
 0xb4d   :  { %4412 = vmatprep.subr.mxu1 %v3315_v59 }
 0xb4e   :  { %4413 = vmatpush3.msra.mxu1 %v3315_v59 }
 0xb4f   :  { %4414 = vmatprep.subr.mxu1 %v3314_v34 }
 0xb50   :  { %4415 = vmatpush3.msra.mxu1 %v3314_v34 }
 0xb51   :  { %4416 = vmatprep.subr.mxu1 %v3313_v5 }
 0xb52   :  { %4417 = vmatpush3.msra.mxu1 %v3313_v5 }
 0xbf3   :  { %v4332_v37 = vpop.f32.mrf.mxu1 }
 0xbf4   :  { %v2198_v16 = vadd.f32 %v4332_v37, %v3294_v36 }
 0xbf5   :  { %v2192_v38 = vpop.f32.mrf.mxu1 }
 0xbf6   :  { %v2193_v39 = vadd.f32 %v3294_v36, %v2192_v38  ;;  %v2232_v42 = vmax.f32 %v2198_v16, 0.0 }
 0xbf7   :  { %v4335_v20 = vpop.f32.mrf.mxu1 }
 0xbf8   :  { %v2231_v40 = vmax.f32 %v2193_v39, 0.0  ;;  %v2208_v24 = vadd.f32 %v4335_v20, %v3294_v36 }
 0xbf9   :  { %v2202_v43 = vpop.f32.mrf.mxu1 }
 0xbfa   :  { %v2203_v45 = vadd.f32 %v3294_v36, %v2202_v43  ;;  %4374 = vmatprep.mubr.f32.mxu0 %v2231_v40  ;;  %v2234_v47 = vmax.f32 %v2208_v24, 0.0  ;;  %v2641_v24 = vld [vmem:[%s5221_s1 + $0x70] sm:$0xff]  ;;  %v2640_v43 = vld [vmem:[%s5221_s1 + $0x68] sm:$0xff] }
 0xbfb   :  { %v4338_v28 = vpop.f32.mrf.mxu1  ;;  %4375 = vmatmul.mubr.f32.vlgmr.msra.gmra.mxu0 %v2232_v42  ;;  %v2642_v42 = vld [vmem:[%s5221_s1 + $0x78] sm:$0xff] }
 0xbfc   :  { %v2233_v46 = vmax.f32 %v2203_v45, 0.0  ;;  %v2218_v50 = vadd.f32 %v4338_v28, %v3294_v36  ;;  %4430 = vmatprep.subr.mxu0 %v2642_v42 }
 0xbfd   :  { %v2212_v51 = vpop.f32.mrf.mxu1  ;;  %4431 = vmatpush3.msra.mxu0 %v2642_v42 }
 0xbfe   :  { %v2213_v26 = vadd.f32 %v3294_v36, %v2212_v51  ;;  %4377 = vmatprep.mubr.f32.mxu0 %v2233_v46  ;;  %v2236_v54 = vmax.f32 %v2218_v50, 0.0  ;;  %4432 = vmatprep.subr.mxu0 %v2641_v24 }
 0xbff   :  { %v4341_v52 = vpop.f32.mrf.mxu1  ;;  %4378 = vmatmul.mubr.f32.gmra.mxu0 %v2234_v47 }
 0xc00   :  { %v2235_v53 = vmax.f32 %v2213_v26, 0.0  ;;  %v2228_v55 = vadd.f32 %v4341_v52, %v3294_v36  ;;  %4433 = vmatpush3.msra.mxu0 %v2641_v24 }
 0xc01   :  { %v2222_v56 = vpop.f32.mrf.mxu1  ;;  %4434 = vmatprep.subr.mxu0 %v2640_v43 }
 0xc02   :  { %v2223_v30 = vadd.f32 %v3294_v36, %v2222_v56  ;;  %4380 = vmatprep.mubr.f32.mxu0 %v2235_v53  ;;  %v2238_v33 = vmax.f32 %v2228_v55, 0.0  ;;  %4435 = vmatpush3.msra.mxu0 %v2640_v43 }
 0xc03   :  { %4381 = vmatmul.mubr.f32.gmra.mxu0 %v2236_v54 }
 0xc04   :  { %v2237_v57 = vmax.f32 %v2223_v30, 0.0 }
 0xc06   :  { %4383 = vmatprep.mubr.f32.mxu0 %v2237_v57 }
 0xc07   :  { %4384 = vmatmul.mubr.f32.gmra.mxu0 %v2238_v33 }
 0xcbb   :  { %v4376_v60 = vpop.f32.mrf.mxu0 }
 0xcbc   :  { %v2336_v61 = vadd.f32 %v4376_v60, %v3312_v41 }
 0xcbd   :  { %v2330_v48 = vpop.f32.mrf.mxu0 }
 0xcbe   :  { %v2331_v44 = vadd.f32 %v3312_v41, %v2330_v48  ;;  %v2370_v0 = vmax.f32 %v2336_v61, 0.0 }
 0xcbf   :  { %v4379_v62 = vpop.f32.mrf.mxu0 }
 0xcc0   :  { %v2369_v63 = vmax.f32 %v2331_v44, 0.0  ;;  %v2346_v2 = vadd.f32 %v4379_v62, %v3312_v41 }
 0xcc1   :  { %v2340_v49 = vpop.f32.mrf.mxu0 }
 0xcc2   :  { %v2341_v4 = vadd.f32 %v3312_v41, %v2340_v49  ;;  %4418 = vmatprep.mubr.f32.mxu1 %v2369_v63  ;;  %v2372_v9 = vmax.f32 %v2346_v2, 0.0 }
 0xcc3   :  { %v4382_v6 = vpop.f32.mrf.mxu0  ;;  %4419 = vmatmul.mubr.f32.vlgmr.msra.gmra.mxu1 %v2370_v0 }
 0xcc4   :  { %v2371_v7 = vmax.f32 %v2341_v4, 0.0  ;;  %v2356_v10 = vadd.f32 %v4382_v6, %v3312_v41 }
 0xcc5   :  { %v2350_v11 = vpop.f32.mrf.mxu0 }
 0xcc6   :  { %v2351_v13 = vadd.f32 %v3312_v41, %v2350_v11  ;;  %4421 = vmatprep.mubr.f32.mxu1 %v2371_v7  ;;  %v2374_v17 = vmax.f32 %v2356_v10, 0.0  ;;  %v2639_v7 = vld [vmem:[%s5221_s1 + $0x60] sm:$0xff]  ;;  %v2638_v10 = vld [vmem:[%s5221_s1 + $0x58] sm:$0xff]  ;;  %v2637_v11 = vld [vmem:[%s5221_s1 + $0x50] sm:$0xff] }
 0xcc7   :  { %v4385_v14 = vpop.f32.mrf.mxu0  ;;  %4422 = vmatmul.mubr.f32.gmra.mxu1 %v2372_v9  ;;  %4436 = vmatprep.subr.mxu0 %v2639_v7 }
 0xcc8   :  { %v2373_v15 = vmax.f32 %v2351_v13, 0.0  ;;  %v2366_v18 = vadd.f32 %v4385_v14, %v3312_v41  ;;  %4437 = vmatpush3.msra.mxu0 %v2639_v7  ;;  %v2636_v13 = vld [vmem:[%s5221_s1 + $0x48] sm:$0xff]  ;;  %v2635_v14 = vld [vmem:[%s5221_s1 + $0x40] sm:$0xff] }
 0xcc9   :  { %v2360_v19 = vpop.f32.mrf.mxu0  ;;  %4438 = vmatprep.subr.mxu0 %v2638_v10 }
 0xcca   :  { %v2361_v21 = vadd.f32 %v3312_v41, %v2360_v19  ;;  %4424 = vmatprep.mubr.f32.mxu1 %v2373_v15  ;;  %v2376_v23 = vmax.f32 %v2366_v18, 0.0  ;;  %4439 = vmatpush3.msra.mxu0 %v2638_v10  ;;  %v2634_v15 = vld [vmem:[%s5221_s1 + $0x38] sm:$0xff]  ;;  %v2632_v18 = vld [vmem:[%s5221_s1 + $0x28] sm:$0xff]  ;;  %v2631_v19 = vld [vmem:[%s5221_s1 + $0x20] sm:$0xff] }
 0xccb   :  { %4425 = vmatmul.mubr.f32.gmra.mxu1 %v2374_v17  ;;  %4440 = vmatprep.subr.mxu0 %v2637_v11  ;;  %v2633_v17 = vld [vmem:[%s5221_s1 + $0x30] sm:$0xff] }
 0xccc   :  { %v2375_v22 = vmax.f32 %v2361_v21, 0.0  ;;  %4441 = vmatpush3.msra.mxu0 %v2637_v11  ;;  %v2630_v21 = vld [vmem:[%s5221_s1 + $0x18] sm:$0xff] }
 0xccd   :  { %4442 = vmatprep.subr.mxu0 %v2636_v13 }
 0xcce   :  { %4427 = vmatprep.mubr.f32.mxu1 %v2375_v22  ;;  %4443 = vmatpush3.msra.mxu0 %v2636_v13  ;;  %v2629_v22 = vld [vmem:[%s5221_s1 + $0x10] sm:$0xff] }
 0xccf   :  { %4428 = vmatmul.mubr.f32.gmra.mxu1 %v2376_v23  ;;  %4444 = vmatprep.subr.mxu0 %v2635_v14  ;;  %v2628_v23 = vld [vmem:[%s5221_s1 + $0x8] sm:$0xff] }
 0xcd0   :  { %4445 = vmatpush3.msra.mxu0 %v2635_v14 }
 0xcd1   :  { %4446 = vmatprep.subr.mxu0 %v2634_v15 }
 0xcd2   :  { %4447 = vmatpush3.msra.mxu0 %v2634_v15 }
 0xcd3   :  { %4448 = vmatprep.subr.mxu0 %v2633_v17 }
 0xcd4   :  { %4449 = vmatpush3.msra.mxu0 %v2633_v17 }
 0xcd5   :  { %4450 = vmatprep.subr.mxu0 %v2632_v18 }
 0xcd6   :  { %4451 = vmatpush3.msra.mxu0 %v2632_v18 }
 0xcd7   :  { %4452 = vmatprep.subr.mxu0 %v2631_v19 }
 0xcd8   :  { %4453 = vmatpush3.msra.mxu0 %v2631_v19 }
 0xcd9   :  { %4454 = vmatprep.subr.mxu0 %v2630_v21 }
 0xcda   :  { %4455 = vmatpush3.msra.mxu0 %v2630_v21 }
 0xcdb   :  { %4456 = vmatprep.subr.mxu0 %v2629_v22 }
 0xcdc   :  { %4457 = vmatpush3.msra.mxu0 %v2629_v22 }
 0xcdd   :  { %4458 = vmatprep.subr.mxu0 %v2628_v23 }
 0xcde   :  { %4459 = vmatpush3.msra.mxu0 %v2628_v23 }
 0xd83   :  { %v4420_v1 = vpop.f32.mrf.mxu1 }
 0xd84   :  { %v2474_v3 = vadd.f32 %v4420_v1, %v3330_v25  ;;  %v2658_v1 = vld [vmem:[%s5274_s12 + $0x78] sm:$0xff] }
 0xd85   :  { %v2468_v27 = vpop.f32.mrf.mxu1  ;;  %4474 = vmatprep.subr.mxu1 %v2658_v1 }
 0xd86   :  { %v2469_v29 = vadd.f32 %v3330_v25, %v2468_v27  ;;  %2513 = vadd.xlane.f32.xlu1 %v2474_v3  ;;  %4475 = vmatpush3.msra.mxu1 %v2658_v1  ;;  %v2656_v27 = vld [vmem:[%s5274_s12 + $0x68] sm:$0xff] }
 0xd87   :  { %v4423_v31 = vpop.f32.mrf.mxu1 }
 0xd88   :  { %v2484_v8 = vadd.f32 %v4423_v31, %v3330_v25  ;;  %2511 = vadd.xlane.f32.xlu0 %v2469_v29  ;;  %v2654_v31 = vld [vmem:[%s5274_s12 + $0x58] sm:$0xff] }
 0xd89   :  { %v2478_v32 = vpop.f32.mrf.mxu1 }
 0xd8a   :  { %v2479_v12 = vadd.f32 %v3330_v25, %v2478_v32  ;;  %2517 = vadd.xlane.f32.xlu1 %v2484_v8  ;;  %v2652_v32 = vld [vmem:[%s5274_s12 + $0x48] sm:$0xff] }
 0xd8b   :  { %v4426_v35 = vpop.f32.mrf.mxu1 }
 0xd8c   :  { %v2494_v36 = vadd.f32 %v4426_v35, %v3330_v25  ;;  %2515 = vadd.xlane.f32.xlu0 %v2479_v12  ;;  %v2650_v35 = vld [vmem:[%s5274_s12 + $0x38] sm:$0xff] }
 0xd8d   :  { %v2488_v37 = vpop.f32.mrf.mxu1 }
 0xd8e   :  { %v2489_v16 = vadd.f32 %v3330_v25, %v2488_v37  ;;  %2521 = vadd.xlane.f32.xlu1 %v2494_v36  ;;  %v2648_v37 = vld [vmem:[%s5274_s12 + $0x28] sm:$0xff] }
 0xd8f   :  { %v4429_v38 = vpop.f32.mrf.mxu1 }
 0xd90   :  { %v2504_v39 = vadd.f32 %v4429_v38, %v3330_v25  ;;  %2519 = vadd.xlane.f32.xlu0 %v2489_v16 }
 0xd91   :  { %v2498_v20 = vpop.f32.mrf.mxu1 }
 0xd92   :  { %v2499_v40 = vadd.f32 %v3330_v25, %v2498_v20  ;;  %2525 = vadd.xlane.f32.xlu1 %v2504_v39  ;;  %v2627_v25 = vld [vmem:[%s5221_s1] sm:$0xff] }
 0xd93   :  { %4460 = vmatprep.subr.mxu0 %v2627_v25 }
 0xd94   :  { %2523 = vadd.xlane.f32.xlu0 %v2499_v40  ;;  %4461 = vmatpush3.msra.mxu0 %v2627_v25 }
 0xe0f   :  { %v2514_v45 = vpop.xlane.xlu1 %2513 }
 0xe10   :  { %v2528_v28 = vmul.f32 0.0078125, %v2514_v45 }
 0xe11   :  { %v2512_v46 = vpop.xlane.xlu0 %2511 }
 0xe12   :  { %v5226_v47 = vsub.f32 %v2474_v3, %v2528_v28  ;;  %v2527_v50 = vmul.f32 0.0078125, %v2512_v46  ;;  %v2657_v3 = vld [vmem:[%s5274_s12 + $0x70] sm:$0xff] }
 0xe13   :  { %v2518_v51 = vpop.xlane.xlu1 %2517  ;;  %4476 = vmatprep.subr.mxu1 %v2657_v3 }
 0xe14   :  { %v5228_v26 = vsub.f32 %v2469_v29, %v2527_v50  ;;  %v2530_v52 = vmul.f32 0.0078125, %v2518_v51  ;;  %v2544_v53 = vmul.f32 %v5226_v47, %v5226_v47  ;;  %4477 = vmatpush3.msra.mxu1 %v2657_v3  ;;  %v2655_v29 = vld [vmem:[%s5274_s12 + $0x60] sm:$0xff] }
 0xe15   :  { %v2516_v54 = vpop.xlane.xlu0 %2515  ;;  %4478 = vmatprep.subr.mxu1 %v2656_v27 }
 0xe16   :  { %v5232_v55 = vsub.f32 %v2484_v8, %v2530_v52  ;;  %v2529_v56 = vmul.f32 0.0078125, %v2516_v54  ;;  %2553 = vadd.xlane.f32.xlu1 %v2544_v53  ;;  %v2543_v30 = vmul.f32 %v5228_v26, %v5228_v26  ;;  %4479 = vmatpush3.msra.mxu1 %v2656_v27  ;;  %v2653_v8 = vld [vmem:[%s5274_s12 + $0x50] sm:$0xff] }
 0xe17   :  { %v2522_v57 = vpop.xlane.xlu1 %2521  ;;  %4480 = vmatprep.subr.mxu1 %v2655_v29 }
 0xe18   :  { %v5236_v33 = vsub.f32 %v2479_v12, %v2529_v56  ;;  %v2532_v58 = vmul.f32 0.0078125, %v2522_v57  ;;  %2551 = vadd.xlane.f32.xlu0 %v2543_v30  ;;  %v2546_v59 = vmul.f32 %v5232_v55, %v5232_v55  ;;  %4481 = vmatpush3.msra.mxu1 %v2655_v29  ;;  %v2651_v12 = vld [vmem:[%s5274_s12 + $0x40] sm:$0xff] }
 0xe19   :  { %v2520_v34 = vpop.xlane.xlu0 %2519  ;;  %4482 = vmatprep.subr.mxu1 %v2654_v31 }
 0xe1a   :  { %v5240_v5 = vsub.f32 %v2494_v36, %v2532_v58  ;;  %v2531_v41 = vmul.f32 0.0078125, %v2520_v34  ;;  %2557 = vadd.xlane.f32.xlu1 %v2546_v59  ;;  %v2545_v60 = vmul.f32 %v5236_v33, %v5236_v33  ;;  %4483 = vmatpush3.msra.mxu1 %v2654_v31  ;;  %v2649_v36 = vld [vmem:[%s5274_s12 + $0x30] sm:$0xff] }
 0xe1b   :  { %v2526_v61 = vpop.xlane.xlu1 %2525  ;;  %4484 = vmatprep.subr.mxu1 %v2653_v8 }
 0xe1c   :  { %v5244_v48 = vsub.f32 %v2489_v16, %v2531_v41  ;;  %v2534_v44 = vmul.f32 0.0078125, %v2526_v61  ;;  %2555 = vadd.xlane.f32.xlu0 %v2545_v60  ;;  %v2548_v62 = vmul.f32 %v5240_v5, %v5240_v5  ;;  %4485 = vmatpush3.msra.mxu1 %v2653_v8  ;;  %v2647_v16 = vld [vmem:[%s5274_s12 + $0x20] sm:$0xff] }
 0xe1d   :  { %v2524_v63 = vpop.xlane.xlu0 %2523  ;;  %4486 = vmatprep.subr.mxu1 %v2652_v32 }
 0xe1e   :  { %v5248_v0 = vsub.f32 %v2504_v39, %v2534_v44  ;;  %v2533_v2 = vmul.f32 0.0078125, %v2524_v63  ;;  %2561 = vadd.xlane.f32.xlu1 %v2548_v62  ;;  %v2547_v49 = vmul.f32 %v5244_v48, %v5244_v48  ;;  %4487 = vmatpush3.msra.mxu1 %v2652_v32  ;;  %v3333_v63 = vld [vmem:[%s5082_s3 + $0x1] ss:$0 sm:$0xff] }
 0xe1f   :  { %4488 = vmatprep.subr.mxu1 %v2651_v12 }
 0xe20   :  { %v5252_v4 = vsub.f32 %v2499_v40, %v2533_v2  ;;  %2559 = vadd.xlane.f32.xlu0 %v2547_v49  ;;  %v2550_v6 = vmul.f32 %v5248_v0, %v5248_v0  ;;  %4489 = vmatpush3.msra.mxu1 %v2651_v12 }
 0xe21   :  { %4490 = vmatprep.subr.mxu1 %v2650_v35 }
 0xe22   :  { %2565 = vadd.xlane.f32.xlu1 %v2550_v6  ;;  %v2549_v9 = vmul.f32 %v5252_v4, %v5252_v4  ;;  %4491 = vmatpush3.msra.mxu1 %v2650_v35  ;;  %v2646_v35 = vld [vmem:[%s5274_s12 + $0x18] sm:$0xff] }
 0xe23   :  { %4492 = vmatprep.subr.mxu1 %v2649_v36 }
 0xe24   :  { %2563 = vadd.xlane.f32.xlu0 %v2549_v9  ;;  %4493 = vmatpush3.msra.mxu1 %v2649_v36  ;;  %v3334_v9 = vld [vmem:[%s5087_s8 + $0x1] ss:$0 sm:$0xff]  ;;  %v2644_v36 = vld [vmem:[%s5274_s12 + $0x8] sm:$0xff] }
 0xe25   :  { %4494 = vmatprep.subr.mxu1 %v2648_v37 }
 0xe26   :  { %4495 = vmatpush3.msra.mxu1 %v2648_v37  ;;  %v2674_v37 = vld [vmem:[%s5305_s17 + $0x78] sm:$0xff] }
 0xe27   :  { %4496 = vmatprep.subr.mxu1 %v2647_v16  ;;  %4518 = vmatprep.subr.mxu0 %v2674_v37 }
 0xe28   :  { %4497 = vmatpush3.msra.mxu1 %v2647_v16  ;;  %v2673_v16 = vld [vmem:[%s5305_s17 + $0x70] sm:$0xff] }
 0xe29   :  { %4498 = vmatprep.subr.mxu1 %v2646_v35 }
 0xe2a   :  { %4499 = vmatpush3.msra.mxu1 %v2646_v35 }
 0xe9f   :  { %v2554_v38 = vpop.xlane.xlu1 %2553 }
 0xea0   :  { %v2568_v39 = vmul.f32 0.0078125, %v2554_v38  ;;  %v2672_v38 = vld [vmem:[%s5305_s17 + $0x68] sm:$0xff] }
 0xea1   :  { %v2552_v20 = vpop.xlane.xlu0 %2551 }
 0xea2   :  { %v2576_v40 = vadd.f32 1e-05, %v2568_v39  ;;  %v2567_v42 = vmul.f32 0.0078125, %v2552_v20  ;;  %v2671_v39 = vld [vmem:[%s5305_s17 + $0x60] sm:$0xff]  ;;  %v2670_v20 = vld [vmem:[%s5305_s17 + $0x58] sm:$0xff] }
 0xea3   :  { %v2558_v24 = vpop.xlane.xlu1 %2557 }
 0xea4   :  { %4669 = vrsqrt.f32 %v2576_v40  ;;  %v2575_v43 = vadd.f32 1e-05, %v2567_v42  ;;  %v2570_v45 = vmul.f32 0.0078125, %v2558_v24  ;;  %v2669_v40 = vld [vmem:[%s5305_s17 + $0x50] sm:$0xff]  ;;  %v2668_v42 = vld [vmem:[%s5305_s17 + $0x48] sm:$0xff]  ;;  %v2667_v24 = vld [vmem:[%s5305_s17 + $0x40] sm:$0xff] }
 0xea5   :  { %v2556_v28 = vpop.xlane.xlu0 %2555 }
 0xea6   :  { %4671 = vrsqrt.f32 %v2575_v43  ;;  %v2578_v46 = vadd.f32 1e-05, %v2570_v45  ;;  %v2569_v50 = vmul.f32 0.0078125, %v2556_v28  ;;  %v2666_v43 = vld [vmem:[%s5305_s17 + $0x38] sm:$0xff]  ;;  %v2665_v45 = vld [vmem:[%s5305_s17 + $0x30] sm:$0xff]  ;;  %v2664_v28 = vld [vmem:[%s5305_s17 + $0x28] sm:$0xff] }
 0xea7   :  { %v2562_v51 = vpop.xlane.xlu1 %2561 }
 0xea8   :  { %4673 = vrsqrt.f32 %v2578_v46  ;;  %v2577_v52 = vadd.f32 1e-05, %v2569_v50  ;;  %v2572_v53 = vmul.f32 0.0078125, %v2562_v51  ;;  %v2663_v46 = vld [vmem:[%s5305_s17 + $0x20] sm:$0xff] }
 0xea9   :  { %v2560_v54 = vpop.xlane.xlu0 %2559  ;;  %v3335_v50 = vld [vmem:[%s3198_s21] ss:$0 sm:$0xff] }
 0xeaa   :  { %4675 = vrsqrt.f32 %v2577_v52  ;;  %v2580_v56 = vadd.f32 1e-05, %v2572_v53  ;;  %v2571_v30 = vmul.f32 0.0078125, %v2560_v54 }
 0xeab   :  { %v2566_v57 = vpop.xlane.xlu1 %2565 }
 0xeac   :  { %4677 = vrsqrt.f32 %v2580_v56  ;;  %v2579_v58 = vadd.f32 1e-05, %v2571_v30  ;;  %v2574_v59 = vmul.f32 0.0078125, %v2566_v57 }
 0xead   :  { %v2564_v34 = vpop.xlane.xlu0 %2563 }
 0xeae   :  { %4679 = vrsqrt.f32 %v2579_v58  ;;  %v2582_v41 = vadd.f32 1e-05, %v2574_v59  ;;  %v2573_v60 = vmul.f32 0.0078125, %v2564_v34 }
 0xeb0   :  { %4681 = vrsqrt.f32 %v2582_v41  ;;  %v2581_v61 = vadd.f32 1e-05, %v2573_v60 }
 0xeb1   :  { %v4670_v44 = vpop.eup %4669 }
 0xeb2   :  { %v2592_v62 = vmul.f32 %v4670_v44, %v5226_v47  ;;  %4683 = vrsqrt.f32 %v2581_v61 }
 0xeb3   :  { %v4672_v2 = vpop.eup %4671 }
 0xeb4   :  { %v2591_v49 = vmul.f32 %v4672_v2, %v5228_v26  ;;  %v2606_v7 = vmul.f32 %v3333_v63, %v2592_v62 }
 0xeb5   :  { %v4674_v6 = vpop.eup %4673 }
 0xeb6   :  { %v2605_v10 = vmul.f32 %v3333_v63, %v2591_v49  ;;  %v2594_v11 = vmul.f32 %v4674_v6, %v5232_v55  ;;  %v2620_v18 = vadd.f32 %v3334_v9, %v2606_v7 }
 0xeb7   :  { %v4676_v13 = vpop.eup %4675 }
 0xeb8   :  { %v2619_v14 = vadd.f32 %v3334_v9, %v2605_v10  ;;  %v2593_v15 = vmul.f32 %v4676_v13, %v5236_v33  ;;  %v2608_v19 = vmul.f32 %v3333_v63, %v2594_v11 }
 0xeb9   :  { %v4678_v17 = vpop.eup %4677 }
 0xeba   :  { %4462 = vmatprep.mubr.f32.mxu0 %v2619_v14  ;;  %v2607_v47 = vmul.f32 %v3333_v63, %v2593_v15  ;;  %v2596_v21 = vmul.f32 %v4678_v17, %v5240_v5  ;;  %v2622_v1 = vadd.f32 %v3334_v9, %v2608_v19  ;;  %v2662_v14 = vld [vmem:[%s5305_s17 + $0x18] sm:$0xff]  ;;  %v2661_v15 = vld [vmem:[%s5305_s17 + $0x10] sm:$0xff]  ;;  %v2660_v17 = vld [vmem:[%s5305_s17 + $0x8] sm:$0xff] }
 0xebb   :  { %v4680_v22 = vpop.eup %4679  ;;  %4463 = vmatmul.mubr.f32.vlgmr.msra.gmra.mxu0 %v2620_v18  ;;  %v2659_v18 = vld [vmem:[%s5305_s17] sm:$0xff]  ;;  %v2690_v19 = vld [vmem:[%s5329_s25 + $0x78] sm:$0xff] }
 0xebc   :  { %v2621_v26 = vadd.f32 %v3334_v9, %v2607_v47  ;;  %v2595_v23 = vmul.f32 %v4680_v22, %v5244_v48  ;;  %v2610_v3 = vmul.f32 %v3333_v63, %v2596_v21  ;;  %4519 = vmatpush3.msra.mxu0 %v2674_v37  ;;  %v2689_v47 = vld [vmem:[%s5329_s25 + $0x70] sm:$0xff]  ;;  %v2688_v21 = vld [vmem:[%s5329_s25 + $0x68] sm:$0xff]  ;;  %v2687_v22 = vld [vmem:[%s5329_s25 + $0x60] sm:$0xff] }
 0xebd   :  { %v4682_v25 = vpop.eup %4681  ;;  %4520 = vmatprep.subr.mxu0 %v2673_v16 }
 0xebe   :  { %4465 = vmatprep.mubr.f32.mxu0 %v2621_v26  ;;  %v2609_v55 = vmul.f32 %v3333_v63, %v2595_v23  ;;  %v2598_v33 = vmul.f32 %v4682_v25, %v5248_v0  ;;  %v2624_v5 = vadd.f32 %v3334_v9, %v2610_v3  ;;  %v2645_v0 = vld [vmem:[%s5274_s12 + $0x10] sm:$0xff]  ;;  %4521 = vmatpush3.msra.mxu0 %v2673_v16  ;;  %v2686_v26 = vld [vmem:[%s5329_s25 + $0x58] sm:$0xff]  ;;  %v2684_v25 = vld [vmem:[%s5329_s25 + $0x48] sm:$0xff] }
 0xebf   :  { %v4684_v27 = vpop.eup %4683  ;;  %4466 = vmatmul.mubr.f32.gmra.mxu0 %v2622_v1  ;;  %4500 = vmatprep.subr.mxu1 %v2645_v0  ;;  %v2685_v23 = vld [vmem:[%s5329_s25 + $0x50] sm:$0xff]  ;;  %v2683_v1 = vld [vmem:[%s5329_s25 + $0x40] sm:$0xff]  ;;  %v2682_v3 = vld [vmem:[%s5329_s25 + $0x38] sm:$0xff] }
 0xec0   :  { %v2623_v29 = vadd.f32 %v3334_v9, %v2609_v55  ;;  %v2597_v31 = vmul.f32 %v4684_v27, %v5252_v4  ;;  %v2612_v8 = vmul.f32 %v3333_v63, %v2598_v33  ;;  %4501 = vmatpush3.msra.mxu1 %v2645_v0  ;;  %v2643_v4 = vld [vmem:[%s5274_s12] sm:$0xff]  ;;  %4522 = vmatprep.subr.mxu0 %v2672_v38  ;;  %v2681_v55 = vld [vmem:[%s5329_s25 + $0x30] sm:$0xff]  ;;  %v2680_v33 = vld [vmem:[%s5329_s25 + $0x28] sm:$0xff] }
 0xec1   :  { %4502 = vmatprep.subr.mxu1 %v2644_v36  ;;  %4523 = vmatpush3.msra.mxu0 %v2672_v38  ;;  %v2679_v27 = vld [vmem:[%s5329_s25 + $0x20] sm:$0xff] }
 0xec2   :  { %4468 = vmatprep.mubr.f32.mxu0 %v2623_v29  ;;  %v2611_v48 = vmul.f32 %v3333_v63, %v2597_v31  ;;  %v2626_v12 = vadd.f32 %v3334_v9, %v2612_v8  ;;  %4503 = vmatpush3.msra.mxu1 %v2644_v36  ;;  %v3336_v29 = vld [vmem:[%s3200_s30] ss:$0 sm:$0xff] }
 0xec3   :  { %4469 = vmatmul.mubr.f32.gmra.mxu0 %v2624_v5  ;;  %4504 = vmatprep.subr.mxu1 %v2643_v4 }
 0xec4   :  { %v2625_v32 = vadd.f32 %v3334_v9, %v2611_v48  ;;  %4505 = vmatpush3.msra.mxu1 %v2643_v4  ;;  %4524 = vmatprep.subr.mxu0 %v2671_v39 }
 0xec5   :  { %4525 = vmatpush3.msra.mxu0 %v2671_v39  ;;  %4562 = vmatprep.subr.mxu1 %v2690_v19 }
 0xec6   :  { %4471 = vmatprep.mubr.f32.mxu0 %v2625_v32  ;;  %4526 = vmatprep.subr.mxu0 %v2670_v20 }
 0xec7   :  { %4472 = vmatmul.mubr.f32.gmra.mxu0 %v2626_v12 }
 0xec8   :  { %4527 = vmatpush3.msra.mxu0 %v2670_v20 }
 0xec9   :  { %4528 = vmatprep.subr.mxu0 %v2669_v40 }
 0xeca   :  { %4529 = vmatpush3.msra.mxu0 %v2669_v40 }
 0xecb   :  { %4530 = vmatprep.subr.mxu0 %v2668_v42 }
 0xecc   :  { %4531 = vmatpush3.msra.mxu0 %v2668_v42 }
 0xecd   :  { %4532 = vmatprep.subr.mxu0 %v2667_v24 }
 0xece   :  { %4533 = vmatpush3.msra.mxu0 %v2667_v24 }
 0xecf   :  { %4534 = vmatprep.subr.mxu0 %v2666_v43 }
 0xed0   :  { %4535 = vmatpush3.msra.mxu0 %v2666_v43 }
 0xed1   :  { %4536 = vmatprep.subr.mxu0 %v2665_v45 }
 0xed2   :  { %4537 = vmatpush3.msra.mxu0 %v2665_v45 }
 0xed3   :  { %4538 = vmatprep.subr.mxu0 %v2664_v28 }
 0xed4   :  { %4539 = vmatpush3.msra.mxu0 %v2664_v28 }
 0xed5   :  { %4540 = vmatprep.subr.mxu0 %v2663_v46 }
 0xed6   :  { %4541 = vmatpush3.msra.mxu0 %v2663_v46 }
 0xed7   :  { %4542 = vmatprep.subr.mxu0 %v2662_v14 }
 0xed8   :  { %4543 = vmatpush3.msra.mxu0 %v2662_v14 }
 0xed9   :  { %4544 = vmatprep.subr.mxu0 %v2661_v15 }
 0xeda   :  { %4545 = vmatpush3.msra.mxu0 %v2661_v15 }
 0xedb   :  { %4546 = vmatprep.subr.mxu0 %v2660_v17 }
 0xedc   :  { %4547 = vmatpush3.msra.mxu0 %v2660_v17 }
 0xedd   :  { %4548 = vmatprep.subr.mxu0 %v2659_v18 }
 0xede   :  { %4549 = vmatpush3.msra.mxu0 %v2659_v18 }
 0xf7b   :  { %v4464_v51 = vpop.f32.mrf.mxu0 }
 0xf7c   :  { %v2773_v52 = vadd.f32 %v4464_v51, %v3335_v50 }
 0xf7d   :  { %v2767_v53 = vpop.f32.mrf.mxu0 }
 0xf7e   :  { %v2768_v54 = vadd.f32 %v3335_v50, %v2767_v53  ;;  %v2807_v57 = vmax.f32 %v2773_v52, 0.0  ;;  %v2678_v52 = vld [vmem:[%s5329_s25 + $0x18] sm:$0xff]  ;;  %v2677_v53 = vld [vmem:[%s5329_s25 + $0x10] sm:$0xff] }
 0xf7f   :  { %v4467_v56 = vpop.f32.mrf.mxu0 }
 0xf80   :  { %v2806_v30 = vmax.f32 %v2768_v54, 0.0  ;;  %v2783_v58 = vadd.f32 %v4467_v56, %v3335_v50  ;;  %v2676_v54 = vld [vmem:[%s5329_s25 + $0x8] sm:$0xff]  ;;  %v2675_v56 = vld [vmem:[%s5329_s25] sm:$0xff] }
 0xf81   :  { %v2777_v59 = vpop.f32.mrf.mxu0 }
 0xf82   :  { %v2778_v34 = vadd.f32 %v3335_v50, %v2777_v59  ;;  %4506 = vmatprep.mubr.f32.mxu1 %v2806_v30  ;;  %v2809_v61 = vmax.f32 %v2783_v58, 0.0  ;;  %v3337_v30 = vld [vmem:[%s3202_s6] ss:$0 sm:$0xff] }
 0xf83   :  { %v4470_v41 = vpop.f32.mrf.mxu0  ;;  %4507 = vmatmul.mubr.f32.vlgmr.msra.gmra.mxu1 %v2807_v57 }
 0xf84   :  { %v2808_v60 = vmax.f32 %v2778_v34, 0.0  ;;  %v2793_v44 = vadd.f32 %v4470_v41, %v3335_v50  ;;  %4563 = vmatpush3.msra.mxu1 %v2690_v19 }
 0xf85   :  { %v2787_v62 = vpop.f32.mrf.mxu0  ;;  %4564 = vmatprep.subr.mxu1 %v2689_v47 }
 0xf86   :  { %v2788_v63 = vadd.f32 %v3335_v50, %v2787_v62  ;;  %4509 = vmatprep.mubr.f32.mxu1 %v2808_v60  ;;  %v2811_v6 = vmax.f32 %v2793_v44, 0.0  ;;  %4565 = vmatpush3.msra.mxu1 %v2689_v47 }
 0xf87   :  { %v4473_v2 = vpop.f32.mrf.mxu0  ;;  %4510 = vmatmul.mubr.f32.gmra.mxu1 %v2809_v61  ;;  %4566 = vmatprep.subr.mxu1 %v2688_v21 }
 0xf88   :  { %v2810_v49 = vmax.f32 %v2788_v63, 0.0  ;;  %v2803_v7 = vadd.f32 %v4473_v2, %v3335_v50  ;;  %4567 = vmatpush3.msra.mxu1 %v2688_v21  ;;  %v3338_v21 = vld [vmem:[%s3204_s15] ss:$0 sm:$0xff] }
 0xf89   :  { %v2797_v9 = vpop.f32.mrf.mxu0  ;;  %4568 = vmatprep.subr.mxu1 %v2687_v22 }
 0xf8a   :  { %v2798_v10 = vadd.f32 %v3335_v50, %v2797_v9  ;;  %4512 = vmatprep.mubr.f32.mxu1 %v2810_v49  ;;  %v2813_v13 = vmax.f32 %v2803_v7, 0.0  ;;  %4569 = vmatpush3.msra.mxu1 %v2687_v22 }
 0xf8b   :  { %4513 = vmatmul.mubr.f32.gmra.mxu1 %v2811_v6  ;;  %4570 = vmatprep.subr.mxu1 %v2686_v26 }
 0xf8c   :  { %v2812_v11 = vmax.f32 %v2798_v10, 0.0  ;;  %4571 = vmatpush3.msra.mxu1 %v2686_v26 }
 0xf8d   :  { %4572 = vmatprep.subr.mxu1 %v2685_v23 }
 0xf8e   :  { %4515 = vmatprep.mubr.f32.mxu1 %v2812_v11  ;;  %4573 = vmatpush3.msra.mxu1 %v2685_v23 }
 0xf8f   :  { %4516 = vmatmul.mubr.f32.gmra.mxu1 %v2813_v13  ;;  %4574 = vmatprep.subr.mxu1 %v2684_v25 }
 0xf90   :  { %4575 = vmatpush3.msra.mxu1 %v2684_v25 }
 0xf91   :  { %4576 = vmatprep.subr.mxu1 %v2683_v1 }
 0xf92   :  { %4577 = vmatpush3.msra.mxu1 %v2683_v1 }
 0xf93   :  { %4578 = vmatprep.subr.mxu1 %v2682_v3 }
 0xf94   :  { %4579 = vmatpush3.msra.mxu1 %v2682_v3 }
 0xf95   :  { %4580 = vmatprep.subr.mxu1 %v2681_v55 }
 0xf96   :  { %4581 = vmatpush3.msra.mxu1 %v2681_v55 }
 0xf97   :  { %4582 = vmatprep.subr.mxu1 %v2680_v33 }
 0xf98   :  { %4583 = vmatpush3.msra.mxu1 %v2680_v33 }
 0xf99   :  { %4584 = vmatprep.subr.mxu1 %v2679_v27 }
 0xf9a   :  { %4585 = vmatpush3.msra.mxu1 %v2679_v27 }
 0xf9b   :  { %4586 = vmatprep.subr.mxu1 %v2678_v52 }
 0xf9c   :  { %4587 = vmatpush3.msra.mxu1 %v2678_v52 }
 0xf9d   :  { %4588 = vmatprep.subr.mxu1 %v2677_v53 }
 0xf9e   :  { %4589 = vmatpush3.msra.mxu1 %v2677_v53 }
 0xf9f   :  { %4590 = vmatprep.subr.mxu1 %v2676_v54 }
 0xfa0   :  { %4591 = vmatpush3.msra.mxu1 %v2676_v54 }
 0xfa1   :  { %4592 = vmatprep.subr.mxu1 %v2675_v56 }
 0xfa2   :  { %4593 = vmatpush3.msra.mxu1 %v2675_v56 }
0x1043   :  { %v4508_v31 = vpop.f32.mrf.mxu1 }
0x1044   :  { %v2892_v5 = vadd.f32 %v4508_v31, %v3336_v29 }
0x1045   :  { %v2886_v8 = vpop.f32.mrf.mxu1 }
0x1046   :  { %v2887_v48 = vadd.f32 %v3336_v29, %v2886_v8  ;;  %v2926_v35 = vmax.f32 %v2892_v5, 0.0 }
0x1047   :  { %v4511_v32 = vpop.f32.mrf.mxu1 }
0x1048   :  { %v2925_v12 = vmax.f32 %v2887_v48, 0.0  ;;  %v2902_v0 = vadd.f32 %v4511_v32, %v3336_v29 }
0x1049   :  { %v2896_v36 = vpop.f32.mrf.mxu1 }
0x104a   :  { %v2897_v4 = vadd.f32 %v3336_v29, %v2896_v36  ;;  %4550 = vmatprep.mubr.f32.mxu0 %v2925_v12  ;;  %v2928_v38 = vmax.f32 %v2902_v0, 0.0 }
0x104b   :  { %v4514_v37 = vpop.f32.mrf.mxu1  ;;  %4551 = vmatmul.mubr.f32.vlgmr.msra.gmra.mxu0 %v2926_v35 }
0x104c   :  { %v2927_v16 = vmax.f32 %v2897_v4, 0.0  ;;  %v2912_v39 = vadd.f32 %v4514_v37, %v3336_v29 }
0x104d   :  { %v2906_v20 = vpop.f32.mrf.mxu1 }
0x104e   :  { %v2907_v40 = vadd.f32 %v3336_v29, %v2906_v20  ;;  %4553 = vmatprep.mubr.f32.mxu0 %v2927_v16  ;;  %v2930_v43 = vmax.f32 %v2912_v39, 0.0 }
0x104f   :  { %v4517_v42 = vpop.f32.mrf.mxu1  ;;  %4554 = vmatmul.mubr.f32.gmra.mxu0 %v2928_v38 }
0x1050   :  { %v2929_v24 = vmax.f32 %v2907_v40, 0.0  ;;  %v2922_v45 = vadd.f32 %v4517_v42, %v3336_v29 }
0x1051   :  { %v2916_v28 = vpop.f32.mrf.mxu1 }
0x1052   :  { %v2917_v46 = vadd.f32 %v3336_v29, %v2916_v28  ;;  %4556 = vmatprep.mubr.f32.mxu0 %v2929_v24  ;;  %v2932_v51 = vmax.f32 %v2922_v45, 0.0 }
0x1053   :  { %4557 = vmatmul.mubr.f32.gmra.mxu0 %v2930_v43 }
0x1054   :  { %v2931_v50 = vmax.f32 %v2917_v46, 0.0 }
0x1056   :  { %4559 = vmatprep.mubr.f32.mxu0 %v2931_v50 }
0x1057   :  { %4560 = vmatmul.mubr.f32.gmra.mxu0 %v2932_v51 }
0x110b   :  { %v4552_v57 = vpop.f32.mrf.mxu0 }
0x110c   :  { %v3011_v58 = vadd.f32 %v4552_v57, %v3337_v30 }
0x110d   :  { %v3005_v59 = vpop.f32.mrf.mxu0 }
0x110e   :  { %v3006_v34 = vadd.f32 %v3337_v30, %v3005_v59  ;;  %v3045_v61 = vmax.f32 %v3011_v58, 0.0 }
0x110f   :  { %v4555_v41 = vpop.f32.mrf.mxu0 }
0x1110   :  { %v3044_v60 = vmax.f32 %v3006_v34, 0.0  ;;  %v3021_v44 = vadd.f32 %v4555_v41, %v3337_v30 }
0x1111   :  { %v3015_v62 = vpop.f32.mrf.mxu0 }
0x1112   :  { %v3016_v63 = vadd.f32 %v3337_v30, %v3015_v62  ;;  %4594 = vmatprep.mubr.f32.mxu1 %v3044_v60  ;;  %v3047_v6 = vmax.f32 %v3021_v44, 0.0 }
0x1113   :  { %v4558_v2 = vpop.f32.mrf.mxu0  ;;  %4595 = vmatmul.mubr.f32.vlgmr.msra.gmra.mxu1 %v3045_v61 }
0x1114   :  { %v3046_v49 = vmax.f32 %v3016_v63, 0.0  ;;  %v3031_v7 = vadd.f32 %v4558_v2, %v3337_v30 }
0x1115   :  { %v3025_v9 = vpop.f32.mrf.mxu0 }
0x1116   :  { %v3026_v10 = vadd.f32 %v3337_v30, %v3025_v9  ;;  %4597 = vmatprep.mubr.f32.mxu1 %v3046_v49  ;;  %v3049_v14 = vmax.f32 %v3031_v7, 0.0 }
0x1117   :  { %v4561_v11 = vpop.f32.mrf.mxu0  ;;  %4598 = vmatmul.mubr.f32.gmra.mxu1 %v3047_v6 }
0x1118   :  { %v3048_v13 = vmax.f32 %v3026_v10, 0.0  ;;  %v3041_v15 = vadd.f32 %v4561_v11, %v3337_v30 }
0x1119   :  { %v3035_v17 = vpop.f32.mrf.mxu0 }
0x111a   :  { %v3036_v18 = vadd.f32 %v3337_v30, %v3035_v17  ;;  %4600 = vmatprep.mubr.f32.mxu1 %v3048_v13  ;;  %v3051_v47 = vmax.f32 %v3041_v15, 0.0 }
0x111b   :  { %4601 = vmatmul.mubr.f32.gmra.mxu1 %v3049_v14 }
0x111c   :  { %v3050_v19 = vmax.f32 %v3036_v18, 0.0 }
0x111e   :  { %4603 = vmatprep.mubr.f32.mxu1 %v3050_v19 }
0x111f   :  { %4604 = vmatmul.mubr.f32.gmra.mxu1 %v3051_v47 }
0x11d3   :  { %v4596_v22 = vpop.f32.mrf.mxu1 }
0x11d4   :  { %v3130_v26 = vadd.f32 %v4596_v22, %v3338_v21 }
0x11d5   :  { %v3124_v23 = vpop.f32.mrf.mxu1 }
0x11d6   :  { %3164 = vst [vmem:[%s3205_s9 + $0x8] sm:$0xff] %v3130_v26  ;;  %v3125_v25 = vadd.f32 %v3338_v21, %v3124_v23 }
0x11d7   :  { %v4599_v1 = vpop.f32.mrf.mxu1 }
0x11d8   :  { %3163 = vst [vmem:[%s3205_s9] sm:$0xff] %v3125_v25  ;;  %v3140_v3 = vadd.f32 %v4599_v1, %v3338_v21 }
0x11d9   :  { %v3134_v55 = vpop.f32.mrf.mxu1 }
0x11da   :  { %3166 = vst [vmem:[%s3205_s9 + $0x18] sm:$0xff] %v3140_v3  ;;  %v3135_v33 = vadd.f32 %v3338_v21, %v3134_v55 }
0x11db   :  { %v4602_v27 = vpop.f32.mrf.mxu1 }
0x11dc   :  { %3165 = vst [vmem:[%s3205_s9 + $0x10] sm:$0xff] %v3135_v33  ;;  %v3150_v29 = vadd.f32 %v4602_v27, %v3338_v21 }
0x11dd   :  { %v3144_v31 = vpop.f32.mrf.mxu1 }
0x11de   :  { %3168 = vst [vmem:[%s3205_s9 + $0x28] sm:$0xff] %v3150_v29  ;;  %v3145_v5 = vadd.f32 %v3338_v21, %v3144_v31 }
0x11df   :  { %v4605_v8 = vpop.f32.mrf.mxu1 }
0x11e0   :  { %3167 = vst [vmem:[%s3205_s9 + $0x20] sm:$0xff] %v3145_v5  ;;  %v3160_v48 = vadd.f32 %v4605_v8, %v3338_v21 }
0x11e1   :  { %v3154_v32 = vpop.f32.mrf.mxu1 }
0x11e2   :  { %3170 = vst [vmem:[%s3205_s9 + $0x38] sm:$0xff] %v3160_v48  ;;  %v3155_v12 = vadd.f32 %v3338_v21, %v3154_v32 }
0x11e4   :  { %3169 = vst [vmem:[%s3205_s9 + $0x30] sm:$0xff] %v3155_v12 }

</bundles_post_ra>
